<compile_context>
chip_gen: v7x
topology: tpu7x:2x2x1
jax: 0.10.0
libtpu: 0.0.40
codegen_flags: <defaults>
</compile_context>

<pallas_src>
import functools

import numpy as np
import jax
import jax.numpy as jnp
from jax import lax
from jax.experimental import pallas as pl
from jax.experimental.pallas import tpu as pltpu


# --------------------------------------------------------------------------
# Host-side, one-time weight preparation (outside jit)
# --------------------------------------------------------------------------

def _build_selection(h_in, w_in, ks, stride, pad):
    """0/1 matrices S[t]:(HWout,HWin) with (S[t] @ X)[p,c] == x_pad[tap t of p, c]."""
    h_out = (h_in + 2 * pad - ks) // stride + 1
    w_out = (w_in + 2 * pad - ks) // stride + 1
    s = np.zeros((ks * ks, h_out * w_out, h_in * w_in), np.float32)
    for di in range(ks):
        for dj in range(ks):
            t = di * ks + dj
            for ho in range(h_out):
                hi = ho * stride + di - pad
                if hi < 0 or hi >= h_in:
                    continue
                for wo in range(w_out):
                    wi = wo * stride + dj - pad
                    if 0 <= wi < w_in:
                        s[t, ho * w_out + wo, hi * w_in + wi] = 1.0
    return s, h_out, w_out


def init_weights(key, params_spec):
    """Raw PyTorch-layout weights (conv OIHW, BN stats, Linear stored as (in,out))."""
    convs = []
    for (ni, nf, ks, stride) in params_spec[:-1]:
        key, k1, k2, k3, k4, k5 = jax.random.split(key, 6)
        w = 0.1 * jax.random.normal(k1, (nf, ni, ks, ks), jnp.float32)
        b = jnp.zeros((nf,), jnp.float32)                       # conv bias=False under BN
        gamma = 1.0 + 0.1 * jax.random.normal(k2, (nf,), jnp.float32)
        beta = 0.1 * jax.random.normal(k3, (nf,), jnp.float32)
        rmean = 0.1 * jax.random.normal(k4, (nf,), jnp.float32)
        rvar = 1.0 + 0.1 * jnp.abs(jax.random.normal(k5, (nf,), jnp.float32))
        convs.append((w, b, gamma, beta, rmean, rvar))
    ni, nf = params_spec[-1]
    key, k1, k2 = jax.random.split(key, 3)
    fc_w = 0.1 * jax.random.normal(k1, (ni, nf), jnp.float32)   # (in, out)
    fc_b = 0.1 * jax.random.normal(k2, (nf,), jnp.float32)
    return {"convs": convs, "fc_w": fc_w, "fc_b": fc_b}


def prepare_weights(weights, params_spec, in_hw, eps=1e-5):
    """Fold BN, repack conv weights per-tap, build spatial selection matrices.

    Done ONCE outside the jitted forward.  Note: the selection matrices are
    specialized to the input spatial size (the conv stack itself is static
    anyway; only AdaptiveConcatPool would tolerate other sizes).
    """
    h, w = in_hw
    convs = []
    for (cw, cb, gamma, beta, rmean, rvar), spec in zip(weights["convs"], params_spec[:-1]):
        ni, nf, ks, stride = spec
        pad = ks // 2
        scale = gamma / jnp.sqrt(rvar + eps)
        w_f = cw * scale[:, None, None, None]                   # (nf, ni, ks, ks)
        b_f = (cb - rmean) * scale + beta                       # (nf,)
        taps = jnp.transpose(w_f, (2, 3, 1, 0)).reshape(ks * ks, ni, nf)   # (t, ci, co)
        s_np, h, w = _build_selection(h, w, ks, stride, pad)
        convs.append((jnp.asarray(s_np), taps, b_f.reshape(1, nf)))
    c_last = params_spec[-2][1]
    fc_in, fc_out = params_spec[-1]
    assert fc_in == 2 * c_last, (fc_in, c_last)
    fc_w = weights["fc_w"]
    return {
        "convs": convs,
        "fcw_mx": fc_w[:c_last, :],          # rows multiplying the max-pooled features
        "fcw_av": fc_w[c_last:, :],          # rows multiplying the avg-pooled features
        "fcb": weights["fc_b"].reshape(1, fc_out),
    }


# --------------------------------------------------------------------------
# Fused Pallas kernel: whole network per image (grid over batch)
# --------------------------------------------------------------------------

def _face_kernel(*refs, num_layers):
    x_ref = refs[0]                                   # (HW_in, C_in)
    conv_refs = refs[1:1 + 3 * num_layers]
    fcw_mx_ref = refs[1 + 3 * num_layers]             # (C_last, num_out)
    fcw_av_ref = refs[2 + 3 * num_layers]             # (C_last, num_out)
    fcb_ref = refs[3 + 3 * num_layers]                # (1, num_out)
    o_ref = refs[4 + 3 * num_layers]                  # (1, num_out)

    h = x_ref[...]                                    # activations stay in VMEM/vregs
    for l in range(num_layers):
        s_ref = conv_refs[3 * l]                      # (taps, HW_out, HW_in)
        w_ref = conv_refs[3 * l + 1]                  # (taps, C_in, C_out)
        b_ref = conv_refs[3 * l + 2]                  # (1, C_out)
        taps, hw_out, _ = s_ref.shape
        c_out = w_ref.shape[2]
        acc = jnp.zeros((hw_out, c_out), jnp.float32)
        for t in range(taps):                         # static unroll over the ks*ks taps
            cols = jnp.dot(s_ref[t], h, preferred_element_type=jnp.float32)
            acc = acc + jnp.dot(cols, w_ref[t], preferred_element_type=jnp.float32)
        h = jnp.maximum(acc + b_ref[...], 0.0)        # folded BN bias + ReLU

    # AdaptiveConcatPool2d(1) fused in-kernel: global max & mean over spatial rows.
    mx = jnp.max(h, axis=0, keepdims=True)            # (1, C_last)
    av = jnp.mean(h, axis=0, keepdims=True)           # (1, C_last)
    # fc fused in-kernel; concat avoided by splitting fc weights into two halves.
    out = (jnp.dot(mx, fcw_mx_ref[...], preferred_element_type=jnp.float32)
           + jnp.dot(av, fcw_av_ref[...], preferred_element_type=jnp.float32)
           + fcb_ref[...])
    o_ref[...] = out.astype(o_ref.dtype)


def _broadcast_spec(arr):
    nd = arr.ndim
    return pl.BlockSpec(tuple(arr.shape), lambda n: (0,) * nd)


def face_model_forward(x_nchw, prep):
    """x_nchw: (N, C, H, W) float32 -> (N, num_out) float32."""
    convs = prep["convs"]
    fcw_mx, fcw_av, fcb = prep["fcw_mx"], prep["fcw_av"], prep["fcb"]
    n, c, h, w = x_nchw.shape
    hw = h * w
    num_out = fcb.shape[-1]
    num_layers = len(convs)

    # Single one-time layout change: NCHW -> (N, H*W, C); everything downstream
    # stays in this (spatial-rows, channel-lanes) layout inside the kernel.
    x = jnp.transpose(x_nchw, (0, 2, 3, 1)).reshape(n, hw, c)

    flat_inputs = [x]
    in_specs = [pl.BlockSpec((None, hw, c), lambda i: (i, 0, 0))]
    for (s_mat, taps, bias) in convs:
        for arr in (s_mat, taps, bias):
            flat_inputs.append(arr)
            in_specs.append(_broadcast_spec(arr))
    for arr in (fcw_mx, fcw_av, fcb):
        flat_inputs.append(arr)
        in_specs.append(_broadcast_spec(arr))

    out = pl.pallas_call(
        functools.partial(_face_kernel, num_layers=num_layers),
        out_shape=jax.ShapeDtypeStruct((n, 1, num_out), jnp.float32),
        grid=(n,),
        in_specs=in_specs,
        out_specs=pl.BlockSpec((None, 1, num_out), lambda i: (i, 0, 0)),
        compiler_params=pltpu.CompilerParams(
            dimension_semantics=("parallel",)),   # v7x: batch across both TensorCores
    )(*flat_inputs)
    return out.reshape(n, num_out)


# --------------------------------------------------------------------------
# Pure-JAX reference (for a correctness self-check)
# --------------------------------------------------------------------------

def reference_forward(x, weights, params_spec, eps=1e-5):
    for (cw, cb, gamma, beta, rmean, rvar), spec in zip(weights["convs"], params_spec[:-1]):
        ni, nf, ks, stride = spec
        pad = ks // 2
        y = lax.conv_general_dilated(
            x, cw, window_strides=(stride, stride),
            padding=[(pad, pad), (pad, pad)],
            dimension_numbers=("NCHW", "OIHW", "NCHW"),
            precision=lax.Precision.HIGHEST)
        y = y + cb[None, :, None, None]
        y = (y - rmean[None, :, None, None]) / jnp.sqrt(rvar[None, :, None, None] + eps)
        y = gamma[None, :, None, None] * y + beta[None, :, None, None]
        x = jnp.maximum(y, 0.0)
    mx = jnp.max(x, axis=(2, 3))
    av = jnp.mean(x, axis=(2, 3))
    pooled = jnp.concatenate([mx, av], axis=1)       # fastai order: [max, avg]
    return pooled @ weights["fc_w"] + weights["fc_b"]


if __name__ == "__main__":
    # FaceModel(params=[[3,8,3,2], [8,16,3,2], [16,32,3,2], [64,10]])
    # spatial 16 -> 8 -> 4 -> 2; concat-pool doubles 32 -> 64 features; fc -> 10.
    params_spec = [[3, 8, 3, 2], [8, 16, 3, 2], [16, 32, 3, 2], [64, 10]]

    key = jax.random.PRNGKey(0)
    key, kx = jax.random.split(key)
    x = jax.random.normal(kx, (2, 3, 16, 16), jnp.float32)   # NCHW, like PyTorch

    weights = init_weights(key, params_spec)
    prep = prepare_weights(weights, params_spec, in_hw=(16, 16))   # once, outside jit

    fwd = jax.jit(face_model_forward)
    out = jax.block_until_ready(fwd(x, prep))

    assert out.shape == (2, 10), out.shape
    assert bool(jnp.all(jnp.isfinite(out)))

    # Numerical check against the pure-JAX reference (loose tolerance to allow
    # for MXU reduced-precision f32 matmul passes).
    ref = reference_forward(x, weights, params_spec)
    err = float(jnp.max(jnp.abs(out - ref)))
    assert err < 5e-2, f"max abs error vs reference: {err}"

    print("KERNEL_OK")
</pallas_src>

<mosaic_0001>
module attributes {stable_mosaic.version = 11 : i64} {
  func.func @_face_kernel(%arg0: i32, %arg1: memref<1x256x3xf32, #tpu.memory_space<vmem>>, %arg2: memref<9x64x256xf32, #tpu.memory_space<vmem>>, %arg3: memref<9x3x8xf32, #tpu.memory_space<vmem>>, %arg4: memref<1x8xf32, #tpu.memory_space<vmem>>, %arg5: memref<9x16x64xf32, #tpu.memory_space<vmem>>, %arg6: memref<9x8x16xf32, #tpu.memory_space<vmem>>, %arg7: memref<1x16xf32, #tpu.memory_space<vmem>>, %arg8: memref<9x4x16xf32, #tpu.memory_space<vmem>>, %arg9: memref<9x16x32xf32, #tpu.memory_space<vmem>>, %arg10: memref<1x32xf32, #tpu.memory_space<vmem>>, %arg11: memref<32x10xf32, #tpu.memory_space<vmem>>, %arg12: memref<32x10xf32, #tpu.memory_space<vmem>>, %arg13: memref<1x10xf32, #tpu.memory_space<vmem>>, %arg14: memref<1x1x10xf32, #tpu.memory_space<vmem>>) attributes {dimension_semantics = [#tpu.dimension_semantics<parallel>], iteration_bounds = array<i64: 2>, scalar_prefetch = 0 : i64, scratch_operands = 0 : i64, tpu.core_type = #tpu.core_type<tc>, window_params = [{transform_indices = @transform_0, window_bounds = array<i64: 1, 256, 3>}, {pipeline_mode = #tpu.pipeline_mode<synchronous>, transform_indices = @transform_1, window_bounds = array<i64: 9, 64, 256>}, {pipeline_mode = #tpu.pipeline_mode<synchronous>, transform_indices = @transform_2, window_bounds = array<i64: 9, 3, 8>}, {pipeline_mode = #tpu.pipeline_mode<synchronous>, transform_indices = @transform_3, window_bounds = array<i64: 1, 8>}, {pipeline_mode = #tpu.pipeline_mode<synchronous>, transform_indices = @transform_4, window_bounds = array<i64: 9, 16, 64>}, {pipeline_mode = #tpu.pipeline_mode<synchronous>, transform_indices = @transform_5, window_bounds = array<i64: 9, 8, 16>}, {pipeline_mode = #tpu.pipeline_mode<synchronous>, transform_indices = @transform_6, window_bounds = array<i64: 1, 16>}, {pipeline_mode = #tpu.pipeline_mode<synchronous>, transform_indices = @transform_7, window_bounds = array<i64: 9, 4, 16>}, {pipeline_mode = #tpu.pipeline_mode<synchronous>, transform_indices = @transform_8, window_bounds = array<i64: 9, 16, 32>}, {pipeline_mode = #tpu.pipeline_mode<synchronous>, transform_indices = @transform_9, window_bounds = array<i64: 1, 32>}, {pipeline_mode = #tpu.pipeline_mode<synchronous>, transform_indices = @transform_10, window_bounds = array<i64: 32, 10>}, {pipeline_mode = #tpu.pipeline_mode<synchronous>, transform_indices = @transform_11, window_bounds = array<i64: 32, 10>}, {pipeline_mode = #tpu.pipeline_mode<synchronous>, transform_indices = @transform_12, window_bounds = array<i64: 1, 10>}, {transform_indices = @transform_13, window_bounds = array<i64: 1, 1, 10>}]} {
    %c0 = arith.constant 0 : index
    %c0_0 = arith.constant 0 : index
    %c0_1 = arith.constant 0 : index
    %0 = vector.load %arg1[%c0, %c0_0, %c0_1] : memref<1x256x3xf32, #tpu.memory_space<vmem>>, vector<1x256x3xf32>
    %1 = vector.shape_cast %0 : vector<1x256x3xf32> to vector<256x3xf32>
    %cst = arith.constant 0.000000e+00 : f32
    %2 = vector.broadcast %cst : f32 to vector<64x8xf32>
    %c0_2 = arith.constant 0 : index
    %c0_3 = arith.constant 0 : index
    %c0_4 = arith.constant 0 : index
    %3 = vector.load %arg2[%c0_2, %c0_3, %c0_4] : memref<9x64x256xf32, #tpu.memory_space<vmem>>, vector<1x64x256xf32>
    %4 = vector.shape_cast %3 : vector<1x64x256xf32> to vector<64x256xf32>
    %cst_5 = arith.constant dense<0.000000e+00> : vector<64x3xf32>
    %5 = tpu.matmul %4, %1, %cst_5 {dimension_numbers = #tpu.dot_dimension_numbers<[1], [0], [0], [1], [0, 0, 1, 1], [], []>} : vector<64x256xf32>, vector<256x3xf32>, vector<64x3xf32> -> vector<64x3xf32>
    %c0_6 = arith.constant 0 : index
    %c0_7 = arith.constant 0 : index
    %c0_8 = arith.constant 0 : index
    %6 = vector.load %arg3[%c0_6, %c0_7, %c0_8] : memref<9x3x8xf32, #tpu.memory_space<vmem>>, vector<1x3x8xf32>
    %7 = vector.shape_cast %6 : vector<1x3x8xf32> to vector<3x8xf32>
    %cst_9 = arith.constant dense<0.000000e+00> : vector<64x8xf32>
    %8 = tpu.matmul %5, %7, %cst_9 {dimension_numbers = #tpu.dot_dimension_numbers<[1], [0], [0], [1], [0, 0, 1, 1], [], []>} : vector<64x3xf32>, vector<3x8xf32>, vector<64x8xf32> -> vector<64x8xf32>
    %9 = arith.addf %2, %8 : vector<64x8xf32>
    %c1 = arith.constant 1 : index
    %c0_10 = arith.constant 0 : index
    %c0_11 = arith.constant 0 : index
    %10 = vector.load %arg2[%c1, %c0_10, %c0_11] : memref<9x64x256xf32, #tpu.memory_space<vmem>>, vector<1x64x256xf32>
    %11 = vector.shape_cast %10 : vector<1x64x256xf32> to vector<64x256xf32>
    %cst_12 = arith.constant dense<0.000000e+00> : vector<64x3xf32>
    %12 = tpu.matmul %11, %1, %cst_12 {dimension_numbers = #tpu.dot_dimension_numbers<[1], [0], [0], [1], [0, 0, 1, 1], [], []>} : vector<64x256xf32>, vector<256x3xf32>, vector<64x3xf32> -> vector<64x3xf32>
    %c1_13 = arith.constant 1 : index
    %c0_14 = arith.constant 0 : index
    %c0_15 = arith.constant 0 : index
    %13 = vector.load %arg3[%c1_13, %c0_14, %c0_15] : memref<9x3x8xf32, #tpu.memory_space<vmem>>, vector<1x3x8xf32>
    %14 = vector.shape_cast %13 : vector<1x3x8xf32> to vector<3x8xf32>
    %cst_16 = arith.constant dense<0.000000e+00> : vector<64x8xf32>
    %15 = tpu.matmul %12, %14, %cst_16 {dimension_numbers = #tpu.dot_dimension_numbers<[1], [0], [0], [1], [0, 0, 1, 1], [], []>} : vector<64x3xf32>, vector<3x8xf32>, vector<64x8xf32> -> vector<64x8xf32>
    %16 = arith.addf %9, %15 : vector<64x8xf32>
    %c2 = arith.constant 2 : index
    %c0_17 = arith.constant 0 : index
    %c0_18 = arith.constant 0 : index
    %17 = vector.load %arg2[%c2, %c0_17, %c0_18] : memref<9x64x256xf32, #tpu.memory_space<vmem>>, vector<1x64x256xf32>
    %18 = vector.shape_cast %17 : vector<1x64x256xf32> to vector<64x256xf32>
    %cst_19 = arith.constant dense<0.000000e+00> : vector<64x3xf32>
    %19 = tpu.matmul %18, %1, %cst_19 {dimension_numbers = #tpu.dot_dimension_numbers<[1], [0], [0], [1], [0, 0, 1, 1], [], []>} : vector<64x256xf32>, vector<256x3xf32>, vector<64x3xf32> -> vector<64x3xf32>
    %c2_20 = arith.constant 2 : index
    %c0_21 = arith.constant 0 : index
    %c0_22 = arith.constant 0 : index
    %20 = vector.load %arg3[%c2_20, %c0_21, %c0_22] : memref<9x3x8xf32, #tpu.memory_space<vmem>>, vector<1x3x8xf32>
    %21 = vector.shape_cast %20 : vector<1x3x8xf32> to vector<3x8xf32>
    %cst_23 = arith.constant dense<0.000000e+00> : vector<64x8xf32>
    %22 = tpu.matmul %19, %21, %cst_23 {dimension_numbers = #tpu.dot_dimension_numbers<[1], [0], [0], [1], [0, 0, 1, 1], [], []>} : vector<64x3xf32>, vector<3x8xf32>, vector<64x8xf32> -> vector<64x8xf32>
    %23 = arith.addf %16, %22 : vector<64x8xf32>
    %c3 = arith.constant 3 : index
    %c0_24 = arith.constant 0 : index
    %c0_25 = arith.constant 0 : index
    %24 = vector.load %arg2[%c3, %c0_24, %c0_25] : memref<9x64x256xf32, #tpu.memory_space<vmem>>, vector<1x64x256xf32>
    %25 = vector.shape_cast %24 : vector<1x64x256xf32> to vector<64x256xf32>
    %cst_26 = arith.constant dense<0.000000e+00> : vector<64x3xf32>
    %26 = tpu.matmul %25, %1, %cst_26 {dimension_numbers = #tpu.dot_dimension_numbers<[1], [0], [0], [1], [0, 0, 1, 1], [], []>} : vector<64x256xf32>, vector<256x3xf32>, vector<64x3xf32> -> vector<64x3xf32>
    %c3_27 = arith.constant 3 : index
    %c0_28 = arith.constant 0 : index
    %c0_29 = arith.constant 0 : index
    %27 = vector.load %arg3[%c3_27, %c0_28, %c0_29] : memref<9x3x8xf32, #tpu.memory_space<vmem>>, vector<1x3x8xf32>
    %28 = vector.shape_cast %27 : vector<1x3x8xf32> to vector<3x8xf32>
    %cst_30 = arith.constant dense<0.000000e+00> : vector<64x8xf32>
    %29 = tpu.matmul %26, %28, %cst_30 {dimension_numbers = #tpu.dot_dimension_numbers<[1], [0], [0], [1], [0, 0, 1, 1], [], []>} : vector<64x3xf32>, vector<3x8xf32>, vector<64x8xf32> -> vector<64x8xf32>
    %30 = arith.addf %23, %29 : vector<64x8xf32>
    %c4 = arith.constant 4 : index
    %c0_31 = arith.constant 0 : index
    %c0_32 = arith.constant 0 : index
    %31 = vector.load %arg2[%c4, %c0_31, %c0_32] : memref<9x64x256xf32, #tpu.memory_space<vmem>>, vector<1x64x256xf32>
    %32 = vector.shape_cast %31 : vector<1x64x256xf32> to vector<64x256xf32>
    %cst_33 = arith.constant dense<0.000000e+00> : vector<64x3xf32>
    %33 = tpu.matmul %32, %1, %cst_33 {dimension_numbers = #tpu.dot_dimension_numbers<[1], [0], [0], [1], [0, 0, 1, 1], [], []>} : vector<64x256xf32>, vector<256x3xf32>, vector<64x3xf32> -> vector<64x3xf32>
    %c4_34 = arith.constant 4 : index
    %c0_35 = arith.constant 0 : index
    %c0_36 = arith.constant 0 : index
    %34 = vector.load %arg3[%c4_34, %c0_35, %c0_36] : memref<9x3x8xf32, #tpu.memory_space<vmem>>, vector<1x3x8xf32>
    %35 = vector.shape_cast %34 : vector<1x3x8xf32> to vector<3x8xf32>
    %cst_37 = arith.constant dense<0.000000e+00> : vector<64x8xf32>
    %36 = tpu.matmul %33, %35, %cst_37 {dimension_numbers = #tpu.dot_dimension_numbers<[1], [0], [0], [1], [0, 0, 1, 1], [], []>} : vector<64x3xf32>, vector<3x8xf32>, vector<64x8xf32> -> vector<64x8xf32>
    %37 = arith.addf %30, %36 : vector<64x8xf32>
    %c5 = arith.constant 5 : index
    %c0_38 = arith.constant 0 : index
    %c0_39 = arith.constant 0 : index
    %38 = vector.load %arg2[%c5, %c0_38, %c0_39] : memref<9x64x256xf32, #tpu.memory_space<vmem>>, vector<1x64x256xf32>
    %39 = vector.shape_cast %38 : vector<1x64x256xf32> to vector<64x256xf32>
    %cst_40 = arith.constant dense<0.000000e+00> : vector<64x3xf32>
    %40 = tpu.matmul %39, %1, %cst_40 {dimension_numbers = #tpu.dot_dimension_numbers<[1], [0], [0], [1], [0, 0, 1, 1], [], []>} : vector<64x256xf32>, vector<256x3xf32>, vector<64x3xf32> -> vector<64x3xf32>
    %c5_41 = arith.constant 5 : index
    %c0_42 = arith.constant 0 : index
    %c0_43 = arith.constant 0 : index
    %41 = vector.load %arg3[%c5_41, %c0_42, %c0_43] : memref<9x3x8xf32, #tpu.memory_space<vmem>>, vector<1x3x8xf32>
    %42 = vector.shape_cast %41 : vector<1x3x8xf32> to vector<3x8xf32>
    %cst_44 = arith.constant dense<0.000000e+00> : vector<64x8xf32>
    %43 = tpu.matmul %40, %42, %cst_44 {dimension_numbers = #tpu.dot_dimension_numbers<[1], [0], [0], [1], [0, 0, 1, 1], [], []>} : vector<64x3xf32>, vector<3x8xf32>, vector<64x8xf32> -> vector<64x8xf32>
    %44 = arith.addf %37, %43 : vector<64x8xf32>
    %c6 = arith.constant 6 : index
    %c0_45 = arith.constant 0 : index
    %c0_46 = arith.constant 0 : index
    %45 = vector.load %arg2[%c6, %c0_45, %c0_46] : memref<9x64x256xf32, #tpu.memory_space<vmem>>, vector<1x64x256xf32>
    %46 = vector.shape_cast %45 : vector<1x64x256xf32> to vector<64x256xf32>
    %cst_47 = arith.constant dense<0.000000e+00> : vector<64x3xf32>
    %47 = tpu.matmul %46, %1, %cst_47 {dimension_numbers = #tpu.dot_dimension_numbers<[1], [0], [0], [1], [0, 0, 1, 1], [], []>} : vector<64x256xf32>, vector<256x3xf32>, vector<64x3xf32> -> vector<64x3xf32>
    %c6_48 = arith.constant 6 : index
    %c0_49 = arith.constant 0 : index
    %c0_50 = arith.constant 0 : index
    %48 = vector.load %arg3[%c6_48, %c0_49, %c0_50] : memref<9x3x8xf32, #tpu.memory_space<vmem>>, vector<1x3x8xf32>
    %49 = vector.shape_cast %48 : vector<1x3x8xf32> to vector<3x8xf32>
    %cst_51 = arith.constant dense<0.000000e+00> : vector<64x8xf32>
    %50 = tpu.matmul %47, %49, %cst_51 {dimension_numbers = #tpu.dot_dimension_numbers<[1], [0], [0], [1], [0, 0, 1, 1], [], []>} : vector<64x3xf32>, vector<3x8xf32>, vector<64x8xf32> -> vector<64x8xf32>
    %51 = arith.addf %44, %50 : vector<64x8xf32>
    %c7 = arith.constant 7 : index
    %c0_52 = arith.constant 0 : index
    %c0_53 = arith.constant 0 : index
    %52 = vector.load %arg2[%c7, %c0_52, %c0_53] : memref<9x64x256xf32, #tpu.memory_space<vmem>>, vector<1x64x256xf32>
    %53 = vector.shape_cast %52 : vector<1x64x256xf32> to vector<64x256xf32>
    %cst_54 = arith.constant dense<0.000000e+00> : vector<64x3xf32>
    %54 = tpu.matmul %53, %1, %cst_54 {dimension_numbers = #tpu.dot_dimension_numbers<[1], [0], [0], [1], [0, 0, 1, 1], [], []>} : vector<64x256xf32>, vector<256x3xf32>, vector<64x3xf32> -> vector<64x3xf32>
    %c7_55 = arith.constant 7 : index
    %c0_56 = arith.constant 0 : index
    %c0_57 = arith.constant 0 : index
    %55 = vector.load %arg3[%c7_55, %c0_56, %c0_57] : memref<9x3x8xf32, #tpu.memory_space<vmem>>, vector<1x3x8xf32>
    %56 = vector.shape_cast %55 : vector<1x3x8xf32> to vector<3x8xf32>
    %cst_58 = arith.constant dense<0.000000e+00> : vector<64x8xf32>
    %57 = tpu.matmul %54, %56, %cst_58 {dimension_numbers = #tpu.dot_dimension_numbers<[1], [0], [0], [1], [0, 0, 1, 1], [], []>} : vector<64x3xf32>, vector<3x8xf32>, vector<64x8xf32> -> vector<64x8xf32>
    %58 = arith.addf %51, %57 : vector<64x8xf32>
    %c8 = arith.constant 8 : index
    %c0_59 = arith.constant 0 : index
    %c0_60 = arith.constant 0 : index
    %59 = vector.load %arg2[%c8, %c0_59, %c0_60] : memref<9x64x256xf32, #tpu.memory_space<vmem>>, vector<1x64x256xf32>
    %60 = vector.shape_cast %59 : vector<1x64x256xf32> to vector<64x256xf32>
    %cst_61 = arith.constant dense<0.000000e+00> : vector<64x3xf32>
    %61 = tpu.matmul %60, %1, %cst_61 {dimension_numbers = #tpu.dot_dimension_numbers<[1], [0], [0], [1], [0, 0, 1, 1], [], []>} : vector<64x256xf32>, vector<256x3xf32>, vector<64x3xf32> -> vector<64x3xf32>
    %c8_62 = arith.constant 8 : index
    %c0_63 = arith.constant 0 : index
    %c0_64 = arith.constant 0 : index
    %62 = vector.load %arg3[%c8_62, %c0_63, %c0_64] : memref<9x3x8xf32, #tpu.memory_space<vmem>>, vector<1x3x8xf32>
    %63 = vector.shape_cast %62 : vector<1x3x8xf32> to vector<3x8xf32>
    %cst_65 = arith.constant dense<0.000000e+00> : vector<64x8xf32>
    %64 = tpu.matmul %61, %63, %cst_65 {dimension_numbers = #tpu.dot_dimension_numbers<[1], [0], [0], [1], [0, 0, 1, 1], [], []>} : vector<64x3xf32>, vector<3x8xf32>, vector<64x8xf32> -> vector<64x8xf32>
    %65 = arith.addf %58, %64 : vector<64x8xf32>
    %c0_66 = arith.constant 0 : index
    %c0_67 = arith.constant 0 : index
    %66 = vector.load %arg4[%c0_66, %c0_67] : memref<1x8xf32, #tpu.memory_space<vmem>>, vector<1x8xf32>
    %67 = vector.broadcast %66 : vector<1x8xf32> to vector<64x8xf32>
    %68 = arith.addf %65, %67 : vector<64x8xf32>
    %cst_68 = arith.constant 0.000000e+00 : f32
    %69 = vector.broadcast %cst_68 : f32 to vector<64x8xf32>
    %70 = arith.maximumf %68, %69 : vector<64x8xf32>
    %cst_69 = arith.constant 0.000000e+00 : f32
    %71 = vector.broadcast %cst_69 : f32 to vector<16x16xf32>
    %c0_70 = arith.constant 0 : index
    %c0_71 = arith.constant 0 : index
    %c0_72 = arith.constant 0 : index
    %72 = vector.load %arg5[%c0_70, %c0_71, %c0_72] : memref<9x16x64xf32, #tpu.memory_space<vmem>>, vector<1x16x64xf32>
    %73 = vector.shape_cast %72 : vector<1x16x64xf32> to vector<16x64xf32>
    %cst_73 = arith.constant dense<0.000000e+00> : vector<16x8xf32>
    %74 = tpu.matmul %73, %70, %cst_73 {dimension_numbers = #tpu.dot_dimension_numbers<[1], [0], [0], [1], [0, 0, 1, 1], [], []>} : vector<16x64xf32>, vector<64x8xf32>, vector<16x8xf32> -> vector<16x8xf32>
    %c0_74 = arith.constant 0 : index
    %c0_75 = arith.constant 0 : index
    %c0_76 = arith.constant 0 : index
    %75 = vector.load %arg6[%c0_74, %c0_75, %c0_76] : memref<9x8x16xf32, #tpu.memory_space<vmem>>, vector<1x8x16xf32>
    %76 = vector.shape_cast %75 : vector<1x8x16xf32> to vector<8x16xf32>
    %cst_77 = arith.constant dense<0.000000e+00> : vector<16x16xf32>
    %77 = tpu.matmul %74, %76, %cst_77 {dimension_numbers = #tpu.dot_dimension_numbers<[1], [0], [0], [1], [0, 0, 1, 1], [], []>} : vector<16x8xf32>, vector<8x16xf32>, vector<16x16xf32> -> vector<16x16xf32>
    %78 = arith.addf %71, %77 : vector<16x16xf32>
    %c1_78 = arith.constant 1 : index
    %c0_79 = arith.constant 0 : index
    %c0_80 = arith.constant 0 : index
    %79 = vector.load %arg5[%c1_78, %c0_79, %c0_80] : memref<9x16x64xf32, #tpu.memory_space<vmem>>, vector<1x16x64xf32>
    %80 = vector.shape_cast %79 : vector<1x16x64xf32> to vector<16x64xf32>
    %cst_81 = arith.constant dense<0.000000e+00> : vector<16x8xf32>
    %81 = tpu.matmul %80, %70, %cst_81 {dimension_numbers = #tpu.dot_dimension_numbers<[1], [0], [0], [1], [0, 0, 1, 1], [], []>} : vector<16x64xf32>, vector<64x8xf32>, vector<16x8xf32> -> vector<16x8xf32>
    %c1_82 = arith.constant 1 : index
    %c0_83 = arith.constant 0 : index
    %c0_84 = arith.constant 0 : index
    %82 = vector.load %arg6[%c1_82, %c0_83, %c0_84] : memref<9x8x16xf32, #tpu.memory_space<vmem>>, vector<1x8x16xf32>
    %83 = vector.shape_cast %82 : vector<1x8x16xf32> to vector<8x16xf32>
    %cst_85 = arith.constant dense<0.000000e+00> : vector<16x16xf32>
    %84 = tpu.matmul %81, %83, %cst_85 {dimension_numbers = #tpu.dot_dimension_numbers<[1], [0], [0], [1], [0, 0, 1, 1], [], []>} : vector<16x8xf32>, vector<8x16xf32>, vector<16x16xf32> -> vector<16x16xf32>
    %85 = arith.addf %78, %84 : vector<16x16xf32>
    %c2_86 = arith.constant 2 : index
    %c0_87 = arith.constant 0 : index
    %c0_88 = arith.constant 0 : index
    %86 = vector.load %arg5[%c2_86, %c0_87, %c0_88] : memref<9x16x64xf32, #tpu.memory_space<vmem>>, vector<1x16x64xf32>
    %87 = vector.shape_cast %86 : vector<1x16x64xf32> to vector<16x64xf32>
    %cst_89 = arith.constant dense<0.000000e+00> : vector<16x8xf32>
    %88 = tpu.matmul %87, %70, %cst_89 {dimension_numbers = #tpu.dot_dimension_numbers<[1], [0], [0], [1], [0, 0, 1, 1], [], []>} : vector<16x64xf32>, vector<64x8xf32>, vector<16x8xf32> -> vector<16x8xf32>
    %c2_90 = arith.constant 2 : index
    %c0_91 = arith.constant 0 : index
    %c0_92 = arith.constant 0 : index
    %89 = vector.load %arg6[%c2_90, %c0_91, %c0_92] : memref<9x8x16xf32, #tpu.memory_space<vmem>>, vector<1x8x16xf32>
    %90 = vector.shape_cast %89 : vector<1x8x16xf32> to vector<8x16xf32>
    %cst_93 = arith.constant dense<0.000000e+00> : vector<16x16xf32>
    %91 = tpu.matmul %88, %90, %cst_93 {dimension_numbers = #tpu.dot_dimension_numbers<[1], [0], [0], [1], [0, 0, 1, 1], [], []>} : vector<16x8xf32>, vector<8x16xf32>, vector<16x16xf32> -> vector<16x16xf32>
    %92 = arith.addf %85, %91 : vector<16x16xf32>
    %c3_94 = arith.constant 3 : index
    %c0_95 = arith.constant 0 : index
    %c0_96 = arith.constant 0 : index
    %93 = vector.load %arg5[%c3_94, %c0_95, %c0_96] : memref<9x16x64xf32, #tpu.memory_space<vmem>>, vector<1x16x64xf32>
    %94 = vector.shape_cast %93 : vector<1x16x64xf32> to vector<16x64xf32>
    %cst_97 = arith.constant dense<0.000000e+00> : vector<16x8xf32>
    %95 = tpu.matmul %94, %70, %cst_97 {dimension_numbers = #tpu.dot_dimension_numbers<[1], [0], [0], [1], [0, 0, 1, 1], [], []>} : vector<16x64xf32>, vector<64x8xf32>, vector<16x8xf32> -> vector<16x8xf32>
    %c3_98 = arith.constant 3 : index
    %c0_99 = arith.constant 0 : index
    %c0_100 = arith.constant 0 : index
    %96 = vector.load %arg6[%c3_98, %c0_99, %c0_100] : memref<9x8x16xf32, #tpu.memory_space<vmem>>, vector<1x8x16xf32>
    %97 = vector.shape_cast %96 : vector<1x8x16xf32> to vector<8x16xf32>
    %cst_101 = arith.constant dense<0.000000e+00> : vector<16x16xf32>
    %98 = tpu.matmul %95, %97, %cst_101 {dimension_numbers = #tpu.dot_dimension_numbers<[1], [0], [0], [1], [0, 0, 1, 1], [], []>} : vector<16x8xf32>, vector<8x16xf32>, vector<16x16xf32> -> vector<16x16xf32>
    %99 = arith.addf %92, %98 : vector<16x16xf32>
    %c4_102 = arith.constant 4 : index
    %c0_103 = arith.constant 0 : index
    %c0_104 = arith.constant 0 : index
    %100 = vector.load %arg5[%c4_102, %c0_103, %c0_104] : memref<9x16x64xf32, #tpu.memory_space<vmem>>, vector<1x16x64xf32>
    %101 = vector.shape_cast %100 : vector<1x16x64xf32> to vector<16x64xf32>
    %cst_105 = arith.constant dense<0.000000e+00> : vector<16x8xf32>
    %102 = tpu.matmul %101, %70, %cst_105 {dimension_numbers = #tpu.dot_dimension_numbers<[1], [0], [0], [1], [0, 0, 1, 1], [], []>} : vector<16x64xf32>, vector<64x8xf32>, vector<16x8xf32> -> vector<16x8xf32>
    %c4_106 = arith.constant 4 : index
    %c0_107 = arith.constant 0 : index
    %c0_108 = arith.constant 0 : index
    %103 = vector.load %arg6[%c4_106, %c0_107, %c0_108] : memref<9x8x16xf32, #tpu.memory_space<vmem>>, vector<1x8x16xf32>
    %104 = vector.shape_cast %103 : vector<1x8x16xf32> to vector<8x16xf32>
    %cst_109 = arith.constant dense<0.000000e+00> : vector<16x16xf32>
    %105 = tpu.matmul %102, %104, %cst_109 {dimension_numbers = #tpu.dot_dimension_numbers<[1], [0], [0], [1], [0, 0, 1, 1], [], []>} : vector<16x8xf32>, vector<8x16xf32>, vector<16x16xf32> -> vector<16x16xf32>
    %106 = arith.addf %99, %105 : vector<16x16xf32>
    %c5_110 = arith.constant 5 : index
    %c0_111 = arith.constant 0 : index
    %c0_112 = arith.constant 0 : index
    %107 = vector.load %arg5[%c5_110, %c0_111, %c0_112] : memref<9x16x64xf32, #tpu.memory_space<vmem>>, vector<1x16x64xf32>
    %108 = vector.shape_cast %107 : vector<1x16x64xf32> to vector<16x64xf32>
    %cst_113 = arith.constant dense<0.000000e+00> : vector<16x8xf32>
    %109 = tpu.matmul %108, %70, %cst_113 {dimension_numbers = #tpu.dot_dimension_numbers<[1], [0], [0], [1], [0, 0, 1, 1], [], []>} : vector<16x64xf32>, vector<64x8xf32>, vector<16x8xf32> -> vector<16x8xf32>
    %c5_114 = arith.constant 5 : index
    %c0_115 = arith.constant 0 : index
    %c0_116 = arith.constant 0 : index
    %110 = vector.load %arg6[%c5_114, %c0_115, %c0_116] : memref<9x8x16xf32, #tpu.memory_space<vmem>>, vector<1x8x16xf32>
    %111 = vector.shape_cast %110 : vector<1x8x16xf32> to vector<8x16xf32>
    %cst_117 = arith.constant dense<0.000000e+00> : vector<16x16xf32>
    %112 = tpu.matmul %109, %111, %cst_117 {dimension_numbers = #tpu.dot_dimension_numbers<[1], [0], [0], [1], [0, 0, 1, 1], [], []>} : vector<16x8xf32>, vector<8x16xf32>, vector<16x16xf32> -> vector<16x16xf32>
    %113 = arith.addf %106, %112 : vector<16x16xf32>
    %c6_118 = arith.constant 6 : index
    %c0_119 = arith.constant 0 : index
    %c0_120 = arith.constant 0 : index
    %114 = vector.load %arg5[%c6_118, %c0_119, %c0_120] : memref<9x16x64xf32, #tpu.memory_space<vmem>>, vector<1x16x64xf32>
    %115 = vector.shape_cast %114 : vector<1x16x64xf32> to vector<16x64xf32>
    %cst_121 = arith.constant dense<0.000000e+00> : vector<16x8xf32>
    %116 = tpu.matmul %115, %70, %cst_121 {dimension_numbers = #tpu.dot_dimension_numbers<[1], [0], [0], [1], [0, 0, 1, 1], [], []>} : vector<16x64xf32>, vector<64x8xf32>, vector<16x8xf32> -> vector<16x8xf32>
    %c6_122 = arith.constant 6 : index
    %c0_123 = arith.constant 0 : index
    %c0_124 = arith.constant 0 : index
    %117 = vector.load %arg6[%c6_122, %c0_123, %c0_124] : memref<9x8x16xf32, #tpu.memory_space<vmem>>, vector<1x8x16xf32>
    %118 = vector.shape_cast %117 : vector<1x8x16xf32> to vector<8x16xf32>
    %cst_125 = arith.constant dense<0.000000e+00> : vector<16x16xf32>
    %119 = tpu.matmul %116, %118, %cst_125 {dimension_numbers = #tpu.dot_dimension_numbers<[1], [0], [0], [1], [0, 0, 1, 1], [], []>} : vector<16x8xf32>, vector<8x16xf32>, vector<16x16xf32> -> vector<16x16xf32>
    %120 = arith.addf %113, %119 : vector<16x16xf32>
    %c7_126 = arith.constant 7 : index
    %c0_127 = arith.constant 0 : index
    %c0_128 = arith.constant 0 : index
    %121 = vector.load %arg5[%c7_126, %c0_127, %c0_128] : memref<9x16x64xf32, #tpu.memory_space<vmem>>, vector<1x16x64xf32>
    %122 = vector.shape_cast %121 : vector<1x16x64xf32> to vector<16x64xf32>
    %cst_129 = arith.constant dense<0.000000e+00> : vector<16x8xf32>
    %123 = tpu.matmul %122, %70, %cst_129 {dimension_numbers = #tpu.dot_dimension_numbers<[1], [0], [0], [1], [0, 0, 1, 1], [], []>} : vector<16x64xf32>, vector<64x8xf32>, vector<16x8xf32> -> vector<16x8xf32>
    %c7_130 = arith.constant 7 : index
    %c0_131 = arith.constant 0 : index
    %c0_132 = arith.constant 0 : index
    %124 = vector.load %arg6[%c7_130, %c0_131, %c0_132] : memref<9x8x16xf32, #tpu.memory_space<vmem>>, vector<1x8x16xf32>
    %125 = vector.shape_cast %124 : vector<1x8x16xf32> to vector<8x16xf32>
    %cst_133 = arith.constant dense<0.000000e+00> : vector<16x16xf32>
    %126 = tpu.matmul %123, %125, %cst_133 {dimension_numbers = #tpu.dot_dimension_numbers<[1], [0], [0], [1], [0, 0, 1, 1], [], []>} : vector<16x8xf32>, vector<8x16xf32>, vector<16x16xf32> -> vector<16x16xf32>
    %127 = arith.addf %120, %126 : vector<16x16xf32>
    %c8_134 = arith.constant 8 : index
    %c0_135 = arith.constant 0 : index
    %c0_136 = arith.constant 0 : index
    %128 = vector.load %arg5[%c8_134, %c0_135, %c0_136] : memref<9x16x64xf32, #tpu.memory_space<vmem>>, vector<1x16x64xf32>
    %129 = vector.shape_cast %128 : vector<1x16x64xf32> to vector<16x64xf32>
    %cst_137 = arith.constant dense<0.000000e+00> : vector<16x8xf32>
    %130 = tpu.matmul %129, %70, %cst_137 {dimension_numbers = #tpu.dot_dimension_numbers<[1], [0], [0], [1], [0, 0, 1, 1], [], []>} : vector<16x64xf32>, vector<64x8xf32>, vector<16x8xf32> -> vector<16x8xf32>
    %c8_138 = arith.constant 8 : index
    %c0_139 = arith.constant 0 : index
    %c0_140 = arith.constant 0 : index
    %131 = vector.load %arg6[%c8_138, %c0_139, %c0_140] : memref<9x8x16xf32, #tpu.memory_space<vmem>>, vector<1x8x16xf32>
    %132 = vector.shape_cast %131 : vector<1x8x16xf32> to vector<8x16xf32>
    %cst_141 = arith.constant dense<0.000000e+00> : vector<16x16xf32>
    %133 = tpu.matmul %130, %132, %cst_141 {dimension_numbers = #tpu.dot_dimension_numbers<[1], [0], [0], [1], [0, 0, 1, 1], [], []>} : vector<16x8xf32>, vector<8x16xf32>, vector<16x16xf32> -> vector<16x16xf32>
    %134 = arith.addf %127, %133 : vector<16x16xf32>
    %c0_142 = arith.constant 0 : index
    %c0_143 = arith.constant 0 : index
    %135 = vector.load %arg7[%c0_142, %c0_143] : memref<1x16xf32, #tpu.memory_space<vmem>>, vector<1x16xf32>
    %136 = vector.broadcast %135 : vector<1x16xf32> to vector<16x16xf32>
    %137 = arith.addf %134, %136 : vector<16x16xf32>
    %cst_144 = arith.constant 0.000000e+00 : f32
    %138 = vector.broadcast %cst_144 : f32 to vector<16x16xf32>
    %139 = arith.maximumf %137, %138 : vector<16x16xf32>
    %cst_145 = arith.constant 0.000000e+00 : f32
    %140 = vector.broadcast %cst_145 : f32 to vector<4x32xf32>
    %c0_146 = arith.constant 0 : index
    %c0_147 = arith.constant 0 : index
    %c0_148 = arith.constant 0 : index
    %141 = vector.load %arg8[%c0_146, %c0_147, %c0_148] : memref<9x4x16xf32, #tpu.memory_space<vmem>>, vector<1x4x16xf32>
    %142 = vector.shape_cast %141 : vector<1x4x16xf32> to vector<4x16xf32>
    %cst_149 = arith.constant dense<0.000000e+00> : vector<4x16xf32>
    %143 = tpu.matmul %142, %139, %cst_149 {dimension_numbers = #tpu.dot_dimension_numbers<[1], [0], [0], [1], [0, 0, 1, 1], [], []>} : vector<4x16xf32>, vector<16x16xf32>, vector<4x16xf32> -> vector<4x16xf32>
    %c0_150 = arith.constant 0 : index
    %c0_151 = arith.constant 0 : index
    %c0_152 = arith.constant 0 : index
    %144 = vector.load %arg9[%c0_150, %c0_151, %c0_152] : memref<9x16x32xf32, #tpu.memory_space<vmem>>, vector<1x16x32xf32>
    %145 = vector.shape_cast %144 : vector<1x16x32xf32> to vector<16x32xf32>
    %cst_153 = arith.constant dense<0.000000e+00> : vector<4x32xf32>
    %146 = tpu.matmul %143, %145, %cst_153 {dimension_numbers = #tpu.dot_dimension_numbers<[1], [0], [0], [1], [0, 0, 1, 1], [], []>} : vector<4x16xf32>, vector<16x32xf32>, vector<4x32xf32> -> vector<4x32xf32>
    %147 = arith.addf %140, %146 : vector<4x32xf32>
    %c1_154 = arith.constant 1 : index
    %c0_155 = arith.constant 0 : index
    %c0_156 = arith.constant 0 : index
    %148 = vector.load %arg8[%c1_154, %c0_155, %c0_156] : memref<9x4x16xf32, #tpu.memory_space<vmem>>, vector<1x4x16xf32>
    %149 = vector.shape_cast %148 : vector<1x4x16xf32> to vector<4x16xf32>
    %cst_157 = arith.constant dense<0.000000e+00> : vector<4x16xf32>
    %150 = tpu.matmul %149, %139, %cst_157 {dimension_numbers = #tpu.dot_dimension_numbers<[1], [0], [0], [1], [0, 0, 1, 1], [], []>} : vector<4x16xf32>, vector<16x16xf32>, vector<4x16xf32> -> vector<4x16xf32>
    %c1_158 = arith.constant 1 : index
    %c0_159 = arith.constant 0 : index
    %c0_160 = arith.constant 0 : index
    %151 = vector.load %arg9[%c1_158, %c0_159, %c0_160] : memref<9x16x32xf32, #tpu.memory_space<vmem>>, vector<1x16x32xf32>
    %152 = vector.shape_cast %151 : vector<1x16x32xf32> to vector<16x32xf32>
    %cst_161 = arith.constant dense<0.000000e+00> : vector<4x32xf32>
    %153 = tpu.matmul %150, %152, %cst_161 {dimension_numbers = #tpu.dot_dimension_numbers<[1], [0], [0], [1], [0, 0, 1, 1], [], []>} : vector<4x16xf32>, vector<16x32xf32>, vector<4x32xf32> -> vector<4x32xf32>
    %154 = arith.addf %147, %153 : vector<4x32xf32>
    %c2_162 = arith.constant 2 : index
    %c0_163 = arith.constant 0 : index
    %c0_164 = arith.constant 0 : index
    %155 = vector.load %arg8[%c2_162, %c0_163, %c0_164] : memref<9x4x16xf32, #tpu.memory_space<vmem>>, vector<1x4x16xf32>
    %156 = vector.shape_cast %155 : vector<1x4x16xf32> to vector<4x16xf32>
    %cst_165 = arith.constant dense<0.000000e+00> : vector<4x16xf32>
    %157 = tpu.matmul %156, %139, %cst_165 {dimension_numbers = #tpu.dot_dimension_numbers<[1], [0], [0], [1], [0, 0, 1, 1], [], []>} : vector<4x16xf32>, vector<16x16xf32>, vector<4x16xf32> -> vector<4x16xf32>
    %c2_166 = arith.constant 2 : index
    %c0_167 = arith.constant 0 : index
    %c0_168 = arith.constant 0 : index
    %158 = vector.load %arg9[%c2_166, %c0_167, %c0_168] : memref<9x16x32xf32, #tpu.memory_space<vmem>>, vector<1x16x32xf32>
    %159 = vector.shape_cast %158 : vector<1x16x32xf32> to vector<16x32xf32>
    %cst_169 = arith.constant dense<0.000000e+00> : vector<4x32xf32>
    %160 = tpu.matmul %157, %159, %cst_169 {dimension_numbers = #tpu.dot_dimension_numbers<[1], [0], [0], [1], [0, 0, 1, 1], [], []>} : vector<4x16xf32>, vector<16x32xf32>, vector<4x32xf32> -> vector<4x32xf32>
    %161 = arith.addf %154, %160 : vector<4x32xf32>
    %c3_170 = arith.constant 3 : index
    %c0_171 = arith.constant 0 : index
    %c0_172 = arith.constant 0 : index
    %162 = vector.load %arg8[%c3_170, %c0_171, %c0_172] : memref<9x4x16xf32, #tpu.memory_space<vmem>>, vector<1x4x16xf32>
    %163 = vector.shape_cast %162 : vector<1x4x16xf32> to vector<4x16xf32>
    %cst_173 = arith.constant dense<0.000000e+00> : vector<4x16xf32>
    %164 = tpu.matmul %163, %139, %cst_173 {dimension_numbers = #tpu.dot_dimension_numbers<[1], [0], [0], [1], [0, 0, 1, 1], [], []>} : vector<4x16xf32>, vector<16x16xf32>, vector<4x16xf32> -> vector<4x16xf32>
    %c3_174 = arith.constant 3 : index
    %c0_175 = arith.constant 0 : index
    %c0_176 = arith.constant 0 : index
    %165 = vector.load %arg9[%c3_174, %c0_175, %c0_176] : memref<9x16x32xf32, #tpu.memory_space<vmem>>, vector<1x16x32xf32>
    %166 = vector.shape_cast %165 : vector<1x16x32xf32> to vector<16x32xf32>
    %cst_177 = arith.constant dense<0.000000e+00> : vector<4x32xf32>
    %167 = tpu.matmul %164, %166, %cst_177 {dimension_numbers = #tpu.dot_dimension_numbers<[1], [0], [0], [1], [0, 0, 1, 1], [], []>} : vector<4x16xf32>, vector<16x32xf32>, vector<4x32xf32> -> vector<4x32xf32>
    %168 = arith.addf %161, %167 : vector<4x32xf32>
    %c4_178 = arith.constant 4 : index
    %c0_179 = arith.constant 0 : index
    %c0_180 = arith.constant 0 : index
    %169 = vector.load %arg8[%c4_178, %c0_179, %c0_180] : memref<9x4x16xf32, #tpu.memory_space<vmem>>, vector<1x4x16xf32>
    %170 = vector.shape_cast %169 : vector<1x4x16xf32> to vector<4x16xf32>
    %cst_181 = arith.constant dense<0.000000e+00> : vector<4x16xf32>
    %171 = tpu.matmul %170, %139, %cst_181 {dimension_numbers = #tpu.dot_dimension_numbers<[1], [0], [0], [1], [0, 0, 1, 1], [], []>} : vector<4x16xf32>, vector<16x16xf32>, vector<4x16xf32> -> vector<4x16xf32>
    %c4_182 = arith.constant 4 : index
    %c0_183 = arith.constant 0 : index
    %c0_184 = arith.constant 0 : index
    %172 = vector.load %arg9[%c4_182, %c0_183, %c0_184] : memref<9x16x32xf32, #tpu.memory_space<vmem>>, vector<1x16x32xf32>
    %173 = vector.shape_cast %172 : vector<1x16x32xf32> to vector<16x32xf32>
    %cst_185 = arith.constant dense<0.000000e+00> : vector<4x32xf32>
    %174 = tpu.matmul %171, %173, %cst_185 {dimension_numbers = #tpu.dot_dimension_numbers<[1], [0], [0], [1], [0, 0, 1, 1], [], []>} : vector<4x16xf32>, vector<16x32xf32>, vector<4x32xf32> -> vector<4x32xf32>
    %175 = arith.addf %168, %174 : vector<4x32xf32>
    %c5_186 = arith.constant 5 : index
    %c0_187 = arith.constant 0 : index
    %c0_188 = arith.constant 0 : index
    %176 = vector.load %arg8[%c5_186, %c0_187, %c0_188] : memref<9x4x16xf32, #tpu.memory_space<vmem>>, vector<1x4x16xf32>
    %177 = vector.shape_cast %176 : vector<1x4x16xf32> to vector<4x16xf32>
    %cst_189 = arith.constant dense<0.000000e+00> : vector<4x16xf32>
    %178 = tpu.matmul %177, %139, %cst_189 {dimension_numbers = #tpu.dot_dimension_numbers<[1], [0], [0], [1], [0, 0, 1, 1], [], []>} : vector<4x16xf32>, vector<16x16xf32>, vector<4x16xf32> -> vector<4x16xf32>
    %c5_190 = arith.constant 5 : index
    %c0_191 = arith.constant 0 : index
    %c0_192 = arith.constant 0 : index
    %179 = vector.load %arg9[%c5_190, %c0_191, %c0_192] : memref<9x16x32xf32, #tpu.memory_space<vmem>>, vector<1x16x32xf32>
    %180 = vector.shape_cast %179 : vector<1x16x32xf32> to vector<16x32xf32>
    %cst_193 = arith.constant dense<0.000000e+00> : vector<4x32xf32>
    %181 = tpu.matmul %178, %180, %cst_193 {dimension_numbers = #tpu.dot_dimension_numbers<[1], [0], [0], [1], [0, 0, 1, 1], [], []>} : vector<4x16xf32>, vector<16x32xf32>, vector<4x32xf32> -> vector<4x32xf32>
    %182 = arith.addf %175, %181 : vector<4x32xf32>
    %c6_194 = arith.constant 6 : index
    %c0_195 = arith.constant 0 : index
    %c0_196 = arith.constant 0 : index
    %183 = vector.load %arg8[%c6_194, %c0_195, %c0_196] : memref<9x4x16xf32, #tpu.memory_space<vmem>>, vector<1x4x16xf32>
    %184 = vector.shape_cast %183 : vector<1x4x16xf32> to vector<4x16xf32>
    %cst_197 = arith.constant dense<0.000000e+00> : vector<4x16xf32>
    %185 = tpu.matmul %184, %139, %cst_197 {dimension_numbers = #tpu.dot_dimension_numbers<[1], [0], [0], [1], [0, 0, 1, 1], [], []>} : vector<4x16xf32>, vector<16x16xf32>, vector<4x16xf32> -> vector<4x16xf32>
    %c6_198 = arith.constant 6 : index
    %c0_199 = arith.constant 0 : index
    %c0_200 = arith.constant 0 : index
    %186 = vector.load %arg9[%c6_198, %c0_199, %c0_200] : memref<9x16x32xf32, #tpu.memory_space<vmem>>, vector<1x16x32xf32>
    %187 = vector.shape_cast %186 : vector<1x16x32xf32> to vector<16x32xf32>
    %cst_201 = arith.constant dense<0.000000e+00> : vector<4x32xf32>
    %188 = tpu.matmul %185, %187, %cst_201 {dimension_numbers = #tpu.dot_dimension_numbers<[1], [0], [0], [1], [0, 0, 1, 1], [], []>} : vector<4x16xf32>, vector<16x32xf32>, vector<4x32xf32> -> vector<4x32xf32>
    %189 = arith.addf %182, %188 : vector<4x32xf32>
    %c7_202 = arith.constant 7 : index
    %c0_203 = arith.constant 0 : index
    %c0_204 = arith.constant 0 : index
    %190 = vector.load %arg8[%c7_202, %c0_203, %c0_204] : memref<9x4x16xf32, #tpu.memory_space<vmem>>, vector<1x4x16xf32>
    %191 = vector.shape_cast %190 : vector<1x4x16xf32> to vector<4x16xf32>
    %cst_205 = arith.constant dense<0.000000e+00> : vector<4x16xf32>
    %192 = tpu.matmul %191, %139, %cst_205 {dimension_numbers = #tpu.dot_dimension_numbers<[1], [0], [0], [1], [0, 0, 1, 1], [], []>} : vector<4x16xf32>, vector<16x16xf32>, vector<4x16xf32> -> vector<4x16xf32>
    %c7_206 = arith.constant 7 : index
    %c0_207 = arith.constant 0 : index
    %c0_208 = arith.constant 0 : index
    %193 = vector.load %arg9[%c7_206, %c0_207, %c0_208] : memref<9x16x32xf32, #tpu.memory_space<vmem>>, vector<1x16x32xf32>
    %194 = vector.shape_cast %193 : vector<1x16x32xf32> to vector<16x32xf32>
    %cst_209 = arith.constant dense<0.000000e+00> : vector<4x32xf32>
    %195 = tpu.matmul %192, %194, %cst_209 {dimension_numbers = #tpu.dot_dimension_numbers<[1], [0], [0], [1], [0, 0, 1, 1], [], []>} : vector<4x16xf32>, vector<16x32xf32>, vector<4x32xf32> -> vector<4x32xf32>
    %196 = arith.addf %189, %195 : vector<4x32xf32>
    %c8_210 = arith.constant 8 : index
    %c0_211 = arith.constant 0 : index
    %c0_212 = arith.constant 0 : index
    %197 = vector.load %arg8[%c8_210, %c0_211, %c0_212] : memref<9x4x16xf32, #tpu.memory_space<vmem>>, vector<1x4x16xf32>
    %198 = vector.shape_cast %197 : vector<1x4x16xf32> to vector<4x16xf32>
    %cst_213 = arith.constant dense<0.000000e+00> : vector<4x16xf32>
    %199 = tpu.matmul %198, %139, %cst_213 {dimension_numbers = #tpu.dot_dimension_numbers<[1], [0], [0], [1], [0, 0, 1, 1], [], []>} : vector<4x16xf32>, vector<16x16xf32>, vector<4x16xf32> -> vector<4x16xf32>
    %c8_214 = arith.constant 8 : index
    %c0_215 = arith.constant 0 : index
    %c0_216 = arith.constant 0 : index
    %200 = vector.load %arg9[%c8_214, %c0_215, %c0_216] : memref<9x16x32xf32, #tpu.memory_space<vmem>>, vector<1x16x32xf32>
    %201 = vector.shape_cast %200 : vector<1x16x32xf32> to vector<16x32xf32>
    %cst_217 = arith.constant dense<0.000000e+00> : vector<4x32xf32>
    %202 = tpu.matmul %199, %201, %cst_217 {dimension_numbers = #tpu.dot_dimension_numbers<[1], [0], [0], [1], [0, 0, 1, 1], [], []>} : vector<4x16xf32>, vector<16x32xf32>, vector<4x32xf32> -> vector<4x32xf32>
    %203 = arith.addf %196, %202 : vector<4x32xf32>
    %c0_218 = arith.constant 0 : index
    %c0_219 = arith.constant 0 : index
    %204 = vector.load %arg10[%c0_218, %c0_219] : memref<1x32xf32, #tpu.memory_space<vmem>>, vector<1x32xf32>
    %205 = vector.broadcast %204 : vector<1x32xf32> to vector<4x32xf32>
    %206 = arith.addf %203, %205 : vector<4x32xf32>
    %cst_220 = arith.constant 0.000000e+00 : f32
    %207 = vector.broadcast %cst_220 : f32 to vector<4x32xf32>
    %208 = arith.maximumf %206, %207 : vector<4x32xf32>
    %cst_221 = arith.constant dense<0xFF800000> : vector<32xf32>
    %209 = vector.multi_reduction <maximumf>, %208, %cst_221 [0] : vector<4x32xf32> to vector<32xf32>
    %210 = vector.shape_cast %209 : vector<32xf32> to vector<1x32xf32>
    %cst_222 = arith.constant dense<0.000000e+00> : vector<32xf32>
    %211 = vector.multi_reduction <add>, %208, %cst_222 [0] : vector<4x32xf32> to vector<32xf32>
    %212 = vector.shape_cast %211 : vector<32xf32> to vector<1x32xf32>
    %cst_223 = arith.constant 4.000000e+00 : f32
    %213 = vector.broadcast %cst_223 : f32 to vector<1x32xf32>
    %214 = arith.divf %212, %213 : vector<1x32xf32>
    %c0_224 = arith.constant 0 : index
    %c0_225 = arith.constant 0 : index
    %215 = vector.load %arg11[%c0_224, %c0_225] : memref<32x10xf32, #tpu.memory_space<vmem>>, vector<32x10xf32>
    %cst_226 = arith.constant dense<0.000000e+00> : vector<1x10xf32>
    %216 = tpu.matmul %210, %215, %cst_226 {dimension_numbers = #tpu.dot_dimension_numbers<[1], [0], [0], [1], [0, 0, 1, 1], [], []>} : vector<1x32xf32>, vector<32x10xf32>, vector<1x10xf32> -> vector<1x10xf32>
    %c0_227 = arith.constant 0 : index
    %c0_228 = arith.constant 0 : index
    %217 = vector.load %arg12[%c0_227, %c0_228] : memref<32x10xf32, #tpu.memory_space<vmem>>, vector<32x10xf32>
    %cst_229 = arith.constant dense<0.000000e+00> : vector<1x10xf32>
    %218 = tpu.matmul %214, %217, %cst_229 {dimension_numbers = #tpu.dot_dimension_numbers<[1], [0], [0], [1], [0, 0, 1, 1], [], []>} : vector<1x32xf32>, vector<32x10xf32>, vector<1x10xf32> -> vector<1x10xf32>
    %219 = arith.addf %216, %218 : vector<1x10xf32>
    %c0_230 = arith.constant 0 : index
    %c0_231 = arith.constant 0 : index
    %220 = vector.load %arg13[%c0_230, %c0_231] : memref<1x10xf32, #tpu.memory_space<vmem>>, vector<1x10xf32>
    %221 = arith.addf %219, %220 : vector<1x10xf32>
    %c0_232 = arith.constant 0 : index
    %c0_233 = arith.constant 0 : index
    %c0_234 = arith.constant 0 : index
    %222 = vector.load %arg14[%c0_232, %c0_233, %c0_234] : memref<1x1x10xf32, #tpu.memory_space<vmem>>, vector<1x1x10xf32>
    %223 = vector.shape_cast %222 : vector<1x1x10xf32> to vector<1x10xf32>
    %224 = vector.shape_cast %221 : vector<1x10xf32> to vector<1x1x10xf32>
    tpu.vector_store %arg14[%c0_232, %c0_233, %c0_234], %224 {strides = array<i32>} : memref<1x1x10xf32, #tpu.memory_space<vmem>>, vector<1x1x10xf32>,
    return
  }
  func.func @transform_0(%arg0: i32) -> (i32, i32, i32) {
    %c0_i32 = arith.constant 0 : i32
    %c0_i32_0 = arith.constant 0 : i32
    %c0_i32_1 = arith.constant 0 : i32
    return %arg0, %c0_i32, %c0_i32_0 : i32, i32, i32
  }
  func.func @transform_1(%arg0: i32) -> (i32, i32, i32) {
    %c0_i32 = arith.constant 0 : i32
    %c0_i32_0 = arith.constant 0 : i32
    %c0_i32_1 = arith.constant 0 : i32
    %c0_i32_2 = arith.constant 0 : i32
    return %c0_i32, %c0_i32_0, %c0_i32_1 : i32, i32, i32
  }
  func.func @transform_2(%arg0: i32) -> (i32, i32, i32) {
    %c0_i32 = arith.constant 0 : i32
    %c0_i32_0 = arith.constant 0 : i32
    %c0_i32_1 = arith.constant 0 : i32
    %c0_i32_2 = arith.constant 0 : i32
    return %c0_i32, %c0_i32_0, %c0_i32_1 : i32, i32, i32
  }
  func.func @transform_3(%arg0: i32) -> (i32, i32) {
    %c0_i32 = arith.constant 0 : i32
    %c0_i32_0 = arith.constant 0 : i32
    %c0_i32_1 = arith.constant 0 : i32
    return %c0_i32, %c0_i32_0 : i32, i32
  }
  func.func @transform_4(%arg0: i32) -> (i32, i32, i32) {
    %c0_i32 = arith.constant 0 : i32
    %c0_i32_0 = arith.constant 0 : i32
    %c0_i32_1 = arith.constant 0 : i32
    %c0_i32_2 = arith.constant 0 : i32
    return %c0_i32, %c0_i32_0, %c0_i32_1 : i32, i32, i32
  }
  func.func @transform_5(%arg0: i32) -> (i32, i32, i32) {
    %c0_i32 = arith.constant 0 : i32
    %c0_i32_0 = arith.constant 0 : i32
    %c0_i32_1 = arith.constant 0 : i32
    %c0_i32_2 = arith.constant 0 : i32
    return %c0_i32, %c0_i32_0, %c0_i32_1 : i32, i32, i32
  }
  func.func @transform_6(%arg0: i32) -> (i32, i32) {
    %c0_i32 = arith.constant 0 : i32
    %c0_i32_0 = arith.constant 0 : i32
    %c0_i32_1 = arith.constant 0 : i32
    return %c0_i32, %c0_i32_0 : i32, i32
  }
  func.func @transform_7(%arg0: i32) -> (i32, i32, i32) {
    %c0_i32 = arith.constant 0 : i32
    %c0_i32_0 = arith.constant 0 : i32
    %c0_i32_1 = arith.constant 0 : i32
    %c0_i32_2 = arith.constant 0 : i32
    return %c0_i32, %c0_i32_0, %c0_i32_1 : i32, i32, i32
  }
  func.func @transform_8(%arg0: i32) -> (i32, i32, i32) {
    %c0_i32 = arith.constant 0 : i32
    %c0_i32_0 = arith.constant 0 : i32
    %c0_i32_1 = arith.constant 0 : i32
    %c0_i32_2 = arith.constant 0 : i32
    return %c0_i32, %c0_i32_0, %c0_i32_1 : i32, i32, i32
  }
  func.func @transform_9(%arg0: i32) -> (i32, i32) {
    %c0_i32 = arith.constant 0 : i32
    %c0_i32_0 = arith.constant 0 : i32
    %c0_i32_1 = arith.constant 0 : i32
    return %c0_i32, %c0_i32_0 : i32, i32
  }
  func.func @transform_10(%arg0: i32) -> (i32, i32) {
    %c0_i32 = arith.constant 0 : i32
    %c0_i32_0 = arith.constant 0 : i32
    %c0_i32_1 = arith.constant 0 : i32
    return %c0_i32, %c0_i32_0 : i32, i32
  }
  func.func @transform_11(%arg0: i32) -> (i32, i32) {
    %c0_i32 = arith.constant 0 : i32
    %c0_i32_0 = arith.constant 0 : i32
    %c0_i32_1 = arith.constant 0 : i32
    return %c0_i32, %c0_i32_0 : i32, i32
  }
  func.func @transform_12(%arg0: i32) -> (i32, i32) {
    %c0_i32 = arith.constant 0 : i32
    %c0_i32_0 = arith.constant 0 : i32
    %c0_i32_1 = arith.constant 0 : i32
    return %c0_i32, %c0_i32_0 : i32, i32
  }
  func.func @transform_13(%arg0: i32) -> (i32, i32, i32) {
    %c0_i32 = arith.constant 0 : i32
    %c0_i32_0 = arith.constant 0 : i32
    %c0_i32_1 = arith.constant 0 : i32
    return %arg0, %c0_i32, %c0_i32_0 : i32, i32, i32
  }
}

</mosaic_0001>

<bundles_post_ra>
// kernel: face_model_forward.1
= control target key start
LH: loop header
LB: loop body
LE: loop exit
PB: predicated region body
PF: predicated region fallthrough
CT: control target
= control target key end

     0   :  { %18 = vsyncpa [#allocation3], 0  ;;  %s9253_s0 = inlined_call_operand.vmem [shape: f32[2,256,3], index: 0, kind: input, shape index: {}]   ;;  %s9254_s1 = inlined_call_operand.hbm [shape: f32[9,64,256], index: 1, kind: input, shape index: {}]   ;;  %s9255_s2 = inlined_call_operand.vmem [shape: f32[9,3,8], index: 2, kind: input, shape index: {}]   ;;  %s9256_s3 = inlined_call_operand.vmem [shape: f32[1,8], index: 3, kind: input, shape index: {}]   ;;  %s9257_s4 = inlined_call_operand.vmem [shape: f32[9,16,64], index: 4, kind: input, shape index: {}]   ;;  %s9258_s5 = inlined_call_operand.vmem [shape: f32[9,8,16], index: 5, kind: input, shape index: {}]   ;;  %s9259_s6 = inlined_call_operand.vmem [shape: f32[1,16], index: 6, kind: input, shape index: {}]   ;;  %s9260_s7 = inlined_call_operand.vmem [shape: f32[9,4,16], index: 7, kind: input, shape index: {}]   ;;  %s9261_s8 = inlined_call_operand.vmem [shape: f32[9,16,32], index: 8, kind: input, shape index: {}]   ;;  %s9262_s9 = inlined_call_operand.vmem [shape: f32[1,32], index: 9, kind: input, shape index: {}]   ;;  %s9263_s10 = inlined_call_operand.vmem [shape: f32[32,10], index: 10, kind: input, shape index: {}]   ;;  %s9264_s11 = inlined_call_operand.vmem [shape: f32[32,10], index: 11, kind: input, shape index: {}]   ;;  %s9265_s12 = inlined_call_operand.vmem [shape: f32[1,10], index: 12, kind: input, shape index: {}]   ;;  %s9266_s13 = inlined_call_operand.hbm [shape: f32[2,1,10], index: 13, kind: output, shape index: {}]  }
   0x1   :  { %19 = vsyncpa [#allocation4], 0 }
   0x2   :  { %21 = vsyncpa [#allocation4 + $0x1], 0  ;;  %s8296_s25 = smov 0   ;;  %s8298_s26 = smov 0  }
   0x3   :  { %s8300_s27 = smov 0   ;;  %s8302_s28 = smov 0  }
   0x4 LB: > { %9273 = sst [smem:[#allocation8_spill]] %s8213_s27  ;;  %s8317_s29 = sadd.s32 4294967295, %s8217_s28   ;;  %s8217_s28 = sphi %s8302_s28, %s9285_s28   ;;  %s8213_s27 = sphi %s8300_s27, %s9287_s27   ;;  %s8209_s26 = sphi %s8298_s26, %s9289_s26   ;;  %s8205_s25 = sphi %s8296_s25, %s9288_s25  }
   0x5   : > { %s6026_s30 = sadd.s32 4294967294, %s8217_s28   ;;  %s8321_s14 = sadd.s32 1, %s8217_s28  }
   0x6   : > { %9274 = sst [smem:[#allocation9_spill]] %s8321_s14  ;;  %s312_s15 = sadd.s32 1, %s8213_s27 }
   0x7   : > { %s309_s16 = ssub.s32 %s8217_s28, %s8321_s14  ;;  %p322_p0 = scmp.ne.s32.totalorder %s8213_s27, %s8209_s26 }
   0x8   : > { %p310_p1 = scmp.eq.s32.totalorder %s309_s16, 0  ;;  %p323_p2 = scmp.eq.s32.totalorder %s8317_s29, 1 }
   0x9   : > { %p328_p3 = scmp.ne.s32.totalorder %s8209_s26, %s8205_s25  ;;  %p329_p4 = scmp.eq.s32.totalorder %s6026_s30, 1 }
   0xa   : > { %s8332_s17 = scalar_select %p310_p1, %s8213_s27, %s312_s15  }
   0xb   : > { %p8334_p5 = por %p323_p2, %p322_p0  ;;  %p8338_p6 = por %p329_p4, %p328_p3 }
   0xc   : > { %9275 = sst [smem:[#allocation10_spill]] %s8332_s17  ;;  %p6027_p7 = scmp.ge.s32.totalorder %s8217_s28, 1 }
   0xd   : > { %s9276_s18 = scalar_select %p8334_p5, 1, 0 }
   0xe   : > { %s9277_s19 = scalar_select %p8338_p6, 1, 0 }
   0xf   : > { %p336_p8 = scmp.lt.s32.totalorder %s8217_s28, 3  ;;  %p9270_p9 = scmp.eq.s32.totalorder %s8317_s29, 0 }
  0x10   : > { %s8219_s21 = smov [#allocation2]   ;;  %s8123_s15 = scalar_lea.hbm %s9254_s1, 18432 }
  0x11   : > { %p8345_p10 = pnand %p6027_p7, %p336_p8  ;;  %s348_s22 = sshll.u32 %s8219_s21, 4  ;;  %s349_s22 = int_to_ptr.vmem [resolvable:$true] %s348_s22 }
  0x12   : > { %p8124_p13 = scmp.ne.s32.totalorder %s9254_s1, %s8123_s15  ;;  %p8130_p3 = scmp.lt.u32.totalorder %s8123_s15, %s9254_s1 }
  0x13   : > { %s9278_s20 = scalar_select %p8345_p10, 1, 0 }
  0x14   : > { %p8074_p11 = pneg %p8345_p10 }
  0x16   : > { %p8353_p12 = pnand %p9270_p9, %p8074_p11 }
  0x18   : > { %p8125_p0 = pneg %p8353_p12 }
  0x1a   : > { %p8126_p1 = pnand %p8125_p0, %p8124_p13 }
  0x1c   : > { %p8127_p2 = pneg %p8126_p1 }
  0x1e   : > { %p8132_p4 = pnand %p8130_p3, %p8127_p2 }
  0x20   : > { %8135 = shalt.err (!%p8132_p4)
}
  0x21   : > { %s8136_s14 = scalar_lea.vmem %s349_s22, 18432  ;;  %p8144_p9 = scmp.lt.s32.totalorder %s349_s22, %s349_s22 }
  0x22   : > { %p8137_p7 = scmp.ne.s32.totalorder %s349_s22, %s8136_s14  ;;  %p8145_p6 = scmp.lt.s32.totalorder %s8136_s14, %s8136_s14 }
  0x24   : > { %p8139_p8 = pnand %p8137_p7, %p8125_p0  ;;  %p8146_p5 = por %p8145_p6, %p8144_p9 }
  0x26   : > { %p8140_p11 = pneg %p8139_p8 }
  0x28   : > { %p8147_p10 = pnand %p8146_p5, %p8140_p11 }
  0x2a   : > { %8150 = shalt.err (!%p8147_p10)
}
  0x2b   : > { %s8220_s17 = smov 256   ;;  %s8221_s24 = smov 16  }
  0x2c   : > { %8077 = dma.hbm_to_vmem [thread:$0]  (!%p8353_p12), %s9254_s1, 18432, %s349_s22, [#allocation3], %s8220_s17, %s8220_s17, %s8221_s24  }
  0x2d   : > { %p9280_p13 = scmp.ne.s32.totalorder %s9278_s20, 0 }
  0x2e   : > { %p9281_p1 = scmp.eq.s32.totalorder (!%p9280_p13), %s8317_s29, 0 }
  0x2f   : > { %405 = sbr.rel (%p9280_p13) target bundleno = 3046 (0xbe6), region = 72 }
  0x36   : > { %8196 = dma.done.wait (%p9281_p1), [#allocation3], 18432   ;;  %p9282_p0 = pmov %p9281_p1 }
  0x37   : > { %p448_p5 = scmp.lt.s32.totalorder %s8317_s29, 1  ;;  %v609_v25 = vld [vmem:[#allocation2 + $0x88] sm:$0xff]  ;;  %v608_v50 = vld [vmem:[#allocation2 + $0x80] sm:$0xff]  ;;  %v611_v52 = vld [vmem:[#allocation2 + $0x98] sm:$0xff]  ;;  %vm756_vm0 = vcmask 1042432   ;;  %vm731_vm1 = vcmask 23552  }
  0x38   : > { %8198 = vsyncadd (%p9282_p0), [#allocation3], 4294948864  ;;  %688 = vmatprep.mubr.f32.mxu1 %v609_v25  ;;  %v486_v30 = vld [vmem:[#allocation2 + $0x8] sm:$0xff]  ;;  %v485_v51 = vld [vmem:[#allocation2] sm:$0xff]  ;;  %vm2870_vm2 = vcmask 523264   ;;  %vm3039_vm3 = vcmask 64512  }
  0x39   : > { %s449_s27 = scalar_select %p448_p5, %s8317_s29, 1  ;;  %565 = vmatprep.mubr.f32.mxu0 %v486_v30  ;;  %v488_v53 = vld [vmem:[#allocation2 + $0x18] sm:$0xff]  ;;  %v610_v54 = vld [vmem:[#allocation2 + $0x90] sm:$0xff]  ;;  %v613_v56 = vld [vmem:[#allocation2 + $0xa8] sm:$0xff]  ;;  %vm8223_vm4 = vmmov 0   ;;  %vm4397_vm5 = vcmask 130048  }
  0x3a   : > { %v487_v55 = vld [vmem:[#allocation2 + $0x10] sm:$0xff]  ;;  %v490_v57 = vld [vmem:[#allocation2 + $0x28] sm:$0xff]  ;;  %v612_v58 = vld [vmem:[#allocation2 + $0xa0] sm:$0xff]  ;;  %vm5770_vm6 = vcmask 257024   ;;  %vm5795_vm7 = vcmask 261120   ;;  %s446_s16 = sand.u32 1, %s8209_s26  }
  0x3b   : > { %s6233_s14 = sshll.u32 %s449_s27, 8  ;;  %v489_v59 = vld [vmem:[#allocation2 + $0x20] sm:$0xff]  ;;  %v615_v60 = vld [vmem:[#allocation2 + $0xb8] sm:$0xff]  ;;  %v614_v62 = vld [vmem:[#allocation2 + $0xb0] sm:$0xff]  ;;  %s6230_s15 = sshll.u32 %s8317_s29, 4  ;;  %vm5944_vm8 = vcmask 73728  }
  0x3c   : > { %s8384_s21 = scalar_lea.vmem %s9253_s0, %s6233_s14  ;;  %v492_v61 = vld [vmem:[#allocation2 + $0x38] sm:$0xff]  ;;  %v491_v63 = vld [vmem:[#allocation2 + $0x30] sm:$0xff]  ;;  %v1002_v30 = vld [vmem:[#allocation2 + $0x120] sm:$0xff]  ;;  %s447_s23 = scalar_lea.vmem [#allocation5], %s446_s16 }
  0x3d   : > { %v469_v0 = vld [vmem:[%s8384_s21 + $0x80] sm:$0xff]  ;;  %v470_v1 = vld [vmem:[%s8384_s21 + $0x88] sm:$0xff]  ;;  %v471_v5 = vld [vmem:[%s8384_s21 + $0x90] sm:$0xff]  ;;  %s9211_s17 = scalar_lea.hbm %s9266_s13, %s6230_s15  ;;  %s5947_s24 = scalar_lea.sflag [#allocation4], %s446_s16 }
  0x3e   : > { %v453_v2 = vld [vmem:[%s8384_s21] sm:$0xff]  ;;  %v8389_v3 = vpack.c.bf16 %v470_v1, %v469_v0  ;;  %v454_v4 = vld [vmem:[%s8384_s21 + $0x8] sm:$0xff]  ;;  %v472_v6 = vld [vmem:[%s8384_s21 + $0x98] sm:$0xff]  ;;  %p9283_p9 = scmp.ne.s32.totalorder %s9276_s18, 0  ;;  %s8225_s29 = smov [#allocation5]  }
  0x3f   : > { %v8394_v7 = vpack.c.bf16 %v454_v4, %v453_v2  ;;  %v8396_v8 = vpack.c.bf16 %v472_v6, %v471_v5  ;;  %v455_v9 = vld [vmem:[%s8384_s21 + $0x10] sm:$0xff]  ;;  %v456_v10 = vld [vmem:[%s8384_s21 + $0x18] sm:$0xff]  ;;  %v473_v11 = vld [vmem:[%s8384_s21 + $0xa0] sm:$0xff]  ;;  %s8155_s27 = sshll.u32 %s8225_s29, 4  ;;  %s8156_s27 = int_to_ptr.vmem [resolvable:$false] %s8155_s27 }
  0x40   : > { %7523 = vmatprep.subr.bf16.mxu1 %v8389_v3  ;;  %v474_v12 = vld [vmem:[%s8384_s21 + $0xa8] sm:$0xff]  ;;  %7491 = vmatprep.subr.bf16.mxu0 %v8389_v3  ;;  %v8405_v13 = vpack.c.bf16 %v456_v10, %v455_v9  ;;  %v457_v15 = vld [vmem:[%s8384_s21 + $0x20] sm:$0xff]  ;;  %v475_v17 = vld [vmem:[%s8384_s21 + $0xb0] sm:$0xff]  ;;  %s8157_s14 = scalar_lea.vmem %s8156_s27, 32 }
  0x41   : > { %7525 = vmatpush3.bf16.msra.mxu1 %v8394_v7  ;;  %7493 = vmatpush3.bf16.msra.mxu0 %v8394_v7  ;;  %v8409_v14 = vpack.c.bf16 %v474_v12, %v473_v11  ;;  %v458_v16 = vld [vmem:[%s8384_s21 + $0x28] sm:$0xff]  ;;  %v476_v18 = vld [vmem:[%s8384_s21 + $0xb8] sm:$0xff]  ;;  %v459_v21 = vld [vmem:[%s8384_s21 + $0x30] sm:$0xff] }
  0x42   : > { %7527 = vmatprep.subr.bf16.mxu1 %v8396_v8  ;;  %7495 = vmatprep.subr.bf16.mxu0 %v8396_v8  ;;  %v8417_v19 = vpack.c.bf16 %v458_v16, %v457_v15  ;;  %v8421_v20 = vpack.c.bf16 %v476_v18, %v475_v17  ;;  %v460_v22 = vld [vmem:[%s8384_s21 + $0x38] sm:$0xff]  ;;  %v477_v23 = vld [vmem:[%s8384_s21 + $0xc0] sm:$0xff]  ;;  %v478_v24 = vld [vmem:[%s8384_s21 + $0xc8] sm:$0xff] }
  0x43   : > { %v8429_v26 = vpack.c.bf16 %v460_v22, %v459_v21  ;;  %v8433_v27 = vpack.c.bf16 %v478_v24, %v477_v23  ;;  %v461_v28 = vld [vmem:[%s8384_s21 + $0x40] sm:$0xff]  ;;  %v462_v29 = vld [vmem:[%s8384_s21 + $0x48] sm:$0xff]  ;;  %v479_v31 = vld [vmem:[%s8384_s21 + $0xd0] sm:$0xff] }
  0x44   : > { %v480_v32 = vld [vmem:[%s8384_s21 + $0xd8] sm:$0xff]  ;;  %v8441_v33 = vpack.c.bf16 %v462_v29, %v461_v28  ;;  %v463_v35 = vld [vmem:[%s8384_s21 + $0x50] sm:$0xff]  ;;  %v481_v37 = vld [vmem:[%s8384_s21 + $0xe0] sm:$0xff] }
  0x45   : > { %7529 = vmatpush3.bf16.msra.mxu1 %v8405_v13  ;;  %7497 = vmatpush3.bf16.msra.mxu0 %v8405_v13  ;;  %v8445_v34 = vpack.c.bf16 %v480_v32, %v479_v31  ;;  %v464_v36 = vld [vmem:[%s8384_s21 + $0x58] sm:$0xff]  ;;  %v482_v38 = vld [vmem:[%s8384_s21 + $0xe8] sm:$0xff]  ;;  %v465_v41 = vld [vmem:[%s8384_s21 + $0x60] sm:$0xff] }
  0x46   : > { %7531 = vmatprep.subr.bf16.mxu1 %v8409_v14  ;;  %7499 = vmatprep.subr.bf16.mxu0 %v8409_v14  ;;  %v8453_v39 = vpack.c.bf16 %v464_v36, %v463_v35  ;;  %v8457_v40 = vpack.c.bf16 %v482_v38, %v481_v37  ;;  %v466_v42 = vld [vmem:[%s8384_s21 + $0x68] sm:$0xff]  ;;  %v483_v43 = vld [vmem:[%s8384_s21 + $0xf0] sm:$0xff]  ;;  %v484_v44 = vld [vmem:[%s8384_s21 + $0xf8] sm:$0xff] }
  0x47   : > { %v8465_v45 = vpack.c.bf16 %v466_v42, %v465_v41  ;;  %v8469_v46 = vpack.c.bf16 %v484_v44, %v483_v43  ;;  %v467_v47 = vld [vmem:[%s8384_s21 + $0x70] sm:$0xff]  ;;  %v468_v48 = vld [vmem:[%s8384_s21 + $0x78] sm:$0xff]  ;;  %v617_v0 = vld [vmem:[#allocation2 + $0xc8] sm:$0xff]  ;;  %s5959_s21 = sshll.u32 %s447_s23, 4  ;;  %s9213_s21 = int_to_ptr.vmem [resolvable:$true] %s5959_s21 }
  0x48   : > { %v8475_v49 = vpack.c.bf16 %v468_v48, %v467_v47  ;;  %v494_v1 = vld [vmem:[#allocation2 + $0x48] sm:$0xff]  ;;  %v616_v2 = vld [vmem:[#allocation2 + $0xc0] sm:$0xff]  ;;  %v619_v5 = vld [vmem:[#allocation2 + $0xd8] sm:$0xff]  ;;  %s8151_s30 = scalar_lea.vmem %s9213_s21, 16  ;;  %p8158_p2 = scmp.lt.s32.totalorder %s9213_s21, %s8156_s27 }
  0x49   : > { %7533 = vmatpush3.bf16.msra.mxu1 %v8417_v19  ;;  %7501 = vmatpush3.bf16.msra.mxu0 %v8417_v19  ;;  %v493_v4 = vld [vmem:[#allocation2 + $0x40] sm:$0xff]  ;;  %v496_v6 = vld [vmem:[#allocation2 + $0x58] sm:$0xff]  ;;  %v618_v9 = vld [vmem:[#allocation2 + $0xd0] sm:$0xff]  ;;  %p8152_p6 = scmp.ne.s32.totalorder %s9213_s21, %s8151_s30  ;;  %p8159_p3 = scmp.lt.s32.totalorder %s8157_s14, %s8151_s30 }
  0x4a   : > { %7535 = vmatprep.subr.bf16.mxu1 %v8421_v20  ;;  %7503 = vmatprep.subr.bf16.mxu0 %v8421_v20  ;;  %v495_v10 = vld [vmem:[#allocation2 + $0x50] sm:$0xff]  ;;  %v621_v11 = vld [vmem:[#allocation2 + $0xe8] sm:$0xff]  ;;  %v620_v15 = vld [vmem:[#allocation2 + $0xe0] sm:$0xff] }
  0x4b   : > { %v498_v12 = vld [vmem:[#allocation2 + $0x68] sm:$0xff]  ;;  %v497_v16 = vld [vmem:[#allocation2 + $0x60] sm:$0xff]  ;;  %v623_v17 = vld [vmem:[#allocation2 + $0xf8] sm:$0xff]  ;;  %p8153_p10 = pnand %p8152_p6, %p9283_p9  ;;  %p8160_p4 = por %p8159_p3, %p8158_p2 }
  0x4c   : > { %v500_v18 = vld [vmem:[#allocation2 + $0x78] sm:$0xff]  ;;  %v622_v21 = vld [vmem:[#allocation2 + $0xf0] sm:$0xff]  ;;  %v999_v23 = vld [vmem:[#allocation2 + $0x108] sm:$0xff] }
  0x4d   : > { %7537 = vmatpush3.bf16.msra.mxu1 %v8429_v26  ;;  %7505 = vmatpush3.bf16.msra.mxu0 %v8429_v26  ;;  %v499_v22 = vld [vmem:[#allocation2 + $0x70] sm:$0xff]  ;;  %v998_v24 = vld [vmem:[#allocation2 + $0x100] sm:$0xff]  ;;  %v1001_v25 = vld [vmem:[#allocation2 + $0x118] sm:$0xff]  ;;  %p8154_p12 = pneg %p8153_p10 }
  0x4e   : > { %7539 = vmatprep.subr.bf16.mxu1 %v8433_v27  ;;  %7507 = vmatprep.subr.bf16.mxu0 %v8433_v27  ;;  %v1000_v28 = vld [vmem:[#allocation2 + $0x110] sm:$0xff]  ;;  %v1003_v29 = vld [vmem:[#allocation2 + $0x128] sm:$0xff]  ;;  %v1005_v31 = vld [vmem:[#allocation2 + $0x138] sm:$0xff] }
  0x4f   : > { %v1004_v32 = vld [vmem:[#allocation2 + $0x130] sm:$0xff]  ;;  %v1007_v35 = vld [vmem:[#allocation2 + $0x148] sm:$0xff]  ;;  %v1006_v36 = vld [vmem:[#allocation2 + $0x140] sm:$0xff]  ;;  %p8161_p7 = pnand %p8160_p4, %p8154_p12 }
  0x50   : > { %v1009_v37 = vld [vmem:[#allocation2 + $0x158] sm:$0xff]  ;;  %v1008_v38 = vld [vmem:[#allocation2 + $0x150] sm:$0xff]  ;;  %v1011_v41 = vld [vmem:[#allocation2 + $0x168] sm:$0xff] }
  0x51   : > { %7541 = vmatpush3.bf16.msra.mxu1 %v8441_v33  ;;  %7509 = vmatpush3.bf16.msra.mxu0 %v8441_v33  ;;  %v1010_v42 = vld [vmem:[#allocation2 + $0x160] sm:$0xff]  ;;  %v1013_v43 = vld [vmem:[#allocation2 + $0x178] sm:$0xff]  ;;  %v1012_v44 = vld [vmem:[#allocation2 + $0x170] sm:$0xff] }
  0x52   : > { %7543 = vmatprep.subr.bf16.mxu1 %v8445_v34  ;;  %7511 = vmatprep.subr.bf16.mxu0 %v8445_v34  ;;  %v1263_v47 = vld [vmem:[#allocation2 + $0x188] sm:$0xff]  ;;  %v1262_v48 = vld [vmem:[#allocation2 + $0x180] sm:$0xff] }
  0x55   : > { %7545 = vmatpush3.bf16.msra.mxu1 %v8453_v39  ;;  %7513 = vmatpush3.bf16.msra.mxu0 %v8453_v39 }
  0x56   : > { %7547 = vmatprep.subr.bf16.mxu1 %v8457_v40  ;;  %7515 = vmatprep.subr.bf16.mxu0 %v8457_v40 }
  0x59   : > { %7549 = vmatpush3.bf16.msra.mxu1 %v8465_v45  ;;  %7517 = vmatpush3.bf16.msra.mxu0 %v8465_v45 }
  0x5a   : > { %7551 = vmatprep.subr.bf16.mxu1 %v8469_v46  ;;  %7519 = vmatprep.subr.bf16.mxu0 %v8469_v46 }
  0x5d   : > { %7553 = vmatpush3.bf16.msra.mxu1 %v8475_v49  ;;  %7521 = vmatpush3.bf16.msra.mxu0 %v8475_v49 }
  0x5e   : > { %7555 = vmatprep.subr.bf16.mxu1 %v8389_v3 }
  0x60   : > { %689 = vmatmul.mubr.f32.vlgmr.msra.gmra.mrb[0].mxu1 %v608_v50  ;;  %566 = vmatmul.mubr.f32.vlgmr.msra.gmra.mrb[0].mxu0 %v485_v51  ;;  %v1265_v50 = vld [vmem:[#allocation2 + $0x198] sm:$0xff]  ;;  %v1264_v51 = vld [vmem:[#allocation2 + $0x190] sm:$0xff] }
  0x61   : > { %7557 = vmatpush3.bf16.msra.mxu1 %v8394_v7  ;;  %693 = vmatprep.mubr.f32.mxu1 %v611_v52  ;;  %v1267_v52 = vld [vmem:[#allocation2 + $0x1a8] sm:$0xff] }
  0x62   : > { %7559 = vmatprep.subr.bf16.mxu1 %v8396_v8  ;;  %570 = vmatprep.mubr.f32.mxu0 %v488_v53  ;;  %v1266_v53 = vld [vmem:[#allocation2 + $0x1a0] sm:$0xff] }
  0x64   : > { %694 = vmatmul.mubr.f32.gmra.mrb[2].mxu1 %v610_v54  ;;  %571 = vmatmul.mubr.f32.gmra.mrb[2].mxu0 %v487_v55  ;;  %v1269_v54 = vld [vmem:[#allocation2 + $0x1b8] sm:$0xff]  ;;  %v1268_v55 = vld [vmem:[#allocation2 + $0x1b0] sm:$0xff] }
  0x65   : > { %7561 = vmatpush3.bf16.msra.mxu1 %v8405_v13  ;;  %698 = vmatprep.mubr.f32.mxu1 %v613_v56  ;;  %v1271_v56 = vld [vmem:[#allocation2 + $0x1c8] sm:$0xff] }
  0x66   : > { %7563 = vmatprep.subr.bf16.mxu1 %v8409_v14  ;;  %575 = vmatprep.mubr.f32.mxu0 %v490_v57  ;;  %v1270_v57 = vld [vmem:[#allocation2 + $0x1c0] sm:$0xff] }
  0x68   : > { %699 = vmatmul.mubr.f32.gmra.mrb[4].mxu1 %v612_v58  ;;  %576 = vmatmul.mubr.f32.gmra.mrb[4].mxu0 %v489_v59  ;;  %v1273_v58 = vld [vmem:[#allocation2 + $0x1d8] sm:$0xff]  ;;  %v1272_v59 = vld [vmem:[#allocation2 + $0x1d0] sm:$0xff] }
  0x69   : > { %7565 = vmatpush3.bf16.msra.mxu1 %v8417_v19  ;;  %703 = vmatprep.mubr.f32.mxu1 %v615_v60  ;;  %v1275_v60 = vld [vmem:[#allocation2 + $0x1e8] sm:$0xff] }
  0x6a   : > { %7567 = vmatprep.subr.bf16.mxu1 %v8421_v20  ;;  %580 = vmatprep.mubr.f32.mxu0 %v492_v61  ;;  %v1274_v61 = vld [vmem:[#allocation2 + $0x1e0] sm:$0xff] }
  0x6c   : > { %704 = vmatmul.mubr.f32.gmra.mrb[6].mxu1 %v614_v62  ;;  %581 = vmatmul.mubr.f32.gmra.mrb[6].mxu0 %v491_v63  ;;  %v1277_v62 = vld [vmem:[#allocation2 + $0x1f8] sm:$0xff]  ;;  %v6034_v63 = vld [vmem:[%s9255_s2 + $0x4] sm:$0x7] }
  0x6d   : > { %7569 = vmatpush3.bf16.msra.mxu1 %v8429_v26  ;;  %708 = vmatprep.mubr.f32.mxu1 %v617_v0  ;;  %v1276_v0 = vld [vmem:[#allocation2 + $0x1f0] sm:$0xff] }
  0x6e   : > { %7571 = vmatprep.subr.bf16.mxu1 %v8433_v27  ;;  %585 = vmatprep.mubr.f32.mxu0 %v494_v1  ;;  %v1527_v1 = vld [vmem:[#allocation2 + $0x208] sm:$0xff] }
  0x6f   : > { %7000 = vmatprep.subr.msk.mxu0 %vm756_vm0, %v6034_v63 }
  0x70   : > { %709 = vmatmul.mubr.f32.gmra.mrb[8].mxu1 %v616_v2  ;;  %586 = vmatmul.mubr.f32.gmra.mrb[8].mxu0 %v493_v4  ;;  %v1526_v2 = vld [vmem:[#allocation2 + $0x200] sm:$0xff]  ;;  %v1529_v4 = vld [vmem:[#allocation2 + $0x218] sm:$0xff] }
  0x71   : > { %7573 = vmatpush3.bf16.msra.mxu1 %v8441_v33  ;;  %713 = vmatprep.mubr.f32.mxu1 %v619_v5  ;;  %v1528_v5 = vld [vmem:[#allocation2 + $0x210] sm:$0xff] }
  0x72   : > { %7575 = vmatprep.subr.bf16.mxu1 %v8445_v34  ;;  %590 = vmatprep.mubr.f32.mxu0 %v496_v6  ;;  %v1531_v6 = vld [vmem:[#allocation2 + $0x228] sm:$0xff] }
  0x73   : > { %7001 = vmatpush3.msk.msra.mxu0 %vm756_vm0, %v6034_v63 }
  0x74   : > { %714 = vmatmul.mubr.f32.gmra.mrb[10].mxu1 %v618_v9  ;;  %591 = vmatmul.mubr.f32.gmra.mrb[10].mxu0 %v495_v10  ;;  %v1530_v9 = vld [vmem:[#allocation2 + $0x220] sm:$0xff]  ;;  %v1533_v10 = vld [vmem:[#allocation2 + $0x238] sm:$0xff] }
  0x75   : > { %7577 = vmatpush3.bf16.msra.mxu1 %v8453_v39  ;;  %718 = vmatprep.mubr.f32.mxu1 %v621_v11  ;;  %v1532_v11 = vld [vmem:[#allocation2 + $0x230] sm:$0xff] }
  0x76   : > { %7579 = vmatprep.subr.bf16.mxu1 %v8457_v40  ;;  %595 = vmatprep.mubr.f32.mxu0 %v498_v12  ;;  %v1535_v12 = vld [vmem:[#allocation2 + $0x248] sm:$0xff] }
  0x78   : > { %719 = vmatmul.mubr.f32.gmra.mrb[12].mxu1 %v620_v15  ;;  %596 = vmatmul.mubr.f32.gmra.mrb[12].mxu0 %v497_v16  ;;  %v1534_v15 = vld [vmem:[#allocation2 + $0x240] sm:$0xff]  ;;  %v1537_v16 = vld [vmem:[#allocation2 + $0x258] sm:$0xff] }
  0x79   : > { %7581 = vmatpush3.bf16.msra.mxu1 %v8465_v45  ;;  %723 = vmatprep.mubr.f32.mxu1 %v623_v17  ;;  %v1536_v17 = vld [vmem:[#allocation2 + $0x250] sm:$0xff] }
  0x7a   : > { %7583 = vmatprep.subr.bf16.mxu1 %v8469_v46  ;;  %600 = vmatprep.mubr.f32.mxu0 %v500_v18  ;;  %v1539_v18 = vld [vmem:[#allocation2 + $0x268] sm:$0xff] }
  0x7c   : > { %724 = vmatmul.mubr.f32.gmra.mrb[14].mxu1 %v622_v21  ;;  %601 = vmatmul.mubr.f32.gmra.mrb[14].mxu0 %v499_v22  ;;  %v8549_v21 = vld [vmem:[%s9255_s2] sm:$0x7] }
  0x7d   : > { %7585 = vmatpush3.bf16.msra.mxu1 %v8475_v49  ;;  %1078 = vmatprep.mubr.f32.mxu1 %v999_v23  ;;  %v1538_v22 = vld [vmem:[#allocation2 + $0x260] sm:$0xff]  ;;  %v1541_v23 = vld [vmem:[#allocation2 + $0x278] sm:$0xff] }
  0x7e   : > { %7587 = vmatprep.subr.bf16.mxu1 %v8389_v3  ;;  %7014 = vmatprep.subr.msk.mxu0 %vm756_vm0, %v8549_v21 }
  0x80   : > { %1079 = vmatmul.mubr.f32.vlgmr.msra.gmra.mrb[16].mxu1 %v998_v24  ;;  %v1540_v24 = vld [vmem:[#allocation2 + $0x270] sm:$0xff] }
  0x81   : > { %7589 = vmatpush3.bf16.msra.mxu1 %v8394_v7  ;;  %1083 = vmatprep.mubr.f32.mxu1 %v1001_v25  ;;  %v2055_v25 = vld [vmem:[#allocation2 + $0x308] sm:$0xff] }
  0x82   : > { %7591 = vmatprep.subr.bf16.mxu1 %v8396_v8 }
  0x84   : > { %1084 = vmatmul.mubr.f32.gmra.mrb[18].mxu1 %v1000_v28  ;;  %v2054_v28 = vld [vmem:[#allocation2 + $0x300] sm:$0xff] }
  0x85   : > { %7593 = vmatpush3.bf16.msra.mxu1 %v8405_v13  ;;  %1088 = vmatprep.mubr.f32.mxu1 %v1003_v29  ;;  %v2057_v29 = vld [vmem:[#allocation2 + $0x318] sm:$0xff] }
  0x86   : > { %7595 = vmatprep.subr.bf16.mxu1 %v8409_v14 }
  0x88   : > { %1089 = vmatmul.mubr.f32.gmra.mrb[20].mxu1 %v1002_v30  ;;  %v2056_v30 = vld [vmem:[#allocation2 + $0x310] sm:$0xff] }
  0x89   : > { %7597 = vmatpush3.bf16.msra.mxu1 %v8417_v19  ;;  %1093 = vmatprep.mubr.f32.mxu1 %v1005_v31  ;;  %v2059_v31 = vld [vmem:[#allocation2 + $0x328] sm:$0xff] }
  0x8a   : > { %7599 = vmatprep.subr.bf16.mxu1 %v8421_v20 }
  0x8c   : > { %1094 = vmatmul.mubr.f32.gmra.mrb[22].mxu1 %v1004_v32  ;;  %v2058_v32 = vld [vmem:[#allocation2 + $0x320] sm:$0xff] }
  0x8d   : > { %7601 = vmatpush3.bf16.msra.mxu1 %v8429_v26  ;;  %1098 = vmatprep.mubr.f32.mxu1 %v1007_v35 }
  0x8e   : > { %7603 = vmatprep.subr.bf16.mxu1 %v8433_v27 }
  0x90   : > { %1099 = vmatmul.mubr.f32.gmra.mrb[24].mxu1 %v1006_v36 }
  0x91   : > { %7605 = vmatpush3.bf16.msra.mxu1 %v8441_v33  ;;  %1103 = vmatprep.mubr.f32.mxu1 %v1009_v37 }
  0x92   : > { %7607 = vmatprep.subr.bf16.mxu1 %v8445_v34 }
  0x94   : > { %1104 = vmatmul.mubr.f32.gmra.mrb[26].mxu1 %v1008_v38 }
  0x95   : > { %7609 = vmatpush3.bf16.msra.mxu1 %v8453_v39  ;;  %1108 = vmatprep.mubr.f32.mxu1 %v1011_v41  ;;  %v2061_v41 = vld [vmem:[#allocation2 + $0x338] sm:$0xff] }
  0x96   : > { %7611 = vmatprep.subr.bf16.mxu1 %v8457_v40 }
  0x98   : > { %1109 = vmatmul.mubr.f32.gmra.mrb[28].mxu1 %v1010_v42 }
  0x99   : > { %7613 = vmatpush3.bf16.msra.mxu1 %v8465_v45  ;;  %1113 = vmatprep.mubr.f32.mxu1 %v1013_v43 }
  0x9a   : > { %7615 = vmatprep.subr.bf16.mxu1 %v8469_v46 }
  0x9c   : > { %1114 = vmatmul.mubr.f32.gmra.mrb[30].mxu1 %v1012_v44  ;;  %v2060_v44 = vld [vmem:[#allocation2 + $0x330] sm:$0xff] }
  0x9d   : > { %7617 = vmatpush3.bf16.msra.mxu1 %v8475_v49  ;;  %1342 = vmatprep.mubr.f32.mxu1 %v1263_v47 }
  0x9e   : > { %7619 = vmatprep.subr.bf16.mxu1 %v8389_v3 }
  0xa0   : > { %1343 = vmatmul.mubr.f32.vlgmr.msra.gmra.mrb[32].mxu1 %v1262_v48 }
  0xa1   : > { %7621 = vmatpush3.bf16.msra.mxu1 %v8394_v7  ;;  %1347 = vmatprep.mubr.f32.mxu1 %v1265_v50 }
  0xa2   : > { %7623 = vmatprep.subr.bf16.mxu1 %v8396_v8 }
  0xa4   : > { %1348 = vmatmul.mubr.f32.gmra.mrb[34].mxu1 %v1264_v51 }
  0xa5   : > { %7625 = vmatpush3.bf16.msra.mxu1 %v8405_v13  ;;  %1352 = vmatprep.mubr.f32.mxu1 %v1267_v52  ;;  %v2063_v52 = vld [vmem:[#allocation2 + $0x348] sm:$0xff] }
  0xa6   : > { %7627 = vmatprep.subr.bf16.mxu1 %v8409_v14 }
  0xa8   : > { %1353 = vmatmul.mubr.f32.gmra.mrb[36].mxu1 %v1266_v53 }
  0xa9   : > { %7629 = vmatpush3.bf16.msra.mxu1 %v8417_v19  ;;  %1357 = vmatprep.mubr.f32.mxu1 %v1269_v54 }
  0xaa   : > { %7631 = vmatprep.subr.bf16.mxu1 %v8421_v20 }
  0xac   : > { %1358 = vmatmul.mubr.f32.gmra.mrb[38].mxu1 %v1268_v55  ;;  %v2062_v55 = vld [vmem:[#allocation2 + $0x340] sm:$0xff] }
  0xad   : > { %7633 = vmatpush3.bf16.msra.mxu1 %v8429_v26  ;;  %1362 = vmatprep.mubr.f32.mxu1 %v1271_v56  ;;  %v8575_v56 = vld [vmem:[%s9255_s2 + $0x8] sm:$0x7] }
  0xae   : > { %7635 = vmatprep.subr.bf16.mxu1 %v8433_v27 }
  0xb0   : > { %1363 = vmatmul.mubr.f32.gmra.mrb[40].mxu1 %v1270_v57 }
  0xb1   : > { %7637 = vmatpush3.bf16.msra.mxu1 %v8441_v33  ;;  %1367 = vmatprep.mubr.f32.mxu1 %v1273_v58 }
  0xb2   : > { %7639 = vmatprep.subr.bf16.mxu1 %v8445_v34 }
  0xb4   : > { %1368 = vmatmul.mubr.f32.gmra.mrb[42].mxu1 %v1272_v59 }
  0xb5   : > { %7641 = vmatpush3.bf16.msra.mxu1 %v8453_v39  ;;  %1372 = vmatprep.mubr.f32.mxu1 %v1275_v60 }
  0xb6   : > { %7643 = vmatprep.subr.bf16.mxu1 %v8457_v40 }
  0xb8   : > { %1373 = vmatmul.mubr.f32.gmra.mrb[44].mxu1 %v1274_v61  ;;  %v2065_v61 = vld [vmem:[#allocation2 + $0x358] sm:$0xff] }
  0xb9   : > { %7645 = vmatpush3.bf16.msra.mxu1 %v8465_v45  ;;  %1377 = vmatprep.mubr.f32.mxu1 %v1277_v62 }
  0xba   : > { %7647 = vmatprep.subr.bf16.mxu1 %v8469_v46 }
  0xbc   : > { %1378 = vmatmul.mubr.f32.gmra.mrb[46].mxu1 %v1276_v0  ;;  %v2064_v0 = vld [vmem:[#allocation2 + $0x350] sm:$0xff] }
  0xbd   : > { %7649 = vmatpush3.bf16.msra.mxu1 %v8475_v49  ;;  %1606 = vmatprep.mubr.f32.mxu1 %v1527_v1 }
  0xbe   : > { %7683 = vmatprep.subr.bf16.mxu1 %v8389_v3 }
  0xc0   : > { %1607 = vmatmul.mubr.f32.vlgmr.msra.gmra.mrb[48].mxu1 %v1526_v2 }
  0xc1   : > { %1611 = vmatprep.mubr.f32.mxu1 %v1529_v4  ;;  %7685 = vmatpush3.bf16.msra.mxu1 %v8394_v7 }
  0xc2   : > { %7687 = vmatprep.subr.bf16.mxu1 %v8396_v8 }
  0xc4   : > { %1612 = vmatmul.mubr.f32.gmra.mrb[50].mxu1 %v1528_v5 }
  0xc5   : > { %1616 = vmatprep.mubr.f32.mxu1 %v1531_v6  ;;  %7689 = vmatpush3.bf16.msra.mxu1 %v8405_v13  ;;  %v2067_v6 = vld [vmem:[#allocation2 + $0x368] sm:$0xff] }
  0xc6   : > { %7691 = vmatprep.subr.bf16.mxu1 %v8409_v14 }
  0xc8   : > { %1617 = vmatmul.mubr.f32.gmra.mrb[52].mxu1 %v1530_v9 }
  0xc9   : > { %1621 = vmatprep.mubr.f32.mxu1 %v1533_v10  ;;  %7693 = vmatpush3.bf16.msra.mxu1 %v8417_v19 }
  0xca   : > { %7695 = vmatprep.subr.bf16.mxu1 %v8421_v20 }
  0xcc   : > { %1622 = vmatmul.mubr.f32.gmra.mrb[54].mxu1 %v1532_v11  ;;  %v2066_v11 = vld [vmem:[#allocation2 + $0x360] sm:$0xff] }
  0xcd   : > { %1626 = vmatprep.mubr.f32.mxu1 %v1535_v12  ;;  %7697 = vmatpush3.bf16.msra.mxu1 %v8429_v26 }
  0xce   : > { %7699 = vmatprep.subr.bf16.mxu1 %v8433_v27 }
  0xd0   : > { %1627 = vmatmul.mubr.f32.gmra.mrb[56].mxu1 %v1534_v15 }
  0xd1   : > { %1631 = vmatprep.mubr.f32.mxu1 %v1537_v16  ;;  %7701 = vmatpush3.bf16.msra.mxu1 %v8441_v33 }
  0xd2   : > { %7703 = vmatprep.subr.bf16.mxu1 %v8445_v34 }
  0xd4   : > { %1632 = vmatmul.mubr.f32.gmra.mrb[58].mxu1 %v1536_v17 }
  0xd5   : > { %1636 = vmatprep.mubr.f32.mxu1 %v1539_v18  ;;  %7705 = vmatpush3.bf16.msra.mxu1 %v8453_v39  ;;  %v2069_v18 = vld [vmem:[#allocation2 + $0x378] sm:$0xff] }
  0xd6   : > { %7707 = vmatprep.subr.bf16.mxu1 %v8457_v40 }
  0xd8   : > { %1637 = vmatmul.mubr.f32.gmra.mrb[60].mxu1 %v1538_v22 }
  0xd9   : > { %1641 = vmatprep.mubr.f32.mxu1 %v1541_v23  ;;  %7709 = vmatpush3.bf16.msra.mxu1 %v8465_v45  ;;  %v2068_v23 = vld [vmem:[#allocation2 + $0x370] sm:$0xff] }
  0xda   : > { %7711 = vmatprep.subr.bf16.mxu1 %v8469_v46 }
  0xdc   : > { %1642 = vmatmul.mubr.f32.gmra.mrb[62].mxu1 %v1540_v24 }
  0xdd   : > { %7713 = vmatpush3.bf16.msra.mxu1 %v8475_v49  ;;  %2134 = vmatprep.mubr.f32.mxu1 %v2055_v25 }
  0xde   : > { %7715 = vmatprep.subr.bf16.mxu1 %v8389_v3 }
  0xe0   : > { %2135 = vmatmul.mubr.f32.vlgmr.msra.gmra.mrb[64].mxu1 %v2054_v28 }
  0xe1   : > { %7717 = vmatpush3.bf16.msra.mxu1 %v8394_v7  ;;  %2139 = vmatprep.mubr.f32.mxu1 %v2057_v29 }
  0xe2   : > { %7719 = vmatprep.subr.bf16.mxu1 %v8396_v8 }
  0xe4   : > { %2140 = vmatmul.mubr.f32.gmra.mrb[66].mxu1 %v2056_v30  ;;  %v2319_v30 = vld [vmem:[#allocation2 + $0x388] sm:$0xff] }
  0xe5   : > { %7721 = vmatpush3.bf16.msra.mxu1 %v8405_v13  ;;  %2144 = vmatprep.mubr.f32.mxu1 %v2059_v31 }
  0xe6   : > { %7723 = vmatprep.subr.bf16.mxu1 %v8409_v14 }
  0xe8   : > { %2145 = vmatmul.mubr.f32.gmra.mrb[68].mxu1 %v2058_v32 }
  0xe9   : > { %7725 = vmatpush3.bf16.msra.mxu1 %v8417_v19  ;;  %2149 = vmatprep.mubr.f32.mxu1 %v2061_v41 }
  0xea   : > { %7727 = vmatprep.subr.bf16.mxu1 %v8421_v20 }
  0xec   : > { %2150 = vmatmul.mubr.f32.gmra.mrb[70].mxu1 %v2060_v44 }
  0xed   : > { %7729 = vmatpush3.bf16.msra.mxu1 %v8429_v26  ;;  %2154 = vmatprep.mubr.f32.mxu1 %v2063_v52 }
  0xee   : > { %7731 = vmatprep.subr.bf16.mxu1 %v8433_v27 }
  0xf0   : > { %2155 = vmatmul.mubr.f32.gmra.mrb[72].mxu1 %v2062_v55  ;;  %v2323_v55 = vld [vmem:[#allocation2 + $0x3a8] sm:$0xff] }
  0xf1   : > { %7733 = vmatpush3.bf16.msra.mxu1 %v8441_v33  ;;  %2159 = vmatprep.mubr.f32.mxu1 %v2065_v61 }
  0xf2   : > { %7735 = vmatprep.subr.bf16.mxu1 %v8445_v34 }
  0xf4   : > { %2160 = vmatmul.mubr.f32.gmra.mrb[74].mxu1 %v2064_v0 }
  0xf5   : > { %7737 = vmatpush3.bf16.msra.mxu1 %v8453_v39  ;;  %2164 = vmatprep.mubr.f32.mxu1 %v2067_v6  ;;  %v2326_v6 = vld [vmem:[#allocation2 + $0x3c0] sm:$0xff] }
  0xf6   : > { %7739 = vmatprep.subr.bf16.mxu1 %v8457_v40 }
  0xf8   : > { %2165 = vmatmul.mubr.f32.gmra.mrb[76].mxu1 %v2066_v11  ;;  %v2329_v11 = vld [vmem:[#allocation2 + $0x3d8] sm:$0xff] }
  0xf9   : > { %7741 = vmatpush3.bf16.msra.mxu1 %v8465_v45  ;;  %2169 = vmatprep.mubr.f32.mxu1 %v2069_v18 }
  0xfa   : > { %7743 = vmatprep.subr.bf16.mxu1 %v8469_v46 }
  0xfc   : > { %2170 = vmatmul.mubr.f32.gmra.mrb[78].mxu1 %v2068_v23  ;;  %v2332_v23 = vld [vmem:[#allocation2 + $0x3f0] sm:$0xff] }
  0xfd   : > { %7745 = vmatpush3.bf16.msra.mxu1 %v8475_v49  ;;  %2398 = vmatprep.mubr.f32.mxu1 %v2319_v30 }
  0xfe   : > { %7747 = vmatprep.subr.bf16.mxu1 %v8389_v3 }
 0x133   : > { %v6322_v35 = vpop.f32.mrb[0].mxu1  ;;  %v6266_v36 = vpop.f32.mrb[0].mxu0 }
 0x134   : > { %v6323_v37 = vpop.f32.mrb[1].mxu1  ;;  %v6267_v38 = vpop.f32.mrb[1].mxu0 }
 0x135   : > { %v6324_v42 = vadd.f32 %v6323_v37, %v6322_v35  ;;  %v8565_v43 = vadd.f32 %v6267_v38, %v6266_v36  ;;  %v2318_v35 = vld [vmem:[#allocation2 + $0x380] sm:$0xff] }
 0x136   : > { %2399 = vmatmul.mubr.f32.vlgmr.msra.gmra.mrb[80].mxu1 %v2318_v35  ;;  %v2585_v35 = vld [vmem:[#allocation2 + $0x418] sm:$0xff] }
 0x137   : > { %v6325_v47 = vpop.f32.mrb[2].mxu1  ;;  %7002 = vmatprep.mubr.msk.f32.mxu0 %vm731_vm1, %v6324_v42  ;;  %v6269_v48 = vpop.f32.mrb[2].mxu0  ;;  %7749 = vmatpush3.bf16.msra.mxu1 %v8394_v7  ;;  %v2321_v42 = vld [vmem:[#allocation2 + $0x398] sm:$0xff] }
 0x138   : > { %v6326_v50 = vpop.f32.mrb[3].mxu1  ;;  %v6270_v51 = vpop.f32.mrb[3].mxu0  ;;  %7751 = vmatprep.subr.bf16.mxu1 %v8396_v8  ;;  %2403 = vmatprep.mubr.f32.mxu1 %v2321_v42  ;;  %v2587_v42 = vld [vmem:[#allocation2 + $0x428] sm:$0xff] }
 0x139   : > { %v6327_v53 = vadd.f32 %v6326_v50, %v6325_v47  ;;  %v8570_v54 = vadd.f32 %v6270_v51, %v6269_v48  ;;  %v2320_v48 = vld [vmem:[#allocation2 + $0x390] sm:$0xff] }
 0x13a   : > { %2404 = vmatmul.mubr.f32.gmra.mrb[82].mxu1 %v2320_v48  ;;  %v2586_v48 = vld [vmem:[#allocation2 + $0x420] sm:$0xff] }
 0x13b   : > { %v6328_v57 = vpop.f32.mrb[4].mxu1  ;;  %7003 = vmatmul.mubr.msk.f32.vlgmr.msra.gmra.mrb[16].mxu0 %vm731_vm1, %v6327_v53  ;;  %v6272_v58 = vpop.f32.mrb[4].mxu0  ;;  %7753 = vmatpush3.bf16.msra.mxu1 %v8405_v13 }
 0x13c   : > { %v6329_v59 = vpop.f32.mrb[5].mxu1  ;;  %v6273_v60 = vpop.f32.mrb[5].mxu0  ;;  %7015 = vmatpush3.msk.msra.mxu0 %vm756_vm0, %v8549_v21  ;;  %7755 = vmatprep.subr.bf16.mxu1 %v8409_v14 }
 0x13d   : > { %v6330_v62 = vadd.f32 %v6329_v59, %v6328_v57  ;;  %v8582_v63 = vadd.f32 %v6273_v60, %v6272_v58  ;;  %7028 = vmatprep.subr.msk.mxu0 %vm756_vm0, %v8575_v56  ;;  %2408 = vmatprep.mubr.f32.mxu1 %v2323_v55  ;;  %v2322_v59 = vld [vmem:[#allocation2 + $0x3a0] sm:$0xff]  ;;  %v2588_v55 = vld [vmem:[#allocation2 + $0x430] sm:$0xff] }
 0x13e   : > { %2409 = vmatmul.mubr.f32.gmra.mrb[84].mxu1 %v2322_v59 }
 0x13f   : > { %v6331_v1 = vpop.f32.mrb[6].mxu1  ;;  %7005 = vmatprep.mubr.msk.f32.mxu0 %vm731_vm1, %v6330_v62  ;;  %v6275_v2 = vpop.f32.mrb[6].mxu0  ;;  %7757 = vmatpush3.bf16.msra.mxu1 %v8417_v19  ;;  %v2325_v62 = vld [vmem:[#allocation2 + $0x3b8] sm:$0xff] }
 0x140   : > { %v6332_v4 = vpop.f32.mrb[7].mxu1  ;;  %v6276_v5 = vpop.f32.mrb[7].mxu0  ;;  %7759 = vmatprep.subr.bf16.mxu1 %v8421_v20  ;;  %2413 = vmatprep.mubr.f32.mxu1 %v2325_v62 }
 0x141   : > { %v6333_v9 = vadd.f32 %v6332_v4, %v6331_v1  ;;  %v8589_v10 = vadd.f32 %v6276_v5, %v6275_v2  ;;  %v2324_v1 = vld [vmem:[#allocation2 + $0x3b0] sm:$0xff]  ;;  %v6063_v2 = vld [vmem:[%s9255_s2 + $0xc] sm:$0x7] }
 0x142   : > { %2414 = vmatmul.mubr.f32.gmra.mrb[86].mxu1 %v2324_v1  ;;  %v2327_v5 = vld [vmem:[#allocation2 + $0x3c8] sm:$0xff] }
 0x143   : > { %v6334_v12 = vpop.f32.mrb[8].mxu1  ;;  %7006 = vmatmul.mubr.msk.f32.gmra.mrb[18].mxu0 %vm731_vm1, %v6333_v9  ;;  %v6278_v15 = vpop.f32.mrb[8].mxu0  ;;  %7761 = vmatpush3.bf16.msra.mxu1 %v8429_v26 }
 0x144   : > { %v6335_v16 = vpop.f32.mrb[9].mxu1  ;;  %v6279_v17 = vpop.f32.mrb[9].mxu0  ;;  %2418 = vmatprep.mubr.f32.mxu1 %v2327_v5  ;;  %7763 = vmatprep.subr.bf16.mxu1 %v8433_v27 }
 0x145   : > { %v6336_v21 = vadd.f32 %v6335_v16, %v6334_v12  ;;  %v8594_v22 = vadd.f32 %v6279_v17, %v6278_v15  ;;  %v2328_v12 = vld [vmem:[#allocation2 + $0x3d0] sm:$0xff] }
 0x146   : > { %2419 = vmatmul.mubr.f32.gmra.mrb[88].mxu1 %v2326_v6  ;;  %v2595_v6 = vld [vmem:[#allocation2 + $0x468] sm:$0xff] }
 0x147   : > { %v6337_v24 = vpop.f32.mrb[10].mxu1  ;;  %7008 = vmatprep.mubr.msk.f32.mxu0 %vm731_vm1, %v6336_v21  ;;  %v6281_v25 = vpop.f32.mrb[10].mxu0  ;;  %7765 = vmatpush3.bf16.msra.mxu1 %v8441_v33  ;;  %v2333_v21 = vld [vmem:[#allocation2 + $0x3f8] sm:$0xff] }
 0x148   : > { %v6338_v28 = vpop.f32.mrb[11].mxu1  ;;  %v6282_v29 = vpop.f32.mrb[11].mxu0  ;;  %2423 = vmatprep.mubr.f32.mxu1 %v2329_v11  ;;  %7767 = vmatprep.subr.bf16.mxu1 %v8445_v34  ;;  %v2594_v11 = vld [vmem:[#allocation2 + $0x460] sm:$0xff] }
 0x149   : > { %v6339_v31 = vadd.f32 %v6338_v28, %v6337_v24  ;;  %v8599_v32 = vadd.f32 %v6282_v29, %v6281_v25  ;;  %v6073_v28 = vld [vmem:[%s9255_s2 + $0x10] sm:$0x7]  ;;  %v2583_v29 = vld [vmem:[#allocation2 + $0x408] sm:$0xff] }
 0x14a   : > { %2424 = vmatmul.mubr.f32.gmra.mrb[90].mxu1 %v2328_v12  ;;  %v2597_v12 = vld [vmem:[#allocation2 + $0x478] sm:$0xff] }
 0x14b   : > { %v6340_v36 = vpop.f32.mrb[12].mxu1  ;;  %7009 = vmatmul.mubr.msk.f32.gmra.mrb[20].mxu0 %vm731_vm1, %v6339_v31  ;;  %v6284_v37 = vpop.f32.mrb[12].mxu0  ;;  %7769 = vmatpush3.bf16.msra.mxu1 %v8453_v39  ;;  %v2582_v31 = vld [vmem:[#allocation2 + $0x400] sm:$0xff] }
 0x14c   : > { %v6341_v38 = vpop.f32.mrb[13].mxu1  ;;  %v6285_v41 = vpop.f32.mrb[13].mxu0  ;;  %7771 = vmatprep.subr.bf16.mxu1 %v8457_v40 }
 0x14d   : > { %v6342_v44 = vadd.f32 %v6341_v38, %v6340_v36  ;;  %v6286_v47 = vadd.f32 %v6285_v41, %v6284_v37  ;;  %v2584_v38 = vld [vmem:[#allocation2 + $0x410] sm:$0xff] }
 0x14f   : > { %v6343_v50 = vpop.f32.mrb[14].mxu1  ;;  %7011 = vmatprep.mubr.msk.f32.mxu0 %vm731_vm1, %v6342_v44  ;;  %v6287_v51 = vpop.f32.mrb[14].mxu0  ;;  %7773 = vmatpush3.bf16.msra.mxu1 %v8465_v45 }
 0x150   : > { %v6344_v52 = vpop.f32.mrb[15].mxu1  ;;  %v6288_v53 = vpop.f32.mrb[15].mxu0  ;;  %7775 = vmatprep.subr.bf16.mxu1 %v8469_v46 }
 0x151   : > { %v6345_v57 = vadd.f32 %v6344_v52, %v6343_v50  ;;  %v6289_v58 = vadd.f32 %v6288_v53, %v6287_v51  ;;  %v2589_v51 = vld [vmem:[#allocation2 + $0x438] sm:$0xff] }
 0x153   : > { %7012 = vmatmul.mubr.msk.f32.gmra.mrb[22].mxu0 %vm731_vm1, %v6345_v57  ;;  %v6396_v60 = vpop.f32.mrb[16].mxu1  ;;  %7777 = vmatpush3.bf16.msra.mxu1 %v8475_v49 }
 0x154   : > { %v6397_v61 = vpop.f32.mrb[17].mxu1  ;;  %7016 = vmatprep.mubr.msk.f32.mxu0 %vm731_vm1, %v8565_v43 }
 0x155   : > { %v6398_v0 = vadd.f32 %v6397_v61, %v6396_v60  ;;  %v2590_v61 = vld [vmem:[#allocation2 + $0x440] sm:$0xff] }
 0x157   : > { %7017 = vmatmul.mubr.msk.f32.vlgmr.msra.gmra.mrb[16].mxu0 %vm731_vm1, %v8570_v54  ;;  %v6399_v4 = vpop.f32.mrb[18].mxu1 }
 0x158   : > { %v6400_v43 = vpop.f32.mrb[19].mxu1  ;;  %7019 = vmatprep.mubr.msk.f32.mxu0 %vm731_vm1, %v8582_v63  ;;  %7029 = vmatpush3.msk.msra.mxu0 %vm756_vm0, %v8575_v56  ;;  %v2331_v63 = vld [vmem:[#allocation2 + $0x3e8] sm:$0xff] }
 0x159   : > { %v6401_v9 = vadd.f32 %v6400_v43, %v6399_v4  ;;  %7042 = vmatprep.subr.msk.mxu0 %vm756_vm0, %v6063_v2  ;;  %2428 = vmatprep.mubr.f32.mxu1 %v2331_v63  ;;  %v2592_v4 = vld [vmem:[#allocation2 + $0x450] sm:$0xff] }
 0x15a   : > { %v2596_v63 = vld [vmem:[#allocation2 + $0x470] sm:$0xff] }
 0x15b   : > { %7020 = vmatmul.mubr.msk.f32.gmra.mrb[18].mxu0 %vm731_vm1, %v8589_v10  ;;  %v6402_v54 = vpop.f32.mrb[20].mxu1  ;;  %v2330_v10 = vld [vmem:[#allocation2 + $0x3e0] sm:$0xff] }
 0x15c   : > { %v6403_v15 = vpop.f32.mrb[21].mxu1  ;;  %7022 = vmatprep.mubr.msk.f32.mxu0 %vm731_vm1, %v8594_v22  ;;  %2429 = vmatmul.mubr.f32.gmra.mrb[92].mxu1 %v2330_v10 }
 0x15d   : > { %v6404_v56 = vadd.f32 %v6403_v15, %v6402_v54  ;;  %2433 = vmatprep.mubr.f32.mxu1 %v2333_v21 }
 0x15f   : > { %7023 = vmatmul.mubr.msk.f32.gmra.mrb[20].mxu0 %vm731_vm1, %v8599_v32  ;;  %v6405_v16 = vpop.f32.mrb[22].mxu1 }
 0x160   : > { %v6406_v17 = vpop.f32.mrb[23].mxu1  ;;  %7025 = vmatprep.mubr.msk.f32.mxu0 %vm731_vm1, %v6286_v47  ;;  %2434 = vmatmul.mubr.f32.gmra.mrb[94].mxu1 %v2332_v23 }
 0x161   : > { %v6407_v18 = vadd.f32 %v6406_v17, %v6405_v16  ;;  %2662 = vmatprep.mubr.f32.mxu1 %v2583_v29 }
 0x163   : > { %7026 = vmatmul.mubr.msk.f32.gmra.mrb[22].mxu0 %vm731_vm1, %v6289_v58  ;;  %v6408_v22 = vpop.f32.mrb[24].mxu1  ;;  %v2591_v58 = vld [vmem:[#allocation2 + $0x448] sm:$0xff] }
 0x164   : > { %v6409_v24 = vpop.f32.mrb[25].mxu1  ;;  %7030 = vmatprep.mubr.msk.f32.mxu0 %vm731_vm1, %v6398_v0  ;;  %2663 = vmatmul.mubr.f32.vlgmr.msra.gmra.mrb[96].mxu1 %v2582_v31  ;;  %v2593_v0 = vld [vmem:[#allocation2 + $0x458] sm:$0xff] }
 0x165   : > { %v6410_v25 = vadd.f32 %v6409_v24, %v6408_v22  ;;  %2667 = vmatprep.mubr.f32.mxu1 %v2585_v35 }
 0x167   : > { %v6411_v30 = vpop.f32.mrb[26].mxu1  ;;  %7031 = vmatmul.mubr.msk.f32.vlgmr.msra.gmra.mrb[16].mxu0 %vm731_vm1, %v6401_v9 }
 0x168   : > { %v6412_v32 = vpop.f32.mrb[27].mxu1  ;;  %7033 = vmatprep.mubr.msk.f32.mxu0 %vm731_vm1, %v6404_v56  ;;  %7043 = vmatpush3.msk.msra.mxu0 %vm756_vm0, %v6063_v2 }
 0x169   : > { %v6413_v36 = vadd.f32 %v6412_v32, %v6411_v30  ;;  %7056 = vmatprep.subr.msk.mxu0 %vm756_vm0, %v6073_v28  ;;  %2668 = vmatmul.mubr.f32.gmra.mrb[98].mxu1 %v2584_v38 }
 0x16a   : > { %2672 = vmatprep.mubr.f32.mxu1 %v2587_v42 }
 0x16b   : > { %v6414_v37 = vpop.f32.mrb[28].mxu1  ;;  %7034 = vmatmul.mubr.msk.f32.gmra.mrb[18].mxu0 %vm731_vm1, %v6407_v18 }
 0x16c   : > { %v6415_v41 = vpop.f32.mrb[29].mxu1  ;;  %7036 = vmatprep.mubr.msk.f32.mxu0 %vm731_vm1, %v6410_v25 }
 0x16d   : > { %v6416_v44 = vadd.f32 %v6415_v41, %v6414_v37  ;;  %2673 = vmatmul.mubr.f32.gmra.mrb[100].mxu1 %v2586_v48 }
 0x16e   : > { %2677 = vmatprep.mubr.f32.mxu1 %v2589_v51 }
 0x16f   : > { %v6417_v47 = vpop.f32.mrb[30].mxu1  ;;  %7037 = vmatmul.mubr.msk.f32.gmra.mrb[20].mxu0 %vm731_vm1, %v6413_v36 }
 0x170   : > { %v6418_v50 = vpop.f32.mrb[31].mxu1  ;;  %7039 = vmatprep.mubr.msk.f32.mxu0 %vm731_vm1, %v6416_v44 }
 0x171   : > { %v6419_v52 = vadd.f32 %v6418_v50, %v6417_v47  ;;  %2678 = vmatmul.mubr.f32.gmra.mrb[102].mxu1 %v2588_v55  ;;  %v1791_v55 = vld [vmem:[#allocation2 + $0x288] sm:$0xff] }
 0x172   : > { %2682 = vmatprep.mubr.f32.mxu1 %v2591_v58  ;;  %v1796_v58 = vld [vmem:[#allocation2 + $0x2b0] sm:$0xff] }
 0x173   : > { %7040 = vmatmul.mubr.msk.f32.gmra.mrb[22].mxu0 %vm731_vm1, %v6419_v52  ;;  %v6461_v53 = vpop.f32.mrb[32].mxu1 }
 0x174   : > { %v6462_v57 = vpop.f32.mrb[33].mxu1 }
 0x175   : > { %v6463_v59 = vadd.f32 %v6462_v57, %v6461_v53  ;;  %2683 = vmatmul.mubr.f32.gmra.mrb[104].mxu1 %v2590_v61  ;;  %v1794_v57 = vld [vmem:[#allocation2 + $0x2a0] sm:$0xff] }
 0x176   : > { %2687 = vmatprep.mubr.f32.mxu1 %v2593_v0  ;;  %v1802_v61 = vld [vmem:[#allocation2 + $0x2e0] sm:$0xff]  ;;  %v1804_v0 = vld [vmem:[#allocation2 + $0x2f0] sm:$0xff] }
 0x177   : > { %v6464_v60 = vpop.f32.mrb[34].mxu1  ;;  %7044 = vmatprep.mubr.msk.f32.mxu0 %vm731_vm1, %v6463_v59  ;;  %v1799_v59 = vld [vmem:[#allocation2 + $0x2c8] sm:$0xff] }
 0x178   : > { %v6465_v62 = vpop.f32.mrb[35].mxu1 }
 0x179   : > { %v6466_v1 = vadd.f32 %v6465_v62, %v6464_v60  ;;  %2688 = vmatmul.mubr.f32.gmra.mrb[106].mxu1 %v2592_v4  ;;  %v1803_v60 = vld [vmem:[#allocation2 + $0x2e8] sm:$0xff]  ;;  %v1805_v62 = vld [vmem:[#allocation2 + $0x2f8] sm:$0xff] }
 0x17a   : > { %2692 = vmatprep.mubr.f32.mxu1 %v2595_v6 }
 0x17b   : > { %v6467_v2 = vpop.f32.mrb[36].mxu1  ;;  %7045 = vmatmul.mubr.msk.f32.vlgmr.msra.gmra.mrb[16].mxu0 %vm731_vm1, %v6466_v1 }
 0x17c   : > { %v6468_v5 = vpop.f32.mrb[37].mxu1  ;;  %7057 = vmatpush3.msk.msra.mxu0 %vm756_vm0, %v6073_v28 }
 0x17d   : > { %v6469_v43 = vadd.f32 %v6468_v5, %v6467_v2  ;;  %7651 = vmatprep.subr.bf16.mxu0 %v8389_v3  ;;  %2693 = vmatmul.mubr.f32.gmra.mrb[108].mxu1 %v2594_v11 }
 0x17e   : > { %2697 = vmatprep.mubr.f32.mxu1 %v2597_v12 }
 0x17f   : > { %v6470_v9 = vpop.f32.mrb[38].mxu1  ;;  %7047 = vmatprep.mubr.msk.f32.mxu0 %vm731_vm1, %v6469_v43 }
 0x180   : > { %v6471_v54 = vpop.f32.mrb[39].mxu1 }
 0x181   : > { %v6472_v15 = vadd.f32 %v6471_v54, %v6470_v9  ;;  %2698 = vmatmul.mubr.f32.gmra.mrb[110].mxu1 %v2596_v63 }
 0x183   : > { %v6473_v56 = vpop.f32.mrb[40].mxu1  ;;  %7048 = vmatmul.mubr.msk.f32.gmra.mrb[18].mxu0 %vm731_vm1, %v6472_v15 }
 0x184   : > { %v6474_v16 = vpop.f32.mrb[41].mxu1 }
 0x185   : > { %v6475_v10 = vadd.f32 %v6474_v16, %v6473_v56 }
 0x187   : > { %v6476_v17 = vpop.f32.mrb[42].mxu1  ;;  %7050 = vmatprep.mubr.msk.f32.mxu0 %vm731_vm1, %v6475_v10 }
 0x188   : > { %v6477_v3 = vpop.f32.mrb[43].mxu1 }
 0x189   : > { %v6478_v18 = vadd.f32 %v6477_v3, %v6476_v17  ;;  %v6083_v3 = vld [vmem:[%s9255_s2 + $0x14] sm:$0x7] }
 0x18b   : > { %v6479_v21 = vpop.f32.mrb[44].mxu1  ;;  %7051 = vmatmul.mubr.msk.f32.gmra.mrb[20].mxu0 %vm731_vm1, %v6478_v18 }
 0x18c   : > { %v6480_v22 = vpop.f32.mrb[45].mxu1 }
 0x18d   : > { %v6481_v23 = vadd.f32 %v6480_v22, %v6479_v21 }
 0x18f   : > { %v6482_v24 = vpop.f32.mrb[46].mxu1  ;;  %7053 = vmatprep.mubr.msk.f32.mxu0 %vm731_vm1, %v6481_v23 }
 0x190   : > { %v6483_v25 = vpop.f32.mrb[47].mxu1 }
 0x191   : > { %v6484_v28 = vadd.f32 %v6483_v25, %v6482_v24 }
 0x193   : > { %7054 = vmatmul.mubr.msk.f32.gmra.mrb[22].mxu0 %vm731_vm1, %v6484_v28  ;;  %v6526_v29 = vpop.f32.mrb[48].mxu1 }
 0x194   : > { %v6527_v30 = vpop.f32.mrb[49].mxu1 }
 0x195   : > { %v6528_v31 = vadd.f32 %v6527_v30, %v6526_v29 }
 0x197   : > { %v6529_v32 = vpop.f32.mrb[50].mxu1  ;;  %7058 = vmatprep.mubr.msk.f32.mxu0 %vm731_vm1, %v6528_v31 }
 0x198   : > { %v6530_v35 = vpop.f32.mrb[51].mxu1 }
 0x199   : > { %v6531_v36 = vadd.f32 %v6530_v35, %v6529_v32 }
 0x19b   : > { %7059 = vmatmul.mubr.msk.f32.vlgmr.msra.gmra.mrb[16].mxu0 %vm731_vm1, %v6531_v36  ;;  %v6532_v37 = vpop.f32.mrb[52].mxu1 }
 0x19c   : > { %7653 = vmatpush3.bf16.msra.mxu0 %v8394_v7  ;;  %v6533_v38 = vpop.f32.mrb[53].mxu1 }
 0x19d   : > { %v6534_v41 = vadd.f32 %v6533_v38, %v6532_v37  ;;  %7655 = vmatprep.subr.bf16.mxu0 %v8396_v8 }
 0x19f   : > { %v6535_v42 = vpop.f32.mrb[54].mxu1  ;;  %7061 = vmatprep.mubr.msk.f32.mxu0 %vm731_vm1, %v6534_v41 }
 0x1a0   : > { %7657 = vmatpush3.bf16.msra.mxu0 %v8405_v13  ;;  %v6536_v44 = vpop.f32.mrb[55].mxu1 }
 0x1a1   : > { %v6537_v47 = vadd.f32 %v6536_v44, %v6535_v42  ;;  %7659 = vmatprep.subr.bf16.mxu0 %v8409_v14 }
 0x1a3   : > { %v6538_v48 = vpop.f32.mrb[56].mxu1  ;;  %7062 = vmatmul.mubr.msk.f32.gmra.mrb[18].mxu0 %vm731_vm1, %v6537_v47 }
 0x1a4   : > { %7661 = vmatpush3.bf16.msra.mxu0 %v8417_v19  ;;  %v6539_v50 = vpop.f32.mrb[57].mxu1 }
 0x1a5   : > { %v6540_v7 = vadd.f32 %v6539_v50, %v6538_v48  ;;  %7663 = vmatprep.subr.bf16.mxu0 %v8421_v20 }
 0x1a7   : > { %v6541_v51 = vpop.f32.mrb[58].mxu1  ;;  %7064 = vmatprep.mubr.msk.f32.mxu0 %vm731_vm1, %v6540_v7 }
 0x1a8   : > { %7665 = vmatpush3.bf16.msra.mxu0 %v8429_v26  ;;  %v6542_v8 = vpop.f32.mrb[59].mxu1 }
 0x1a9   : > { %v6543_v13 = vadd.f32 %v6542_v8, %v6541_v51  ;;  %7667 = vmatprep.subr.bf16.mxu0 %v8433_v27  ;;  %v1790_v27 = vld [vmem:[#allocation2 + $0x280] sm:$0xff]  ;;  %v6093_v51 = vld [vmem:[%s9255_s2 + $0x18] sm:$0x7] }
 0x1ab   : > { %v6544_v52 = vpop.f32.mrb[60].mxu1  ;;  %7065 = vmatmul.mubr.msk.f32.gmra.mrb[20].mxu0 %vm731_vm1, %v6543_v13 }
 0x1ac   : > { %7669 = vmatpush3.bf16.msra.mxu0 %v8441_v33  ;;  %v6545_v14 = vpop.f32.mrb[61].mxu1  ;;  %v1793_v33 = vld [vmem:[#allocation2 + $0x298] sm:$0xff] }
 0x1ad   : > { %v6546_v19 = vadd.f32 %v6545_v14, %v6544_v52  ;;  %7671 = vmatprep.subr.bf16.mxu0 %v8445_v34  ;;  %v1792_v34 = vld [vmem:[#allocation2 + $0x290] sm:$0xff] }
 0x1af   : > { %v6547_v53 = vpop.f32.mrb[62].mxu1  ;;  %7067 = vmatprep.mubr.msk.f32.mxu0 %vm731_vm1, %v6546_v19 }
 0x1b0   : > { %7673 = vmatpush3.bf16.msra.mxu0 %v8453_v39  ;;  %v6548_v20 = vpop.f32.mrb[63].mxu1  ;;  %v1795_v39 = vld [vmem:[#allocation2 + $0x2a8] sm:$0xff] }
 0x1b1   : > { %v6549_v26 = vadd.f32 %v6548_v20, %v6547_v53  ;;  %7675 = vmatprep.subr.bf16.mxu0 %v8457_v40  ;;  %v1797_v40 = vld [vmem:[#allocation2 + $0x2b8] sm:$0xff] }
 0x1b3   : > { %7068 = vmatmul.mubr.msk.f32.gmra.mrb[22].mxu0 %vm731_vm1, %v6549_v26  ;;  %v6656_v1 = vpop.f32.mrb[64].mxu1 }
 0x1b4   : > { %7677 = vmatpush3.bf16.msra.mxu0 %v8465_v45  ;;  %1870 = vmatprep.mubr.f32.mxu0 %v1791_v55  ;;  %v1798_v45 = vld [vmem:[#allocation2 + $0x2c0] sm:$0xff]  ;;  %v6657_v2 = vpop.f32.mrb[65].mxu1 }
 0x1b5   : > { %7679 = vmatprep.subr.bf16.mxu0 %v8469_v46  ;;  %v1801_v46 = vld [vmem:[#allocation2 + $0x2d8] sm:$0xff]  ;;  %v8685_v4 = vadd.f32 %v6657_v2, %v6656_v1 }
 0x1b7   : > { %v6659_v5 = vpop.f32.mrb[66].mxu1 }
 0x1b8   : > { %7681 = vmatpush3.bf16.msra.mxu0 %v8475_v49  ;;  %v1800_v49 = vld [vmem:[#allocation2 + $0x2d0] sm:$0xff]  ;;  %v6660_v6 = vpop.f32.mrb[67].mxu1 }
 0x1b9   : > { %v8687_v43 = vadd.f32 %v6660_v6, %v6659_v5  ;;  %7070 = vmatprep.subr.msk.mxu0 %vm756_vm0, %v6083_v3 }
 0x1bb   : > { %1871 = vmatmul.mubr.f32.vlgmr.msra.gmra.mrb[24].mxu0 %v1790_v27  ;;  %v6662_v9 = vpop.f32.mrb[68].mxu1 }
 0x1bc   : > { %1875 = vmatprep.mubr.f32.mxu0 %v1793_v33  ;;  %v6663_v11 = vpop.f32.mrb[69].mxu1  ;;  %7071 = vmatpush3.msk.msra.mxu0 %vm756_vm0, %v6083_v3 }
 0x1bd   : > { %v8689_v54 = vadd.f32 %v6663_v11, %v6662_v9  ;;  %7084 = vmatprep.subr.msk.mxu0 %vm756_vm0, %v6093_v51 }
 0x1bf   : > { %1876 = vmatmul.mubr.f32.gmra.mrb[26].mxu0 %v1792_v34  ;;  %v6665_v12 = vpop.f32.mrb[70].mxu1 }
 0x1c0   : > { %1880 = vmatprep.mubr.f32.mxu0 %v1795_v39  ;;  %v6666_v15 = vpop.f32.mrb[71].mxu1 }
 0x1c1   : > { %v8691_v56 = vadd.f32 %v6666_v15, %v6665_v12 }
 0x1c3   : > { %1881 = vmatmul.mubr.f32.gmra.mrb[28].mxu0 %v1794_v57  ;;  %v6668_v63 = vpop.f32.mrb[72].mxu1 }
 0x1c4   : > { %1885 = vmatprep.mubr.f32.mxu0 %v1797_v40  ;;  %v6669_v16 = vpop.f32.mrb[73].mxu1 }
 0x1c5   : > { %v8693_v10 = vadd.f32 %v6669_v16, %v6668_v63 }
 0x1c7   : > { %1886 = vmatmul.mubr.f32.gmra.mrb[30].mxu0 %v1796_v58  ;;  %v6671_v17 = vpop.f32.mrb[74].mxu1 }
 0x1c8   : > { %1890 = vmatprep.mubr.f32.mxu0 %v1799_v59  ;;  %v6672_v18 = vpop.f32.mrb[75].mxu1 }
 0x1c9   : > { %v8699_v21 = vadd.f32 %v6672_v18, %v6671_v17 }
 0x1cb   : > { %1891 = vmatmul.mubr.f32.gmra.mrb[32].mxu0 %v1798_v45  ;;  %v6674_v22 = vpop.f32.mrb[76].mxu1 }
 0x1cc   : > { %1895 = vmatprep.mubr.f32.mxu0 %v1801_v46  ;;  %v6675_v23 = vpop.f32.mrb[77].mxu1 }
 0x1cd   : > { %v8702_v24 = vadd.f32 %v6675_v23, %v6674_v22 }
 0x1cf   : > { %1896 = vmatmul.mubr.f32.gmra.mrb[34].mxu0 %v1800_v49  ;;  %v6677_v25 = vpop.f32.mrb[78].mxu1 }
 0x1d0   : > { %1900 = vmatprep.mubr.f32.mxu0 %v1803_v60  ;;  %v6678_v28 = vpop.f32.mrb[79].mxu1 }
 0x1d1   : > { %v8704_v29 = vadd.f32 %v6678_v28, %v6677_v25  ;;  %v6103_v28 = vld [vmem:[%s9255_s2 + $0x1c] sm:$0x7] }
 0x1d3   : > { %1901 = vmatmul.mubr.f32.gmra.mrb[36].mxu0 %v1802_v61 }
 0x1d4   : > { %1905 = vmatprep.mubr.f32.mxu0 %v1805_v62 }
 0x1d7   : > { %1906 = vmatmul.mubr.f32.gmra.mrb[38].mxu0 %v1804_v0 }
 0x209   : > { %v6721_v30 = vpop.f32.mrb[80].mxu1 }
 0x20a   : > { %v6722_v31 = vpop.f32.mrb[81].mxu1 }
 0x20b   : > { %v8706_v32 = vadd.f32 %v6722_v31, %v6721_v30 }
 0x20d   : > { %v6724_v35 = vpop.f32.mrb[82].mxu1 }
 0x20e   : > { %v6725_v36 = vpop.f32.mrb[83].mxu1 }
 0x20f   : > { %v8708_v37 = vadd.f32 %v6725_v36, %v6724_v35 }
 0x211   : > { %v6727_v38 = vpop.f32.mrb[84].mxu1 }
 0x212   : > { %v6728_v41 = vpop.f32.mrb[85].mxu1 }
 0x213   : > { %v8710_v42 = vadd.f32 %v6728_v41, %v6727_v38 }
 0x215   : > { %v6730_v44 = vpop.f32.mrb[86].mxu1 }
 0x216   : > { %v6731_v47 = vpop.f32.mrb[87].mxu1 }
 0x217   : > { %v8712_v48 = vadd.f32 %v6731_v47, %v6730_v44 }
 0x219   : > { %v6733_v50 = vpop.f32.mrb[88].mxu1 }
 0x21a   : > { %v6734_v7 = vpop.f32.mrb[89].mxu1 }
 0x21b   : > { %v8717_v8 = vadd.f32 %v6734_v7, %v6733_v50 }
 0x21d   : > { %v6736_v13 = vpop.f32.mrb[90].mxu1 }
 0x21e   : > { %v6737_v52 = vpop.f32.mrb[91].mxu1 }
 0x21f   : > { %v8720_v14 = vadd.f32 %v6737_v52, %v6736_v13 }
 0x22f   : > { %v6739_v19 = vpop.f32.mrb[92].mxu1 }
 0x230   : > { %v6740_v53 = vpop.f32.mrb[93].mxu1 }
 0x231   : > { %v8722_v20 = vadd.f32 %v6740_v53, %v6739_v19 }
 0x233   : > { %v6742_v26 = vpop.f32.mrb[94].mxu1 }
 0x234   : > { %v6743_v55 = vpop.f32.mrb[95].mxu1 }
 0x235   : > { %v8724_v27 = vadd.f32 %v6743_v55, %v6742_v26 }
 0x237   : > { %v6786_v33 = vpop.f32.mrb[96].mxu1 }
 0x238   : > { %v6787_v34 = vpop.f32.mrb[97].mxu1 }
 0x239   : > { %v8726_v39 = vadd.f32 %v6787_v34, %v6786_v33  ;;  %v6113_v34 = vld [vmem:[%s9255_s2 + $0x20] sm:$0x7] }
 0x23c   : > { %v6789_v57 = vpop.f32.mrb[98].mxu1 }
 0x23d   : > { %v6790_v40 = vpop.f32.mrb[99].mxu1 }
 0x23e   : > { %v8728_v58 = vadd.f32 %v6790_v40, %v6789_v57 }
 0x240   : > { %v6792_v59 = vpop.f32.mrb[100].mxu1 }
 0x241   : > { %v6793_v45 = vpop.f32.mrb[101].mxu1 }
 0x242   : > { %v8730_v46 = vadd.f32 %v6793_v45, %v6792_v59 }
 0x244   : > { %v6795_v49 = vpop.f32.mrb[102].mxu1 }
 0x245   : > { %v6796_v60 = vpop.f32.mrb[103].mxu1 }
 0x246   : > { %v8732_v61 = vadd.f32 %v6796_v60, %v6795_v49 }
 0x248   : > { %v6798_v62 = vpop.f32.mrb[104].mxu1 }
 0x249   : > { %v6799_v0 = vpop.f32.mrb[105].mxu1 }
 0x24a   : > { %v8734_v1 = vadd.f32 %v6799_v0, %v6798_v62 }
 0x24c   : > { %v6801_v2 = vpop.f32.mrb[106].mxu1 }
 0x24d   : > { %v6802_v5 = vpop.f32.mrb[107].mxu1 }
 0x24e   : > { %v8736_v6 = vadd.f32 %v6802_v5, %v6801_v2 }
 0x250   : > { %v6804_v9 = vpop.f32.mrb[108].mxu1 }
 0x251   : > { %v6805_v11 = vpop.f32.mrb[109].mxu1 }
 0x252   : > { %v8738_v12 = vadd.f32 %v6805_v11, %v6804_v9  ;;  %v2869_v9 = vld [vmem:[%s9257_s4 + $0x8] sm:$0xff]  ;;  %v6135_v11 = vld [vmem:[%s9257_s4 + $0x20] sm:$0xff] }
 0x254   : > { %v6807_v15 = vpop.f32.mrb[110].mxu1 }
 0x255   : > { %v6808_v63 = vpop.f32.mrb[111].mxu1 }
 0x256   : > { %v8740_v16 = vadd.f32 %v6808_v63, %v6807_v15  ;;  %v6149_v15 = vld [vmem:[%s9257_s4 + $0x40] sm:$0xff]  ;;  %v6150_v63 = vld [vmem:[%s9257_s4 + $0x48] sm:$0xff] }
 0x28e   : > { %v6591_v17 = vpop.f32.mrb[24].mxu0 }
 0x28f   : > { %v6592_v3 = vpop.f32.mrb[25].mxu0 }
 0x290   : > { %v6593_v18 = vadd.f32 %v6592_v3, %v6591_v17  ;;  %v6157_v17 = vld [vmem:[%s9257_s4 + $0x58] sm:$0xff]  ;;  %v6130_v3 = vld [vmem:[%s9258_s5 + $0x8] sm:$0xff] }
 0x292   : > { %v6594_v22 = vpop.f32.mrb[26].mxu0  ;;  %7072 = vmatprep.mubr.msk.f32.mxu0 %vm731_vm1, %v6593_v18  ;;  %v2952_v18 = vld [vmem:[%s9258_s5] sm:$0xff] }
 0x293   : > { %v6595_v23 = vpop.f32.mrb[27].mxu0 }
 0x294   : > { %v6596_v25 = vadd.f32 %v6595_v23, %v6594_v22 }
 0x296   : > { %v6597_v30 = vpop.f32.mrb[28].mxu0  ;;  %7073 = vmatmul.mubr.msk.f32.vlgmr.msra.gmra.mrb[16].mxu0 %vm731_vm1, %v6596_v25 }
 0x297   : > { %v6598_v31 = vpop.f32.mrb[29].mxu0  ;;  %7085 = vmatpush3.msk.msra.mxu0 %vm756_vm0, %v6093_v51 }
 0x298   : > { %v6599_v35 = vadd.f32 %v6598_v31, %v6597_v30  ;;  %7098 = vmatprep.subr.msk.mxu0 %vm756_vm0, %v6103_v28  ;;  %v6139_v30 = vld [vmem:[%s9258_s5 + $0x10] sm:$0xff] }
 0x29a   : > { %v6600_v36 = vpop.f32.mrb[30].mxu0  ;;  %7075 = vmatprep.mubr.msk.f32.mxu0 %vm731_vm1, %v6599_v35 }
 0x29b   : > { %v6601_v38 = vpop.f32.mrb[31].mxu0 }
 0x29c   : > { %v6602_v41 = vadd.f32 %v6601_v38, %v6600_v36  ;;  %v6142_v36 = vld [vmem:[%s9257_s4 + $0x30] sm:$0xff]  ;;  %v6143_v38 = vld [vmem:[%s9257_s4 + $0x38] sm:$0xff] }
 0x29e   : > { %v6603_v44 = vpop.f32.mrb[32].mxu0  ;;  %7076 = vmatmul.mubr.msk.f32.gmra.mrb[18].mxu0 %vm731_vm1, %v6602_v41  ;;  %v6146_v41 = vld [vmem:[%s9258_s5 + $0x18] sm:$0xff] }
 0x29f   : > { %v6604_v47 = vpop.f32.mrb[33].mxu0 }
 0x2a0   : > { %v6605_v50 = vadd.f32 %v6604_v47, %v6603_v44 }
 0x2a2   : > { %v6606_v7 = vpop.f32.mrb[34].mxu0  ;;  %7078 = vmatprep.mubr.msk.f32.mxu0 %vm731_vm1, %v6605_v50  ;;  %v6153_v50 = vld [vmem:[%s9258_s5 + $0x20] sm:$0xff] }
 0x2a3   : > { %v6607_v13 = vpop.f32.mrb[35].mxu0 }
 0x2a4   : > { %v6608_v52 = vadd.f32 %v6607_v13, %v6606_v7 }
 0x2a6   : > { %v6609_v19 = vpop.f32.mrb[36].mxu0  ;;  %7079 = vmatmul.mubr.msk.f32.gmra.mrb[20].mxu0 %vm731_vm1, %v6608_v52  ;;  %v6170_v52 = vld [vmem:[%s9257_s4 + $0x70] sm:$0xff] }
 0x2a7   : > { %v6610_v51 = vpop.f32.mrb[37].mxu0 }
 0x2a8   : > { %v6611_v53 = vadd.f32 %v6610_v51, %v6609_v19  ;;  %v6171_v19 = vld [vmem:[%s9257_s4 + $0x78] sm:$0xff] }
 0x2aa   : > { %v6612_v26 = vpop.f32.mrb[38].mxu0  ;;  %7081 = vmatprep.mubr.msk.f32.mxu0 %vm731_vm1, %v6611_v53 }
 0x2ab   : > { %v6613_v55 = vpop.f32.mrb[39].mxu0 }
 0x2ac   : > { %v6614_v33 = vadd.f32 %v6613_v55, %v6612_v26  ;;  %v6160_v26 = vld [vmem:[%s9258_s5 + $0x28] sm:$0xff]  ;;  %v6163_v55 = vld [vmem:[%s9257_s4 + $0x60] sm:$0xff] }
 0x2ae   : > { %7082 = vmatmul.mubr.msk.f32.gmra.mrb[22].mxu0 %vm731_vm1, %v6614_v33  ;;  %v6164_v33 = vld [vmem:[%s9257_s4 + $0x68] sm:$0xff] }
 0x2af   : > { %7086 = vmatprep.mubr.msk.f32.mxu0 %vm731_vm1, %v8685_v4  ;;  %v6126_v4 = vld [vmem:[%s9257_s4 + $0x10] sm:$0xff] }
 0x2b0   : > { %7161 = vmatprep.mubr.msk.f32.mxu1 %vm2870_vm2, %v6126_v4  ;;  %v6174_v4 = vld [vmem:[%s9258_s5 + $0x38] sm:$0xff] }
 0x2b2   : > { %7087 = vmatmul.mubr.msk.f32.vlgmr.msra.gmra.mrb[16].mxu0 %vm731_vm1, %v8687_v43  ;;  %v2868_v43 = vld [vmem:[%s9257_s4] sm:$0xff] }
 0x2b3   : > { %7089 = vmatprep.mubr.msk.f32.mxu0 %vm731_vm1, %v8689_v54  ;;  %7099 = vmatpush3.msk.msra.mxu0 %vm756_vm0, %v6103_v28  ;;  %v6123_v54 = vld [vmem:[%s9256_s3] ss:$0 sm:$0xff] }
 0x2b4   : > { %7112 = vmatprep.subr.msk.mxu0 %vm756_vm0, %v6113_v34 }
 0x2b6   : > { %7090 = vmatmul.mubr.msk.f32.gmra.mrb[18].mxu0 %vm731_vm1, %v8691_v56 }
 0x2b7   : > { %7092 = vmatprep.mubr.msk.f32.mxu0 %vm731_vm1, %v8693_v10 }
 0x2ba   : > { %7093 = vmatmul.mubr.msk.f32.gmra.mrb[20].mxu0 %vm731_vm1, %v8699_v21 }
 0x2bb   : > { %7095 = vmatprep.mubr.msk.f32.mxu0 %vm731_vm1, %v8702_v24 }
 0x2be   : > { %7096 = vmatmul.mubr.msk.f32.gmra.mrb[22].mxu0 %vm731_vm1, %v8704_v29 }
 0x2bf   : > { %7100 = vmatprep.mubr.msk.f32.mxu0 %vm731_vm1, %v8706_v32 }
 0x2c2   : > { %7101 = vmatmul.mubr.msk.f32.vlgmr.msra.gmra.mrb[16].mxu0 %vm731_vm1, %v8708_v37 }
 0x2c3   : > { %7103 = vmatprep.mubr.msk.f32.mxu0 %vm731_vm1, %v8710_v42  ;;  %7113 = vmatpush3.msk.msra.mxu0 %vm756_vm0, %v6113_v34  ;;  %v6167_v34 = vld [vmem:[%s9258_s5 + $0x30] sm:$0xff] }
 0x2c6   : > { %7104 = vmatmul.mubr.msk.f32.gmra.mrb[18].mxu0 %vm731_vm1, %v8712_v48 }
 0x2c7   : > { %7106 = vmatprep.mubr.msk.f32.mxu0 %vm731_vm1, %v8717_v8 }
 0x2ca   : > { %7107 = vmatmul.mubr.msk.f32.gmra.mrb[20].mxu0 %vm731_vm1, %v8720_v14 }
 0x2cb   : > { %7109 = vmatprep.mubr.msk.f32.mxu0 %vm731_vm1, %v8722_v20 }
 0x2ce   : > { %7110 = vmatmul.mubr.msk.f32.gmra.mrb[22].mxu0 %vm731_vm1, %v8724_v27 }
 0x2cf   : > { %7114 = vmatprep.mubr.msk.f32.mxu0 %vm731_vm1, %v8726_v39 }
 0x2d2   : > { %7115 = vmatmul.mubr.msk.f32.vlgmr.msra.gmra.mrb[16].mxu0 %vm731_vm1, %v8728_v58 }
 0x2d3   : > { %7117 = vmatprep.mubr.msk.f32.mxu0 %vm731_vm1, %v8730_v46 }
 0x2d6   : > { %7118 = vmatmul.mubr.msk.f32.gmra.mrb[18].mxu0 %vm731_vm1, %v8732_v61 }
 0x2d7   : > { %7120 = vmatprep.mubr.msk.f32.mxu0 %vm731_vm1, %v8734_v1 }
 0x2da   : > { %7121 = vmatmul.mubr.msk.f32.gmra.mrb[20].mxu0 %vm731_vm1, %v8736_v6  ;;  %v6127_v6 = vld [vmem:[%s9257_s4 + $0x18] sm:$0xff] }
 0x2db   : > { %7123 = vmatprep.mubr.msk.f32.mxu0 %vm731_vm1, %v8738_v12  ;;  %v6136_v12 = vld [vmem:[%s9257_s4 + $0x28] sm:$0xff] }
 0x2de   : > { %7124 = vmatmul.mubr.msk.f32.gmra.mrb[22].mxu0 %vm731_vm1, %v8740_v16  ;;  %v6156_v16 = vld [vmem:[%s9257_s4 + $0x50] sm:$0xff] }
 0x2df   : > { %7142 = vmatprep.mubr.msk.f32.mxu0 %vm2870_vm2, %v2868_v43 }
 0x3a5   : > { %v7116_v56 = vpop.f32.mrb[16].mxu0 }
 0x3a6   : > { %v2853_v10 = vadd.f32 %v7116_v56, %v6123_v54  ;;  %v2798_v21 = vpop.f32.mrb[17].mxu0 }
 0x3a7   : > { %v2852_v24 = vadd.f32 %v6123_v54, %v2798_v21  ;;  %v6177_v21 = vld [vmem:[%s9257_s4 + $0x80] sm:$0xff] }
 0x3a8   : > { %v2861_v29 = vmax.f32 %v2853_v10, 0.0 }
 0x3a9   : > { %v2860_v32 = vmax.f32 %v2852_v24, 0.0  ;;  %v7119_v37 = vpop.f32.mrb[18].mxu0  ;;  %v6178_v24 = vld [vmem:[%s9257_s4 + $0x88] sm:$0xff] }
 0x3aa   : > { %v2855_v42 = vadd.f32 %v7119_v37, %v6123_v54  ;;  %v2808_v48 = vpop.f32.mrb[19].mxu0 }
 0x3ab   : > { %v8820_v8 = vpack.c.bf16 %v2861_v29, %v2860_v32  ;;  %v2854_v14 = vadd.f32 %v6123_v54, %v2808_v48  ;;  %v6181_v29 = vld [vmem:[%s9258_s5 + $0x40] sm:$0xff]  ;;  %v8224_v48 = vmov 0.0  }
 0x3ac   : > { %v2863_v20 = vmax.f32 %v2855_v42, 0.0  ;;  %v8222_v42 = vmov 0.0|0.0  }
 0x3ad   : > { %v2862_v27 = vmax.f32 %v2854_v14, 0.0  ;;  %v7122_v39 = vpop.f32.mrb[20].mxu0  ;;  %7779 = vmatprep.subr.bf16.mxu0 %v8820_v8  ;;  %7795 = vmatprep.subr.bf16.mxu1 %v8820_v8 }
 0x3ae   : > { %v2857_v57 = vadd.f32 %v7122_v39, %v6123_v54  ;;  %v2818_v40 = vpop.f32.mrb[21].mxu0  ;;  %7781 = vmatpush3.bf16.msra.mxu0 %v8820_v8  ;;  %7797 = vmatpush3.bf16.msra.mxu1 %v8820_v8 }
 0x3af   : > { %v8826_v58 = vpack.c.bf16 %v2863_v20, %v2862_v27  ;;  %v2856_v59 = vadd.f32 %v6123_v54, %v2818_v40 }
 0x3b0   : > { %v2865_v45 = vmax.f32 %v2857_v57, 0.0 }
 0x3b1   : > { %v2864_v46 = vmax.f32 %v2856_v59, 0.0  ;;  %v7125_v49 = vpop.f32.mrb[22].mxu0  ;;  %7783 = vmatprep.subr.bf16.mxu0 %v8826_v58  ;;  %7799 = vmatprep.subr.bf16.mxu1 %v8826_v58  ;;  %v4396_v59 = vld [vmem:[%s9260_s7] sm:$0xf] }
 0x3b2   : > { %v2859_v60 = vadd.f32 %v7125_v49, %v6123_v54  ;;  %v2828_v61 = vpop.f32.mrb[23].mxu0  ;;  %7785 = vmatpush3.bf16.msra.mxu0 %v8826_v58  ;;  %7801 = vmatpush3.bf16.msra.mxu1 %v8826_v58  ;;  %v6186_v49 = vld [vmem:[%s9260_s7 + $0x4] sm:$0xf] }
 0x3b3   : > { %v8832_v62 = vpack.c.bf16 %v2865_v45, %v2864_v46  ;;  %v2858_v0 = vadd.f32 %v6123_v54, %v2828_v61  ;;  %v6188_v45 = vld [vmem:[%s9261_s8 + $0x10] sm:$0xff]  ;;  %v6189_v46 = vld [vmem:[%s9261_s8 + $0x18] sm:$0xff]  ;;  %v4471_v61 = vld [vmem:[%s9261_s8] sm:$0xff] }
 0x3b4   : > { %v2867_v1 = vmax.f32 %v2859_v60, 0.0  ;;  %v7929_v60 = vpack.c.bf16 %v6189_v46, %v6188_v45  ;;  %v5792_v45 = vld [vmem:[%s9264_s11 + $0x8] sm:$0xff] }
 0x3b5   : > { %v2866_v2 = vmax.f32 %v2858_v0, 0.0  ;;  %7787 = vmatprep.subr.bf16.mxu0 %v8832_v62  ;;  %7803 = vmatprep.subr.bf16.mxu1 %v8832_v62 }
 0x3b6   : > { %7789 = vmatpush3.bf16.msra.mxu0 %v8832_v62  ;;  %7805 = vmatpush3.bf16.msra.mxu1 %v8832_v62 }
 0x3b7   : > { %v8838_v5 = vpack.c.bf16 %v2867_v1, %v2866_v2 }
 0x3b9   : > { %7791 = vmatprep.subr.bf16.mxu0 %v8838_v5  ;;  %7807 = vmatprep.subr.bf16.mxu1 %v8838_v5 }
 0x3ba   : > { %7793 = vmatpush3.bf16.msra.mxu0 %v8838_v5  ;;  %7809 = vmatpush3.bf16.msra.mxu1 %v8838_v5 }
 0x3bb   : > { %7811 = vmatprep.subr.bf16.mxu1 %v8820_v8  ;;  %7164 = vmatprep.subr.mxu0 %v6130_v3 }
 0x3bd   : > { %7162 = vmatmul.mubr.msk.f32.vlgmr.msra.gmra.mrb[112].mxu1 %vm2870_vm2, %v6127_v6  ;;  %7143 = vmatmul.mubr.msk.f32.vlgmr.msra.gmra.mrb[40].mxu0 %vm2870_vm2, %v2869_v9  ;;  %v6192_v9 = vld [vmem:[%s9260_s7 + $0x8] sm:$0xf] }
 0x3be   : > { %7813 = vmatpush3.bf16.msra.mxu1 %v8820_v8  ;;  %7190 = vmatprep.mubr.msk.f32.mxu1 %vm2870_vm2, %v6135_v11  ;;  %v6197_v11 = vld [vmem:[%s9260_s7 + $0xc] sm:$0xf] }
 0x3bf   : > { %7815 = vmatprep.subr.bf16.mxu1 %v8826_v58  ;;  %7165 = vmatpush3.msra.mxu0 %v6130_v3  ;;  %v6194_v3 = vld [vmem:[%s9261_s8 + $0x20] sm:$0xff] }
 0x3c0   : > { %7169 = vmatprep.subr.mxu0 %v2952_v18 }
 0x3c2   : > { %7817 = vmatpush3.bf16.msra.mxu1 %v8826_v58 }
 0x3c3   : > { %7819 = vmatprep.subr.bf16.mxu1 %v8832_v62 }
 0x3c6   : > { %7821 = vmatpush3.bf16.msra.mxu1 %v8832_v62 }
 0x3c7   : > { %7823 = vmatprep.subr.bf16.mxu1 %v8838_v5 }
 0x3ca   : > { %7825 = vmatpush3.bf16.msra.mxu1 %v8838_v5 }
 0x3cb   : > { %7843 = vmatprep.subr.bf16.mxu1 %v8820_v8 }
 0x3cd   : > { %7191 = vmatmul.mubr.msk.f32.vlgmr.msra.gmra.mrb[114].mxu1 %vm2870_vm2, %v6136_v12  ;;  %v6202_v12 = vld [vmem:[%s9260_s7 + $0x10] sm:$0xf] }
 0x3ce   : > { %7845 = vmatpush3.bf16.msra.mxu1 %v8820_v8  ;;  %7238 = vmatprep.mubr.msk.f32.mxu1 %vm2870_vm2, %v6149_v15  ;;  %v6207_v15 = vld [vmem:[%s9260_s7 + $0x14] sm:$0xf] }
 0x3cf   : > { %7847 = vmatprep.subr.bf16.mxu1 %v8826_v58 }
 0x3d2   : > { %7849 = vmatpush3.bf16.msra.mxu1 %v8826_v58 }
 0x3d3   : > { %7851 = vmatprep.subr.bf16.mxu1 %v8832_v62 }
 0x3d6   : > { %7853 = vmatpush3.bf16.msra.mxu1 %v8832_v62 }
 0x3d7   : > { %7855 = vmatprep.subr.bf16.mxu1 %v8838_v5 }
 0x3da   : > { %7857 = vmatpush3.bf16.msra.mxu1 %v8838_v5 }
 0x3db   : > { %7859 = vmatprep.subr.bf16.mxu1 %v8820_v8 }
 0x3dd   : > { %7239 = vmatmul.mubr.msk.f32.vlgmr.msra.gmra.mrb[116].mxu1 %vm2870_vm2, %v6150_v63  ;;  %v6212_v63 = vld [vmem:[%s9260_s7 + $0x18] sm:$0xf] }
 0x3de   : > { %7861 = vmatpush3.bf16.msra.mxu1 %v8820_v8  ;;  %7262 = vmatprep.mubr.msk.f32.mxu1 %vm2870_vm2, %v6156_v16  ;;  %v6217_v16 = vld [vmem:[%s9260_s7 + $0x1c] sm:$0xf] }
 0x3df   : > { %7863 = vmatprep.subr.bf16.mxu1 %v8826_v58 }
 0x3e2   : > { %7865 = vmatpush3.bf16.msra.mxu1 %v8826_v58 }
 0x3e3   : > { %7867 = vmatprep.subr.bf16.mxu1 %v8832_v62 }
 0x3e6   : > { %7869 = vmatpush3.bf16.msra.mxu1 %v8832_v62 }
 0x3e7   : > { %7871 = vmatprep.subr.bf16.mxu1 %v8838_v5 }
 0x3ea   : > { %7873 = vmatpush3.bf16.msra.mxu1 %v8838_v5 }
 0x3eb   : > { %7891 = vmatprep.subr.bf16.mxu1 %v8820_v8 }
 0x3ed   : > { %7263 = vmatmul.mubr.msk.f32.vlgmr.msra.gmra.mrb[118].mxu1 %vm2870_vm2, %v6157_v17  ;;  %v6222_v17 = vld [vmem:[%s9260_s7 + $0x20] sm:$0xf] }
 0x3ee   : > { %7893 = vmatpush3.bf16.msra.mxu1 %v8820_v8  ;;  %7310 = vmatprep.mubr.msk.f32.mxu1 %vm2870_vm2, %v6170_v52  ;;  %v6210_v52 = vld [vmem:[%s9261_s8 + $0x58] sm:$0xff] }
 0x3ef   : > { %7895 = vmatprep.subr.bf16.mxu1 %v8826_v58 }
 0x3f2   : > { %7897 = vmatpush3.bf16.msra.mxu1 %v8826_v58 }
 0x3f3   : > { %7899 = vmatprep.subr.bf16.mxu1 %v8832_v62 }
 0x3f6   : > { %7901 = vmatpush3.bf16.msra.mxu1 %v8832_v62 }
 0x3f7   : > { %7903 = vmatprep.subr.bf16.mxu1 %v8838_v5 }
 0x3fa   : > { %7905 = vmatpush3.bf16.msra.mxu1 %v8838_v5 }
 0x3fb   : > { %7922 = vmatprep.subr.bf16.mxu1 %v8222_v42 }
 0x3fd   : > { %7311 = vmatmul.mubr.msk.f32.vlgmr.msra.gmra.mrb[120].mxu1 %vm2870_vm2, %v6171_v19 }
 0x3fe   : > { %7346 = vmatprep.mubr.msk.f32.mxu1 %vm8223_vm4, %v8224_v48 }
 0x490   : > { %v7163_v22 = vpop.f32.mrb[112].mxu1  ;;  %v7144_v23 = vpop.f32.mrb[40].mxu0 }
 0x491   : > { %v3028_v25 = vpop.f32.mrb[113].mxu1  ;;  %v2943_v28 = vpop.f32.mrb[41].mxu0 }
 0x492   : > { %7166 = vmatprep.mubr.msk.f32.mxu0 %vm3039_vm3, %v3028_v25 }
 0x493   : > { %7167 = vmatmul.mubr.msk.f32.vlgmr.msra.gmra.mrb[42].mxu0 %vm3039_vm3, %v7163_v22 }
 0x494   : > { %7170 = vmatpush3.msra.mxu0 %v2952_v18  ;;  %7171 = vmatprep.mubr.msk.f32.mxu0 %vm3039_vm3, %v2943_v28  ;;  %v6195_v18 = vld [vmem:[%s9261_s8 + $0x28] sm:$0xff]  ;;  %v6199_v28 = vld [vmem:[%s9261_s8 + $0x30] sm:$0xff] }
 0x495   : > { %7193 = vmatprep.subr.mxu0 %v6139_v30  ;;  %v7938_v22 = vpack.c.bf16 %v6195_v18, %v6194_v3 }
 0x49b   : > { %7172 = vmatmul.mubr.msk.f32.vlgmr.msra.gmra.mrb[42].mxu0 %vm3039_vm3, %v7144_v23 }
 0x49c   : > { %7194 = vmatpush3.msra.mxu0 %v6139_v30  ;;  %v6200_v30 = vld [vmem:[%s9261_s8 + $0x38] sm:$0xff] }
 0x49d   : > { %7827 = vmatprep.subr.bf16.mxu0 %v8820_v8 }
 0x4a0   : > { %v7192_v31 = vpop.f32.mrb[114].mxu1 }
 0x4a1   : > { %v3277_v35 = vpop.f32.mrb[115].mxu1 }
 0x4a2   : > { %7195 = vmatprep.mubr.msk.f32.mxu0 %vm3039_vm3, %v3277_v35 }
 0x4a3   : > { %7196 = vmatmul.mubr.msk.f32.vlgmr.msra.gmra.mrb[42].mxu0 %vm3039_vm3, %v7192_v31 }
 0x4a4   : > { %7829 = vmatpush3.bf16.msra.mxu0 %v8820_v8  ;;  %7214 = vmatprep.mubr.msk.f32.mxu0 %vm2870_vm2, %v6142_v36 }
 0x4a5   : > { %7831 = vmatprep.subr.bf16.mxu0 %v8826_v58 }
 0x4a8   : > { %7833 = vmatpush3.bf16.msra.mxu0 %v8826_v58 }
 0x4a9   : > { %7835 = vmatprep.subr.bf16.mxu0 %v8832_v62 }
 0x4ac   : > { %7837 = vmatpush3.bf16.msra.mxu0 %v8832_v62 }
 0x4ad   : > { %7839 = vmatprep.subr.bf16.mxu0 %v8838_v5 }
 0x4b0   : > { %7841 = vmatpush3.bf16.msra.mxu0 %v8838_v5  ;;  %v7240_v44 = vpop.f32.mrb[116].mxu1 }
 0x4b1   : > { %7217 = vmatprep.subr.mxu0 %v6146_v41  ;;  %v3615_v47 = vpop.f32.mrb[117].mxu1 }
 0x4b3   : > { %7215 = vmatmul.mubr.msk.f32.vlgmr.msra.gmra.mrb[44].mxu0 %vm2870_vm2, %v6143_v38  ;;  %v7944_v38 = vpack.c.bf16 %v6200_v30, %v6199_v28 }
 0x4b4   : > { %7218 = vmatpush3.msra.mxu0 %v6146_v41  ;;  %v6204_v41 = vld [vmem:[%s9261_s8 + $0x40] sm:$0xff] }
 0x4b5   : > { %7241 = vmatprep.subr.mxu0 %v6153_v50 }
 0x4c0   : > { %v7264_v7 = vpop.f32.mrb[118].mxu1 }
 0x4c1   : > { %v3784_v13 = vpop.f32.mrb[119].mxu1 }
 0x4d0   : > { %v7312_v43 = vpop.f32.mrb[120].mxu1 }
 0x4d1   : > { %v4122_v54 = vpop.f32.mrb[121].mxu1 }
 0x586   : > { %v7216_v51 = vpop.f32.mrb[44].mxu0 }
 0x587   : > { %v3446_v53 = vpop.f32.mrb[45].mxu0 }
 0x588   : > { %7219 = vmatprep.mubr.msk.f32.mxu0 %vm3039_vm3, %v3446_v53 }
 0x589   : > { %7220 = vmatmul.mubr.msk.f32.vlgmr.msra.gmra.mrb[42].mxu0 %vm3039_vm3, %v7216_v51 }
 0x58a   : > { %7242 = vmatpush3.msra.mxu0 %v6153_v50  ;;  %7243 = vmatprep.mubr.msk.f32.mxu0 %vm3039_vm3, %v3615_v47 }
 0x58b   : > { %7265 = vmatprep.subr.mxu0 %v6160_v26 }
 0x591   : > { %7244 = vmatmul.mubr.msk.f32.vlgmr.msra.gmra.mrb[42].mxu0 %vm3039_vm3, %v7240_v44  ;;  %v6205_v44 = vld [vmem:[%s9261_s8 + $0x48] sm:$0xff] }
 0x592   : > { %7266 = vmatpush3.msra.mxu0 %v6160_v26  ;;  %7267 = vmatprep.mubr.msk.f32.mxu0 %vm3039_vm3, %v3784_v13  ;;  %v6209_v13 = vld [vmem:[%s9261_s8 + $0x50] sm:$0xff]  ;;  %v6214_v26 = vld [vmem:[%s9261_s8 + $0x60] sm:$0xff] }
 0x593   : > { %7875 = vmatprep.subr.bf16.mxu0 %v8820_v8  ;;  %v7956_v53 = vpack.c.bf16 %v6210_v52, %v6209_v13 }
 0x599   : > { %7268 = vmatmul.mubr.msk.f32.vlgmr.msra.gmra.mrb[42].mxu0 %vm3039_vm3, %v7264_v7  ;;  %v7950_v7 = vpack.c.bf16 %v6205_v44, %v6204_v41 }
 0x59a   : > { %7877 = vmatpush3.bf16.msra.mxu0 %v8820_v8  ;;  %7286 = vmatprep.mubr.msk.f32.mxu0 %vm2870_vm2, %v6163_v55  ;;  %v6215_v55 = vld [vmem:[%s9261_s8 + $0x68] sm:$0xff] }
 0x59b   : > { %7879 = vmatprep.subr.bf16.mxu0 %v8826_v58 }
 0x59e   : > { %7881 = vmatpush3.bf16.msra.mxu0 %v8826_v58 }
 0x59f   : > { %7883 = vmatprep.subr.bf16.mxu0 %v8832_v62 }
 0x5a2   : > { %7885 = vmatpush3.bf16.msra.mxu0 %v8832_v62 }
 0x5a3   : > { %7887 = vmatprep.subr.bf16.mxu0 %v8838_v5 }
 0x5a6   : > { %7889 = vmatpush3.bf16.msra.mxu0 %v8838_v5 }
 0x5a7   : > { %7289 = vmatprep.subr.mxu0 %v6167_v34 }
 0x5a9   : > { %7287 = vmatmul.mubr.msk.f32.vlgmr.msra.gmra.mrb[46].mxu0 %vm2870_vm2, %v6164_v33 }
 0x5aa   : > { %7290 = vmatpush3.msra.mxu0 %v6167_v34 }
 0x5ab   : > { %7313 = vmatprep.subr.mxu0 %v6174_v4 }
 0x67c   : > { %v7288_v56 = vpop.f32.mrb[46].mxu0 }
 0x67d   : > { %v3953_v10 = vpop.f32.mrb[47].mxu0 }
 0x67e   : > { %7291 = vmatprep.mubr.msk.f32.mxu0 %vm3039_vm3, %v3953_v10 }
 0x67f   : > { %7292 = vmatmul.mubr.msk.f32.vlgmr.msra.gmra.mrb[42].mxu0 %vm3039_vm3, %v7288_v56 }
 0x680   : > { %7314 = vmatpush3.msra.mxu0 %v6174_v4  ;;  %7315 = vmatprep.mubr.msk.f32.mxu0 %vm3039_vm3, %v4122_v54  ;;  %v7962_v4 = vpack.c.bf16 %v6215_v55, %v6214_v26  ;;  %v6220_v54 = vld [vmem:[%s9261_s8 + $0x78] sm:$0xff] }
 0x681   : > { %7907 = vmatprep.subr.bf16.mxu0 %v8820_v8 }
 0x687   : > { %7316 = vmatmul.mubr.msk.f32.vlgmr.msra.gmra.mrb[42].mxu0 %vm3039_vm3, %v7312_v43  ;;  %v6219_v43 = vld [vmem:[%s9261_s8 + $0x70] sm:$0xff] }
 0x688   : > { %7909 = vmatpush3.bf16.msra.mxu0 %v8820_v8  ;;  %7334 = vmatprep.mubr.msk.f32.mxu0 %vm2870_vm2, %v6177_v21  ;;  %v6184_v8 = vld [vmem:[%s9259_s6] ss:$0 sm:$0xff]  ;;  %v7968_v21 = vpack.c.bf16 %v6220_v54, %v6219_v43 }
 0x689   : > { %7911 = vmatprep.subr.bf16.mxu0 %v8826_v58 }
 0x68c   : > { %7913 = vmatpush3.bf16.msra.mxu0 %v8826_v58 }
 0x68d   : > { %7915 = vmatprep.subr.bf16.mxu0 %v8832_v62 }
 0x690   : > { %7917 = vmatpush3.bf16.msra.mxu0 %v8832_v62  ;;  %v4472_v62 = vld [vmem:[%s9261_s8 + $0x8] sm:$0xff] }
 0x691   : > { %7919 = vmatprep.subr.bf16.mxu0 %v8838_v5  ;;  %v7932_v2 = vpack.c.bf16 %v4472_v62, %v4471_v61  ;;  %v5793_v61 = vld [vmem:[%s9264_s11 + $0x10] sm:$0xff]  ;;  %v5794_v62 = vld [vmem:[%s9264_s11 + $0x18] sm:$0xff] }
 0x694   : > { %7921 = vmatpush3.bf16.msra.mxu0 %v8838_v5 }
 0x695   : > { %7337 = vmatprep.subr.mxu0 %v6181_v29 }
 0x697   : > { %7335 = vmatmul.mubr.msk.f32.vlgmr.msra.gmra.mrb[48].mxu0 %vm2870_vm2, %v6178_v24  ;;  %v6224_v24 = vld [vmem:[%s9261_s8 + $0x80] sm:$0xff] }
 0x698   : > { %7338 = vmatpush3.msra.mxu0 %v6181_v29  ;;  %v6225_v29 = vld [vmem:[%s9261_s8 + $0x88] sm:$0xff] }
 0x699   : > { %7937 = vmatprep.subr.bf16.mxu0 %v8222_v42 }
 0x76a   : > { %v7336_v32 = vpop.f32.mrb[48].mxu0 }
 0x76b   : > { %v4291_v37 = vpop.f32.mrb[49].mxu0 }
 0x76c   : > { %7339 = vmatprep.mubr.msk.f32.mxu0 %vm3039_vm3, %v4291_v37 }
 0x76d   : > { %7340 = vmatmul.mubr.msk.f32.vlgmr.msra.gmra.mrb[42].mxu0 %vm3039_vm3, %v7336_v32 }
 0x76e   : > { %7381 = vmatprep.mubr.msk.f32.mxu0 %vm8223_vm4, %v8224_v48  ;;  %7939 = vmatpush3.bf16.msra.mxu0 %v7938_v22 }
 0x76f   : > { %7943 = vmatprep.subr.bf16.mxu0 %v8222_v42 }
 0x840   : > { %v7341_v14 = vpop.f32.mrb[42].mxu0 }
 0x841   : > { %v4393_v20 = vadd.f32 %v7341_v14, %v6184_v8  ;;  %v4374_v27 = vpop.f32.mrb[43].mxu0 }
 0x842   : > { %v4392_v39 = vadd.f32 %v6184_v8, %v4374_v27  ;;  %v7974_v8 = vpack.c.bf16 %v6225_v29, %v6224_v24 }
 0x843   : > { %v4395_v57 = vmax.f32 %v4393_v20, 0.0 }
 0x844   : > { %v4394_v40 = vmax.f32 %v4392_v39, 0.0 }
 0x846   : > { %v7923_v58 = vpack.c.bf16 %v4395_v57, %v4394_v40  ;;  %v5787_v57 = vld [vmem:[%s9263_s10] sm:$0xff]  ;;  %v5788_v40 = vld [vmem:[%s9263_s10 + $0x8] sm:$0xff] }
 0x848   : > { %7924 = vmatpush3.bf16.msra.mxu1 %v7923_v58 }
 0x849   : > { %7925 = vmatprep.subr.bf16.mxu1 %v8222_v42 }
 0x84b   : > { %7347 = vmatmul.mubr.msk.f32.vlgmr.msra.gmra.mrb[122].mxu1 %vm4397_vm5, %v4396_v59  ;;  %v5791_v59 = vld [vmem:[%s9264_s11] sm:$0xff] }
 0x84c   : > { %7927 = vmatpush3.bf16.msra.mxu1 %v7923_v58  ;;  %7353 = vmatprep.mubr.msk.f32.mxu1 %vm8223_vm4, %v8224_v48  ;;  %v7977_v46 = vpack.c.bf16 %v5792_v45, %v5791_v59 }
 0x84d   : > { %7928 = vmatprep.subr.bf16.mxu1 %v8222_v42 }
 0x84f   : > { %7354 = vmatmul.mubr.msk.f32.vlgmr.msra.gmra.mrb[124].mxu1 %vm4397_vm5, %v6186_v49  ;;  %v5790_v49 = vld [vmem:[%s9263_s10 + $0x18] sm:$0xff] }
 0x850   : > { %7930 = vmatpush3.bf16.msra.mxu1 %v7929_v60  ;;  %7360 = vmatprep.mubr.msk.f32.mxu1 %vm8223_vm4, %v8224_v48 }
 0x851   : > { %7931 = vmatprep.subr.bf16.mxu1 %v8222_v42 }
 0x91e   : > { %v4467_v0 = vpop.f32.mrb[122].mxu1 }
 0x91f   : > { %v7348_v1 = vpop.f32.mrb[123].mxu1 }
 0x922   : > { %v4544_v5 = vpop.f32.mrb[124].mxu1 }
 0x923   : > { %7361 = vmatmul.mubr.msk.f32.vlgmr.msra.gmra.mrb[126].mxu1 %vm4397_vm5, %v4544_v5  ;;  %v7355_v6 = vpop.f32.mrb[125].mxu1 }
 0x924   : > { %7933 = vmatpush3.bf16.msra.mxu1 %v7932_v2  ;;  %7367 = vmatprep.mubr.msk.f32.mxu1 %vm8223_vm4, %v8224_v48 }
 0x925   : > { %7934 = vmatprep.subr.bf16.mxu1 %v8222_v42 }
 0x927   : > { %7368 = vmatmul.mubr.msk.f32.vlgmr.msra.gmra.mrb[128].mxu1 %vm4397_vm5, %v4467_v0  ;;  %v7980_v0 = vpack.c.bf16 %v5794_v62, %v5793_v61 }
 0x928   : > { %7936 = vmatpush3.bf16.msra.mxu1 %v7923_v58  ;;  %7374 = vmatprep.mubr.msk.f32.mxu1 %vm8223_vm4, %v8224_v48 }
 0x929   : > { %7940 = vmatprep.subr.bf16.mxu1 %v8222_v42 }
 0x92b   : > { %7375 = vmatmul.mubr.msk.f32.vlgmr.msra.gmra.mrb[130].mxu1 %vm4397_vm5, %v6192_v9 }
 0x92c   : > { %7942 = vmatpush3.bf16.msra.mxu1 %v7923_v58  ;;  %7388 = vmatprep.mubr.msk.f32.mxu1 %vm8223_vm4, %v8224_v48 }
 0x92d   : > { %7946 = vmatprep.subr.bf16.mxu1 %v8222_v42 }
 0x92f   : > { %7389 = vmatmul.mubr.msk.f32.vlgmr.msra.gmra.mrb[132].mxu1 %vm4397_vm5, %v6197_v11 }
 0x930   : > { %7948 = vmatpush3.bf16.msra.mxu1 %v7923_v58  ;;  %7402 = vmatprep.mubr.msk.f32.mxu1 %vm8223_vm4, %v8224_v48 }
 0x931   : > { %7952 = vmatprep.subr.bf16.mxu1 %v8222_v42 }
 0x933   : > { %7403 = vmatmul.mubr.msk.f32.vlgmr.msra.gmra.mrb[134].mxu1 %vm4397_vm5, %v6202_v12 }
 0x934   : > { %7954 = vmatpush3.bf16.msra.mxu1 %v7923_v58  ;;  %7416 = vmatprep.mubr.msk.f32.mxu1 %vm8223_vm4, %v8224_v48 }
 0x935   : > { %7958 = vmatprep.subr.bf16.mxu1 %v8222_v42 }
 0x937   : > { %7417 = vmatmul.mubr.msk.f32.vlgmr.msra.gmra.mrb[136].mxu1 %vm4397_vm5, %v6207_v15 }
 0x938   : > { %7960 = vmatpush3.bf16.msra.mxu1 %v7923_v58  ;;  %7430 = vmatprep.mubr.msk.f32.mxu1 %vm8223_vm4, %v8224_v48 }
 0x939   : > { %7964 = vmatprep.subr.bf16.mxu1 %v8222_v42 }
 0x93b   : > { %7431 = vmatmul.mubr.msk.f32.vlgmr.msra.gmra.mrb[138].mxu1 %vm4397_vm5, %v6212_v63 }
 0x93c   : > { %7966 = vmatpush3.bf16.msra.mxu1 %v7923_v58  ;;  %7444 = vmatprep.mubr.msk.f32.mxu1 %vm8223_vm4, %v8224_v48 }
 0x93d   : > { %7970 = vmatprep.subr.bf16.mxu1 %v8222_v42 }
 0x93f   : > { %7445 = vmatmul.mubr.msk.f32.vlgmr.msra.gmra.mrb[140].mxu1 %vm4397_vm5, %v6217_v16 }
 0x940   : > { %7972 = vmatpush3.bf16.msra.mxu1 %v7923_v58  ;;  %7458 = vmatprep.mubr.msk.f32.mxu1 %vm8223_vm4, %v8224_v48  ;;  %v7983_v58 = vpack.c.bf16 %v5788_v40, %v5787_v57 }
 0x941   : > { %7976 = vmatprep.subr.bf16.mxu1 %v8222_v42 }
 0x943   : > { %7459 = vmatmul.mubr.msk.f32.vlgmr.msra.gmra.mrb[142].mxu1 %vm4397_vm5, %v6222_v17 }
 0x944   : > { %7476 = vmatprep.mubr.msk.f32.mxu1 %vm8223_vm4, %v8224_v48  ;;  %7978 = vmatpush3.bf16.msra.mxu1 %v7977_v46 }
 0x945   : > { %7979 = vmatprep.subr.bf16.mxu1 %v8222_v42 }
 0x948   : > { %7981 = vmatpush3.bf16.msra.mxu1 %v7980_v0 }
 0x9f6   : > { %v4620_v23 = vpop.f32.mrb[126].mxu1 }
 0x9f7   : > { %v7362_v25 = vpop.f32.mrb[127].mxu1 }
 0x9fa   : > { %v4693_v31 = vpop.f32.mrb[128].mxu1 }
 0x9fb   : > { %v9114_v35 = vadd.f32 %v4693_v31, %v4620_v23  ;;  %v7369_v36 = vpop.f32.mrb[129].mxu1  ;;  %v6227_v31 = vld [vmem:[%s9262_s9] ss:$0 sm:$0xff] }
 0x9fe   : > { %v4768_v47 = vpop.f32.mrb[130].mxu1 }
 0x9ff   : > { %7382 = vmatmul.mubr.msk.f32.vlgmr.msra.gmra.mrb[50].mxu0 %vm4397_vm5, %v4768_v47  ;;  %v7376_v50 = vpop.f32.mrb[131].mxu1 }
 0xa00   : > { %7945 = vmatpush3.bf16.msra.mxu0 %v7944_v38  ;;  %7395 = vmatprep.mubr.msk.f32.mxu0 %vm8223_vm4, %v8224_v48 }
 0xa01   : > { %7949 = vmatprep.subr.bf16.mxu0 %v8222_v42 }
 0xa02   : > { %v4920_v19 = vpop.f32.mrb[132].mxu1 }
 0xa03   : > { %7396 = vmatmul.mubr.msk.f32.vlgmr.msra.gmra.mrb[52].mxu0 %vm4397_vm5, %v4920_v19  ;;  %v7390_v51 = vpop.f32.mrb[133].mxu1 }
 0xa04   : > { %7951 = vmatpush3.bf16.msra.mxu0 %v7950_v7  ;;  %7409 = vmatprep.mubr.msk.f32.mxu0 %vm8223_vm4, %v8224_v48 }
 0xa05   : > { %7955 = vmatprep.subr.bf16.mxu0 %v8222_v42 }
 0xa06   : > { %v5072_v33 = vpop.f32.mrb[134].mxu1 }
 0xa07   : > { %7410 = vmatmul.mubr.msk.f32.vlgmr.msra.gmra.mrb[54].mxu0 %vm4397_vm5, %v5072_v33  ;;  %v7404_v34 = vpop.f32.mrb[135].mxu1 }
 0xa08   : > { %7957 = vmatpush3.bf16.msra.mxu0 %v7956_v53  ;;  %7423 = vmatprep.mubr.msk.f32.mxu0 %vm8223_vm4, %v8224_v48 }
 0xa09   : > { %7961 = vmatprep.subr.bf16.mxu0 %v8222_v42 }
 0xa0a   : > { %v5224_v56 = vpop.f32.mrb[136].mxu1 }
 0xa0b   : > { %7424 = vmatmul.mubr.msk.f32.vlgmr.msra.gmra.mrb[56].mxu0 %vm4397_vm5, %v5224_v56  ;;  %v7418_v10 = vpop.f32.mrb[137].mxu1 }
 0xa0c   : > { %7963 = vmatpush3.bf16.msra.mxu0 %v7962_v4  ;;  %7437 = vmatprep.mubr.msk.f32.mxu0 %vm8223_vm4, %v8224_v48 }
 0xa0d   : > { %7967 = vmatprep.subr.bf16.mxu0 %v8222_v42 }
 0xa0e   : > { %v5376_v32 = vpop.f32.mrb[138].mxu1 }
 0xa0f   : > { %7438 = vmatmul.mubr.msk.f32.vlgmr.msra.gmra.mrb[58].mxu0 %vm4397_vm5, %v5376_v32  ;;  %v7432_v37 = vpop.f32.mrb[139].mxu1 }
 0xa10   : > { %7969 = vmatpush3.bf16.msra.mxu0 %v7968_v21  ;;  %7451 = vmatprep.mubr.msk.f32.mxu0 %vm8223_vm4, %v8224_v48  ;;  %v5942_v21 = vld [vmem:[%s9265_s12] sm:$0x1] }
 0xa11   : > { %7973 = vmatprep.subr.bf16.mxu0 %v8222_v42 }
 0xa12   : > { %v5528_v14 = vpop.f32.mrb[140].mxu1 }
 0xa13   : > { %7452 = vmatmul.mubr.msk.f32.vlgmr.msra.gmra.mrb[60].mxu0 %vm4397_vm5, %v5528_v14  ;;  %v7446_v20 = vpop.f32.mrb[141].mxu1 }
 0xa14   : > { %7975 = vmatpush3.bf16.msra.mxu0 %v7974_v8  ;;  %7465 = vmatprep.mubr.msk.f32.mxu0 %vm8223_vm4, %v8224_v48 }
 0xa15   : > { %7982 = vmatprep.subr.bf16.mxu0 %v8222_v42 }
 0xa16   : > { %v5680_v27 = vpop.f32.mrb[142].mxu1 }
 0xa17   : > { %7466 = vmatmul.mubr.msk.f32.vlgmr.msra.gmra.mrb[62].mxu0 %vm4397_vm5, %v5680_v27  ;;  %v7460_v39 = vpop.f32.mrb[143].mxu1 }
 0xa18   : > { %7487 = vmatprep.mubr.msk.f32.mxu0 %vm8223_vm4, %v8224_v48  ;;  %7984 = vmatpush3.bf16.msra.mxu0 %v7983_v58  ;;  %v5789_v48 = vld [vmem:[%s9263_s10 + $0x10] sm:$0xff] }
 0xa19   : > { %7985 = vmatprep.subr.bf16.mxu0 %v8222_v42  ;;  %v7986_v60 = vpack.c.bf16 %v5790_v49, %v5789_v48 }
 0xa1c   : > { %7987 = vmatpush3.bf16.msra.mxu0 %v7986_v60 }
 0xad2   : > { %v4844_v1 = vpop.f32.mrb[50].mxu0 }
 0xad3   : > { %v4848_v2 = vadd.f32 %v4844_v1, %v9114_v35  ;;  %v7383_v5 = vpop.f32.mrb[51].mxu0 }
 0xad6   : > { %v4996_v6 = vpop.f32.mrb[52].mxu0 }
 0xad7   : > { %v5000_v9 = vadd.f32 %v4996_v6, %v4848_v2  ;;  %v7397_v11 = vpop.f32.mrb[53].mxu0 }
 0xada   : > { %v5148_v12 = vpop.f32.mrb[54].mxu0 }
 0xadb   : > { %v5152_v42 = vadd.f32 %v5148_v12, %v5000_v9  ;;  %v7411_v15 = vpop.f32.mrb[55].mxu0 }
 0xade   : > { %v5300_v63 = vpop.f32.mrb[56].mxu0 }
 0xadf   : > { %v5304_v16 = vadd.f32 %v5300_v63, %v5152_v42  ;;  %v7425_v17 = vpop.f32.mrb[57].mxu0 }
 0xae2   : > { %v5452_v3 = vpop.f32.mrb[58].mxu0 }
 0xae3   : > { %v5456_v18 = vadd.f32 %v5452_v3, %v5304_v16  ;;  %v7439_v22 = vpop.f32.mrb[59].mxu0 }
 0xae6   : > { %v5604_v23 = vpop.f32.mrb[60].mxu0 }
 0xae7   : > { %v5608_v25 = vadd.f32 %v5604_v23, %v5456_v18  ;;  %v7453_v28 = vpop.f32.mrb[61].mxu0 }
 0xaea   : > { %v5756_v30 = vpop.f32.mrb[62].mxu0 }
 0xaeb   : > { %v5760_v35 = vadd.f32 %v5756_v30, %v5608_v25  ;;  %v7467_v36 = vpop.f32.mrb[63].mxu0 }
 0xaed   : > { %v5768_v38 = vadd.f32 %v6227_v31, %v5760_v35 }
 0xaef   : > { %v5769_v41 = vmax.f32 %v5768_v38, 0.0 }
 0xaf1   : > { %v5771_v44 = vsel %vm5770_vm6, %v5769_v41, -inf  ;;  %v5778_v47 = vsel %vm5770_vm6, %v5769_v41, 0.0 }
 0xaf2   : > { %v5772_v50 = vrot.slane %v5771_v44, 4  ;;  %v5779_v7 = vrot.slane %v5778_v47, 4 }
 0xaf4   : > { %v5773_v13 = vmax.f32 %v5771_v44, %v5772_v50  ;;  %v5780_v52 = vadd.f32 %v5779_v7, %v5778_v47 }
 0xaf6   : > { %v5774_v19 = vrot.slane %v5773_v13, 2  ;;  %v5781_v51 = vrot.slane %v5780_v52, 2 }
 0xaf8   : > { %v5775_v53 = vmax.f32 %v5773_v13, %v5774_v19  ;;  %v5782_v26 = vadd.f32 %v5781_v51, %v5780_v52 }
 0xafa   : > { %v5776_v55 = vrot.slane %v5775_v53, 1  ;;  %v5783_v33 = vrot.slane %v5782_v26, 1 }
 0xafc   : > { %v5777_v34 = vmax.f32 %v5775_v53, %v5776_v55  ;;  %v5784_v4 = vadd.f32 %v5783_v33, %v5782_v26 }
 0xafe   : > { %v5786_v43 = vmul.f32 0.25, %v5784_v4  ;;  %7488 = vmatmul.mubr.msk.f32.vlgmr.msra.gmra.mrb[64].mxu0 %vm5795_vm7, %v5777_v34 }
 0xb00   : > { %7477 = vmatmul.mubr.msk.f32.vlgmr.msra.gmra.mrb[144].mxu1 %vm5795_vm7, %v5786_v43 }
 0xbd1   : > { %v5938_v54 = vpop.f32.mrb[64].mxu0 }
 0xbd2   : > { %v7489_v56 = vpop.f32.mrb[65].mxu0 }
 0xbd3   : > { %v5865_v10 = vpop.f32.mrb[144].mxu1 }
 0xbd4   : > { %v5939_v24 = vadd.f32 %v5938_v54, %v5865_v10  ;;  %v7478_v29 = vpop.f32.mrb[145].mxu1 }
 0xbd6   : > { %v5943_v32 = vadd.f32 %v5942_v21, %v5939_v24 }
 0xbd8   : > { %5945 = vst.msk [vmem:[%s447_s23] sm:$0x1] %vm5944_vm8, %v5943_v32 }
 0xbd9   : > { %8164 = shalt.err (!%p8161_p7)
}
 0xbda   : > { %s8165_s16 = scalar_lea.hbm %s9211_s17, 16  ;;  %s8169_s20 = scalar_lea.hbm %s9266_s13, 32 }
 0xbdb   : > { %p8166_p8 = scmp.ne.s32.totalorder %s9211_s17, %s8165_s16  ;;  %p8170_p1 = scmp.lt.u32.totalorder %s9211_s17, %s9266_s13 }
 0xbdc   : > { %p8171_p0 = scmp.lt.u32.totalorder %s8169_s20, %s8165_s16  ;;  %p8173_p6 = scmp.lt.u32.totalorder %s8165_s16, %s9211_s17 }
 0xbdd   : > { %p8167_p11 = pnand %p8166_p8, %p9283_p9 }
 0xbde   : > { %p8172_p5 = por %p8171_p0, %p8170_p1 }
 0xbdf   : > { %p8168_p13 = pneg %p8167_p11 }
 0xbe0   : > { %p8174_p10 = por %p8173_p6, %p8172_p5 }
 0xbe2   : > { %p8175_p12 = pnand %p8174_p10, %p8168_p13 }
 0xbe4   : > { %8178 = shalt.err (!%p8175_p12)
}
 0xbe5   : > { %8072 = dma.vmem_to_hbm [thread:$0]  (%p9283_p9), %s9213_s21, 16, %s9211_s17, %s5947_s24  }
 0xbe6 PF: > { %p8084_p2 = scmp.ge.s32.totalorder %s8217_s28, 2  ;;  %s5971_s30 = sand.u32 1, %s8205_s25  }
 0xbe7   : > { %p9284_p3 = scmp.ne.s32.totalorder %s9277_s19, 0  ;;  %s5972_s27 = scalar_lea.sflag [#allocation4], %s5971_s30 }
 0xbe9   : > { %p8079_p4 = pnand %p8084_p2, %p9284_p3 }
 0xbeb   : > { %8200 = dma.done.wait (!%p8079_p4), %s5972_s27, 16  }
 0xbec   : > { %8202 = vsyncadd (!%p8079_p4), %s5972_s27, 4294967280  ;;  %s9285_s28 = sld [smem:[#allocation9_spill]]  ;;  %s9286_s14 = sld [smem:[#allocation8_spill]] }
 0xbed   : > { %s9287_s27 = sld [smem:[#allocation10_spill]]  ;;  %s9288_s25 = smov %s8209_s26 }
 0xbf2   : > { %p24_p7 = scmp.ge.s32.totalorder %s9285_s28, 4   ;;  %s9289_s26 = smov %s9286_s14 }
 0xbf4   :  { %26 = sbr.rel (!%p24_p7) target bundleno = 4 (0x4), region = 160 }
 0xbfb   :  { %5976 = vsyncpa [#allocation3], 1 }
 0xbfc   :  { %5978 = vsyncpa [#allocation3 + $0x1], 1 }
 0xbfd   :  { %5979 = vsyncpa [#allocation4], 1 }
 0xbfe   :  { %5981 = vsyncpa [#allocation4 + $0x1], 1 }

</bundles_post_ra>
